<compile_context>
chip_gen: v5e
topology: v5e:2x2
jax: 0.10.0
libtpu: 0.0.40
codegen_flags: <defaults>
</compile_context>

<pallas_src>
import functools

import jax
import jax.numpy as jnp
from jax import lax
from jax.experimental import pallas as pl
from jax.experimental.pallas import tpu as pltpu


def _round_up(x, m):
    return (x + m - 1) // m * m


def _conv_rowblock_kernel(x_ref, w_ref, b_ref, o_ref, acc_ref, xs_ref, *,
                          K, WP, TH, out_scale, bias_scale):
    """One grid step (batch n, row block h, out-channel block oc, in-channel block ic).

    x_ref  : (1, 1, (TH+K)*WP, TI)   flattened padded rows for this row block / ic tile
    w_ref  : (K*K, TI, TO)           per-tap (Ci, Co) weight tiles
    b_ref  : (1, TO)                 f32 bias tile
    o_ref  : (1, 1, TH*WP, TO)       flattened output rows (padded width WP)
    acc_ref: (TH*WP, TO) f32         VMEM accumulator, resident across ic
    xs_ref : ((TH+K-1)*WP, TI)       staging buffer for the kw-shifted window
    """
    ic = pl.program_id(3)

    @pl.when(ic == 0)
    def _():
        acc_ref[...] = jnp.zeros_like(acc_ref)

    m = TH * WP
    l = xs_ref.shape[0]            # (TH + K - 1) * WP

    for kw in range(K):
        if kw > 0:
            # ONE sublane realignment per kw (hoisted out of the kh loop).
            xs_ref[...] = x_ref[0, 0, kw:kw + l, :]
        for kh in range(K):
            if kw == 0:
                # Offset kh*WP is a multiple of 8 (WP % 8 == 0): aligned, no copy.
                lhs = x_ref[0, 0, kh * WP:kh * WP + m, :]
            else:
                lhs = xs_ref[kh * WP:kh * WP + m, :]
            acc_ref[...] += jnp.dot(lhs, w_ref[kh * K + kw],
                                    preferred_element_type=jnp.float32)

    @pl.when(ic == pl.num_programs(3) - 1)
    def _():
        # Epilogue: fold equalized-LR weight_gain and the forward `gain` once per
        # output tile.  Accumulator and output block share the flat layout, so the
        # store is a straight cast (no re-tile).
        res = acc_ref[...] * out_scale + b_ref[...] * bias_scale
        o_ref[0, 0, :, :] = res.astype(o_ref.dtype)


def _hardware():
    """Physical VMEM and MXU-matching lane tile for the current TPU generation."""
    vmem = 64 * 1024 * 1024          # conservative default (v7x physical VMEM)
    lane_tile = 256                  # 2x256x256 MXU on v6e / v7x
    try:
        vmem = int(pltpu.get_tpu_info().vmem_capacity_bytes)
    except Exception:
        pass
    try:
        kind = jax.devices()[0].device_kind.lower()
        if any(t in kind for t in ("v2", "v3", "v4", "v5")):
            lane_tile = 128          # 128x128 MXU generations
    except Exception:
        pass
    return vmem, lane_tile


def _channel_tile(c, lane_tile):
    if c % lane_tile == 0:
        return lane_tile
    if c % 128 == 0:
        return 128
    return c                         # small / odd channel count: full (lane-sparse)


def _plan(N, C_in, C_out, K, H_out, WP, op_isz, out_isz, row_block):
    """Pick (TI, TO, TH, vmem_limit) from the VMEM budget of the current chip."""
    vmem, lane_tile = _hardware()
    budget = int(vmem * 0.55)

    TI = _channel_tile(C_in, lane_tile)
    TO = _channel_tile(C_out, lane_tile)

    def need(th, to):
        s = (th + K) * WP
        l = (th + K - 1) * WP
        m = th * WP
        return (2 * s * TI * op_isz            # x block (double buffered)
                + 2 * K * K * TI * to * op_isz  # weight block (double buffered)
                + 2 * m * to * out_isz          # out block (double buffered)
                + m * to * 4                    # f32 accumulator
                + l * TI * op_isz               # kw-shift staging buffer
                + (1 << 20))                    # slack

    TH = H_out if row_block is None else max(1, min(int(row_block), H_out))
    TH = min(TH, 256)

    # Collapse the out-channel grid axis when it fits (stops re-streaming x per oc).
    while TO < C_out and C_out % (2 * TO) == 0 and need(TH, 2 * TO) <= budget:
        TO *= 2
    # Shrink the row block until everything fits the VMEM budget.
    while TH > 1 and need(TH, TO) > budget:
        TH = max(1, (TH + 1) // 2)
    # Make sure there are >= 2 parallel blocks for the two TensorCores on v7x.
    if row_block is None and N * (C_out // TO) == 1 and H_out >= 2:
        TH = min(TH, -(-H_out // 2))

    vmem_limit = int(min(vmem * 0.85, max(need(TH, TO) * 1.25, 24 << 20)))
    return TI, TO, TH, vmem_limit


def conv2d_layer_forward(x, weight, bias=None, *, up=1, down=1, gain=1.0,
                         mxu_dtype=None, row_block=None):
    """Pallas forward of stylegan `conv2d_layer` (up=1, down=1, activation=None).

    x:      (N, C_in, H, W)   NCHW, like PyTorch
    weight: (C_out, C_in, K, K)
    bias:   (C_out,) or None
    mxu_dtype: optional operand dtype for the MXU (e.g. jnp.bfloat16); output keeps x.dtype.
    row_block: optional override of the output-rows-per-block tile (TH).
    """
    assert up == 1 and down == 1, "only the up=1, down=1 path is implemented"
    N, C_in, H, W = x.shape
    C_out, I, KH, KW = weight.shape
    assert I == C_in and KH == KW
    K = KH
    p = K // 2
    H_out = H + 2 * p - K + 1
    W_out = W + 2 * p - K + 1

    op_dtype = jnp.dtype(mxu_dtype) if mxu_dtype is not None else jnp.dtype(x.dtype)
    out_dtype = jnp.dtype(x.dtype)
    op_isz = op_dtype.itemsize
    out_isz = out_dtype.itemsize

    WP = _round_up(W + 2 * p, 8)               # lane-layout friendly padded width
    TI, TO, TH, vmem_limit = _plan(N, C_in, C_out, K, H_out, WP, op_isz, out_isz,
                                   row_block)
    NH = -(-H_out // TH)                       # number of row blocks
    HB = TH + K                                # halo rows (K-1) + 1 slack row
    HP = NH * TH + K                           # padded height

    weight_gain = 1.0 / float((C_in * K * K) ** 0.5)
    out_scale = float(weight_gain) * float(gain)
    bias_scale = float(gain)

    # ---- Layout glue (wrapper, once per call) --------------------------------
    x_nhwc = jnp.transpose(x, (0, 2, 3, 1)).astype(op_dtype)
    x_pad = jnp.pad(x_nhwc, ((0, 0), (p, HP - H - p), (p, WP - W - p), (0, 0)))
    if NH == 1:
        x_tiles = x_pad[:, None]                                    # (N, 1, HB, WP, C)
    else:
        rows = (jnp.arange(NH, dtype=jnp.int32)[:, None] * TH
                + jnp.arange(HB, dtype=jnp.int32)[None, :])         # (NH, HB) overlapped
        x_tiles = jnp.take(x_pad, rows, axis=1)                     # (N, NH, HB, WP, C)
    x_flat = x_tiles.reshape(N, NH, HB * WP, C_in)                  # flat padded rows

    w_taps = jnp.transpose(weight, (2, 3, 1, 0)).reshape(K * K, C_in, C_out)
    w_taps = w_taps.astype(op_dtype)            # mirror `w.to(x.dtype)` (gain folded later)
    if bias is None:
        b2 = jnp.zeros((1, C_out), jnp.float32)
    else:
        b2 = bias.reshape(1, C_out).astype(jnp.float32)

    S = HB * WP
    M = TH * WP
    n_oc = C_out // TO
    n_ic = C_in // TI
    grid = (N, NH, n_oc, n_ic)

    kernel = functools.partial(
        _conv_rowblock_kernel,
        K=K, WP=WP, TH=TH, out_scale=out_scale, bias_scale=bias_scale,
    )

    # Cost estimate with the *actual* per-step re-streaming.
    steps = N * NH * n_oc * n_ic
    flops = int(2 * steps * M * K * K * TI * TO)
    bytes_accessed = int(
        steps * (S * TI * op_isz + K * K * TI * TO * op_isz)
        + N * NH * n_oc * (M * TO * out_isz + TO * 4))

    out = pl.pallas_call(
        kernel,
        out_shape=jax.ShapeDtypeStruct((N, NH, M, C_out), out_dtype),
        grid_spec=pltpu.PrefetchScalarGridSpec(
            num_scalar_prefetch=0,
            grid=grid,
            in_specs=[
                pl.BlockSpec((1, 1, S, TI), lambda n, h, oc, ic: (n, h, 0, ic)),
                pl.BlockSpec((K * K, TI, TO), lambda n, h, oc, ic: (0, ic, oc)),
                pl.BlockSpec((1, TO), lambda n, h, oc, ic: (0, oc)),
            ],
            out_specs=pl.BlockSpec((1, 1, M, TO), lambda n, h, oc, ic: (n, h, 0, oc)),
            scratch_shapes=[
                pltpu.VMEM((M, TO), jnp.float32),
                pltpu.VMEM(((TH + K - 1) * WP, TI), op_dtype),
            ],
        ),
        compiler_params=pltpu.CompilerParams(
            dimension_semantics=("parallel", "parallel", "parallel", "arbitrary"),
            vmem_limit_bytes=vmem_limit,
        ),
        cost_estimate=pl.CostEstimate(
            flops=flops, transcendentals=0, bytes_accessed=bytes_accessed),
    )(x_flat, w_taps, b2)

    # Un-flatten / un-pad in the wrapper (free XLA reshapes + slice), back to NCHW.
    y = out.reshape(N, NH * TH, WP, C_out)[:, :H_out, :W_out, :]
    return jnp.transpose(y, (0, 3, 1, 2)).astype(out_dtype)


if __name__ == "__main__":
    # Module config: conv2d_layer(in_channels=4, out_channels=8, kernel_size=3,
    #                             bias=True, activation=None, up=1, down=1)
    N, C_in, C_out, K, H, W = 2, 4, 8, 3, 16, 16
    gain = 1.0

    key = jax.random.PRNGKey(0)
    kx, kw_, kb = jax.random.split(key, 3)
    weight = jax.random.normal(kw_, (C_out, C_in, K, K), jnp.float32)
    bias = 0.1 * jax.random.normal(kb, (C_out,), jnp.float32)
    x = jax.random.normal(kx, (N, C_in, H, W), jnp.float32)

    # Reference (plain JAX, same math as the torch forward).
    wg = 1.0 / (C_in * K * K) ** 0.5
    y_ref = lax.conv_general_dilated(
        x, weight * wg, window_strides=(1, 1),
        padding=((K // 2, K // 2), (K // 2, K // 2)),
        dimension_numbers=("NCHW", "OIHW", "NCHW"),
        precision=lax.Precision.HIGHEST)
    y_ref = (y_ref + bias[None, :, None, None]) * gain

    # 1) default plan (single row block for this small feature map)
    y = jax.block_until_ready(conv2d_layer_forward(x, weight, bias, gain=gain))
    assert y.shape == y_ref.shape
    assert jnp.allclose(y, y_ref, atol=1e-4, rtol=1e-4)

    # 2) forced spatial row tiling (exercises the halo'd row-block path / megacore axis)
    y_t = jax.block_until_ready(
        conv2d_layer_forward(x, weight, bias, gain=gain, row_block=8))
    assert jnp.allclose(y_t, y_ref, atol=1e-4, rtol=1e-4)

    # 3) optional bf16 MXU operands (f32 accumulation), looser tolerance
    y_bf16 = jax.block_until_ready(
        conv2d_layer_forward(x, weight, bias, gain=gain, mxu_dtype=jnp.bfloat16))
    assert jnp.allclose(y_bf16, y_ref, atol=1e-1, rtol=1e-1)

    print("KERNEL_OK")
</pallas_src>

<mosaic_0001>
module attributes {stable_mosaic.version = 11 : i64} {
  func.func @_conv_rowblock_kernel(%arg0: i32, %arg1: i32, %arg2: i32, %arg3: i32, %arg4: memref<1x1x456x4xf32, #tpu.memory_space<vmem>>, %arg5: memref<9x4x8xf32, #tpu.memory_space<vmem>>, %arg6: memref<1x8xf32, #tpu.memory_space<vmem>>, %arg7: memref<1x1x384x8xf32, #tpu.memory_space<vmem>>, %arg8: memref<384x8xf32, #tpu.memory_space<vmem>>, %arg9: memref<432x4xf32, #tpu.memory_space<vmem>>) attributes {dimension_semantics = [#tpu.dimension_semantics<parallel>, #tpu.dimension_semantics<parallel>, #tpu.dimension_semantics<parallel>, #tpu.dimension_semantics<arbitrary>], iteration_bounds = array<i64: 2, 1, 1, 1>, scalar_prefetch = 0 : i64, scratch_operands = 2 : i64, tpu.core_type = #tpu.core_type<tc>, window_params = [{transform_indices = @transform_0, window_bounds = array<i64: 1, 1, 456, 4>}, {transform_indices = @transform_1, window_bounds = array<i64: 9, 4, 8>}, {transform_indices = @transform_2, window_bounds = array<i64: 1, 8>}, {transform_indices = @transform_3, window_bounds = array<i64: 1, 1, 384, 8>}]} {
    %c0_i32 = arith.constant 0 : i32
    %0 = arith.cmpi eq, %arg3, %c0_i32 : i32
    %1 = arith.extui %0 : i1 to i32
    %c0_i32_0 = arith.constant 0 : i32
    %2 = arith.cmpi ne, %1, %c0_i32_0 : i32
    scf.if %2 {
      %cst_99 = arith.constant 0.000000e+00 : f32
      %78 = vector.broadcast %cst_99 : f32 to vector<384x8xf32>
      %c0_100 = arith.constant 0 : index
      %c0_101 = arith.constant 0 : index
      %79 = vector.load %arg8[%c0_100, %c0_101] : memref<384x8xf32, #tpu.memory_space<vmem>>, vector<384x8xf32>
      tpu.vector_store %arg8[%c0_100, %c0_101], %78 {strides = array<i32>} : memref<384x8xf32, #tpu.memory_space<vmem>>, vector<384x8xf32>,
    } else {
    }
    %c0 = arith.constant 0 : index
    %c0_1 = arith.constant 0 : index
    %c0_2 = arith.constant 0 : index
    %c0_3 = arith.constant 0 : index
    %3 = vector.load %arg4[%c0, %c0_1, %c0_2, %c0_3] : memref<1x1x456x4xf32, #tpu.memory_space<vmem>>, vector<1x1x384x4xf32>
    %4 = vector.shape_cast %3 : vector<1x1x384x4xf32> to vector<384x4xf32>
    %c0_4 = arith.constant 0 : index
    %c0_5 = arith.constant 0 : index
    %5 = vector.load %arg8[%c0_4, %c0_5] : memref<384x8xf32, #tpu.memory_space<vmem>>, vector<384x8xf32>
    %c0_6 = arith.constant 0 : index
    %c0_7 = arith.constant 0 : index
    %c0_8 = arith.constant 0 : index
    %6 = vector.load %arg5[%c0_6, %c0_7, %c0_8] : memref<9x4x8xf32, #tpu.memory_space<vmem>>, vector<1x4x8xf32>
    %7 = vector.shape_cast %6 : vector<1x4x8xf32> to vector<4x8xf32>
    %cst = arith.constant dense<0.000000e+00> : vector<384x8xf32>
    %8 = tpu.matmul %4, %7, %cst {dimension_numbers = #tpu.dot_dimension_numbers<[1], [0], [0], [1], [0, 0, 1, 1], [], []>} : vector<384x4xf32>, vector<4x8xf32>, vector<384x8xf32> -> vector<384x8xf32>
    %9 = arith.addf %5, %8 : vector<384x8xf32>
    %c0_9 = arith.constant 0 : index
    %c0_10 = arith.constant 0 : index
    %10 = vector.load %arg8[%c0_9, %c0_10] : memref<384x8xf32, #tpu.memory_space<vmem>>, vector<384x8xf32>
    tpu.vector_store %arg8[%c0_9, %c0_10], %9 {strides = array<i32>} : memref<384x8xf32, #tpu.memory_space<vmem>>, vector<384x8xf32>,
    %c0_11 = arith.constant 0 : index
    %c0_12 = arith.constant 0 : index
    %c24 = arith.constant 24 : index
    %c0_13 = arith.constant 0 : index
    %11 = vector.load %arg4[%c0_11, %c0_12, %c24, %c0_13] : memref<1x1x456x4xf32, #tpu.memory_space<vmem>>, vector<1x1x384x4xf32>
    %12 = vector.shape_cast %11 : vector<1x1x384x4xf32> to vector<384x4xf32>
    %c0_14 = arith.constant 0 : index
    %c0_15 = arith.constant 0 : index
    %13 = vector.load %arg8[%c0_14, %c0_15] : memref<384x8xf32, #tpu.memory_space<vmem>>, vector<384x8xf32>
    %c3 = arith.constant 3 : index
    %c0_16 = arith.constant 0 : index
    %c0_17 = arith.constant 0 : index
    %14 = vector.load %arg5[%c3, %c0_16, %c0_17] : memref<9x4x8xf32, #tpu.memory_space<vmem>>, vector<1x4x8xf32>
    %15 = vector.shape_cast %14 : vector<1x4x8xf32> to vector<4x8xf32>
    %cst_18 = arith.constant dense<0.000000e+00> : vector<384x8xf32>
    %16 = tpu.matmul %12, %15, %cst_18 {dimension_numbers = #tpu.dot_dimension_numbers<[1], [0], [0], [1], [0, 0, 1, 1], [], []>} : vector<384x4xf32>, vector<4x8xf32>, vector<384x8xf32> -> vector<384x8xf32>
    %17 = arith.addf %13, %16 : vector<384x8xf32>
    %c0_19 = arith.constant 0 : index
    %c0_20 = arith.constant 0 : index
    %18 = vector.load %arg8[%c0_19, %c0_20] : memref<384x8xf32, #tpu.memory_space<vmem>>, vector<384x8xf32>
    tpu.vector_store %arg8[%c0_19, %c0_20], %17 {strides = array<i32>} : memref<384x8xf32, #tpu.memory_space<vmem>>, vector<384x8xf32>,
    %c0_21 = arith.constant 0 : index
    %c0_22 = arith.constant 0 : index
    %c48 = arith.constant 48 : index
    %c0_23 = arith.constant 0 : index
    %19 = vector.load %arg4[%c0_21, %c0_22, %c48, %c0_23] : memref<1x1x456x4xf32, #tpu.memory_space<vmem>>, vector<1x1x384x4xf32>
    %20 = vector.shape_cast %19 : vector<1x1x384x4xf32> to vector<384x4xf32>
    %c0_24 = arith.constant 0 : index
    %c0_25 = arith.constant 0 : index
    %21 = vector.load %arg8[%c0_24, %c0_25] : memref<384x8xf32, #tpu.memory_space<vmem>>, vector<384x8xf32>
    %c6 = arith.constant 6 : index
    %c0_26 = arith.constant 0 : index
    %c0_27 = arith.constant 0 : index
    %22 = vector.load %arg5[%c6, %c0_26, %c0_27] : memref<9x4x8xf32, #tpu.memory_space<vmem>>, vector<1x4x8xf32>
    %23 = vector.shape_cast %22 : vector<1x4x8xf32> to vector<4x8xf32>
    %cst_28 = arith.constant dense<0.000000e+00> : vector<384x8xf32>
    %24 = tpu.matmul %20, %23, %cst_28 {dimension_numbers = #tpu.dot_dimension_numbers<[1], [0], [0], [1], [0, 0, 1, 1], [], []>} : vector<384x4xf32>, vector<4x8xf32>, vector<384x8xf32> -> vector<384x8xf32>
    %25 = arith.addf %21, %24 : vector<384x8xf32>
    %c0_29 = arith.constant 0 : index
    %c0_30 = arith.constant 0 : index
    %26 = vector.load %arg8[%c0_29, %c0_30] : memref<384x8xf32, #tpu.memory_space<vmem>>, vector<384x8xf32>
    tpu.vector_store %arg8[%c0_29, %c0_30], %25 {strides = array<i32>} : memref<384x8xf32, #tpu.memory_space<vmem>>, vector<384x8xf32>,
    %c0_31 = arith.constant 0 : index
    %c0_32 = arith.constant 0 : index
    %c1 = arith.constant 1 : index
    %c0_33 = arith.constant 0 : index
    %27 = vector.load %arg4[%c0_31, %c0_32, %c1, %c0_33] : memref<1x1x456x4xf32, #tpu.memory_space<vmem>>, vector<1x1x432x4xf32>
    %28 = vector.shape_cast %27 : vector<1x1x432x4xf32> to vector<432x4xf32>
    %c0_34 = arith.constant 0 : index
    %c0_35 = arith.constant 0 : index
    %29 = vector.load %arg9[%c0_34, %c0_35] : memref<432x4xf32, #tpu.memory_space<vmem>>, vector<432x4xf32>
    tpu.vector_store %arg9[%c0_34, %c0_35], %28 {strides = array<i32>} : memref<432x4xf32, #tpu.memory_space<vmem>>, vector<432x4xf32>,
    %c0_36 = arith.constant 0 : index
    %c0_37 = arith.constant 0 : index
    %30 = vector.load %arg9[%c0_36, %c0_37] : memref<432x4xf32, #tpu.memory_space<vmem>>, vector<384x4xf32>
    %c0_38 = arith.constant 0 : index
    %c0_39 = arith.constant 0 : index
    %31 = vector.load %arg8[%c0_38, %c0_39] : memref<384x8xf32, #tpu.memory_space<vmem>>, vector<384x8xf32>
    %c1_40 = arith.constant 1 : index
    %c0_41 = arith.constant 0 : index
    %c0_42 = arith.constant 0 : index
    %32 = vector.load %arg5[%c1_40, %c0_41, %c0_42] : memref<9x4x8xf32, #tpu.memory_space<vmem>>, vector<1x4x8xf32>
    %33 = vector.shape_cast %32 : vector<1x4x8xf32> to vector<4x8xf32>
    %cst_43 = arith.constant dense<0.000000e+00> : vector<384x8xf32>
    %34 = tpu.matmul %30, %33, %cst_43 {dimension_numbers = #tpu.dot_dimension_numbers<[1], [0], [0], [1], [0, 0, 1, 1], [], []>} : vector<384x4xf32>, vector<4x8xf32>, vector<384x8xf32> -> vector<384x8xf32>
    %35 = arith.addf %31, %34 : vector<384x8xf32>
    %c0_44 = arith.constant 0 : index
    %c0_45 = arith.constant 0 : index
    %36 = vector.load %arg8[%c0_44, %c0_45] : memref<384x8xf32, #tpu.memory_space<vmem>>, vector<384x8xf32>
    tpu.vector_store %arg8[%c0_44, %c0_45], %35 {strides = array<i32>} : memref<384x8xf32, #tpu.memory_space<vmem>>, vector<384x8xf32>,
    %c24_46 = arith.constant 24 : index
    %c0_47 = arith.constant 0 : index
    %37 = vector.load %arg9[%c24_46, %c0_47] : memref<432x4xf32, #tpu.memory_space<vmem>>, vector<384x4xf32>
    %c0_48 = arith.constant 0 : index
    %c0_49 = arith.constant 0 : index
    %38 = vector.load %arg8[%c0_48, %c0_49] : memref<384x8xf32, #tpu.memory_space<vmem>>, vector<384x8xf32>
    %c4 = arith.constant 4 : index
    %c0_50 = arith.constant 0 : index
    %c0_51 = arith.constant 0 : index
    %39 = vector.load %arg5[%c4, %c0_50, %c0_51] : memref<9x4x8xf32, #tpu.memory_space<vmem>>, vector<1x4x8xf32>
    %40 = vector.shape_cast %39 : vector<1x4x8xf32> to vector<4x8xf32>
    %cst_52 = arith.constant dense<0.000000e+00> : vector<384x8xf32>
    %41 = tpu.matmul %37, %40, %cst_52 {dimension_numbers = #tpu.dot_dimension_numbers<[1], [0], [0], [1], [0, 0, 1, 1], [], []>} : vector<384x4xf32>, vector<4x8xf32>, vector<384x8xf32> -> vector<384x8xf32>
    %42 = arith.addf %38, %41 : vector<384x8xf32>
    %c0_53 = arith.constant 0 : index
    %c0_54 = arith.constant 0 : index
    %43 = vector.load %arg8[%c0_53, %c0_54] : memref<384x8xf32, #tpu.memory_space<vmem>>, vector<384x8xf32>
    tpu.vector_store %arg8[%c0_53, %c0_54], %42 {strides = array<i32>} : memref<384x8xf32, #tpu.memory_space<vmem>>, vector<384x8xf32>,
    %c48_55 = arith.constant 48 : index
    %c0_56 = arith.constant 0 : index
    %44 = vector.load %arg9[%c48_55, %c0_56] : memref<432x4xf32, #tpu.memory_space<vmem>>, vector<384x4xf32>
    %c0_57 = arith.constant 0 : index
    %c0_58 = arith.constant 0 : index
    %45 = vector.load %arg8[%c0_57, %c0_58] : memref<384x8xf32, #tpu.memory_space<vmem>>, vector<384x8xf32>
    %c7 = arith.constant 7 : index
    %c0_59 = arith.constant 0 : index
    %c0_60 = arith.constant 0 : index
    %46 = vector.load %arg5[%c7, %c0_59, %c0_60] : memref<9x4x8xf32, #tpu.memory_space<vmem>>, vector<1x4x8xf32>
    %47 = vector.shape_cast %46 : vector<1x4x8xf32> to vector<4x8xf32>
    %cst_61 = arith.constant dense<0.000000e+00> : vector<384x8xf32>
    %48 = tpu.matmul %44, %47, %cst_61 {dimension_numbers = #tpu.dot_dimension_numbers<[1], [0], [0], [1], [0, 0, 1, 1], [], []>} : vector<384x4xf32>, vector<4x8xf32>, vector<384x8xf32> -> vector<384x8xf32>
    %49 = arith.addf %45, %48 : vector<384x8xf32>
    %c0_62 = arith.constant 0 : index
    %c0_63 = arith.constant 0 : index
    %50 = vector.load %arg8[%c0_62, %c0_63] : memref<384x8xf32, #tpu.memory_space<vmem>>, vector<384x8xf32>
    tpu.vector_store %arg8[%c0_62, %c0_63], %49 {strides = array<i32>} : memref<384x8xf32, #tpu.memory_space<vmem>>, vector<384x8xf32>,
    %c0_64 = arith.constant 0 : index
    %c0_65 = arith.constant 0 : index
    %c2 = arith.constant 2 : index
    %c0_66 = arith.constant 0 : index
    %51 = vector.load %arg4[%c0_64, %c0_65, %c2, %c0_66] : memref<1x1x456x4xf32, #tpu.memory_space<vmem>>, vector<1x1x432x4xf32>
    %52 = vector.shape_cast %51 : vector<1x1x432x4xf32> to vector<432x4xf32>
    %c0_67 = arith.constant 0 : index
    %c0_68 = arith.constant 0 : index
    %53 = vector.load %arg9[%c0_67, %c0_68] : memref<432x4xf32, #tpu.memory_space<vmem>>, vector<432x4xf32>
    tpu.vector_store %arg9[%c0_67, %c0_68], %52 {strides = array<i32>} : memref<432x4xf32, #tpu.memory_space<vmem>>, vector<432x4xf32>,
    %c0_69 = arith.constant 0 : index
    %c0_70 = arith.constant 0 : index
    %54 = vector.load %arg9[%c0_69, %c0_70] : memref<432x4xf32, #tpu.memory_space<vmem>>, vector<384x4xf32>
    %c0_71 = arith.constant 0 : index
    %c0_72 = arith.constant 0 : index
    %55 = vector.load %arg8[%c0_71, %c0_72] : memref<384x8xf32, #tpu.memory_space<vmem>>, vector<384x8xf32>
    %c2_73 = arith.constant 2 : index
    %c0_74 = arith.constant 0 : index
    %c0_75 = arith.constant 0 : index
    %56 = vector.load %arg5[%c2_73, %c0_74, %c0_75] : memref<9x4x8xf32, #tpu.memory_space<vmem>>, vector<1x4x8xf32>
    %57 = vector.shape_cast %56 : vector<1x4x8xf32> to vector<4x8xf32>
    %cst_76 = arith.constant dense<0.000000e+00> : vector<384x8xf32>
    %58 = tpu.matmul %54, %57, %cst_76 {dimension_numbers = #tpu.dot_dimension_numbers<[1], [0], [0], [1], [0, 0, 1, 1], [], []>} : vector<384x4xf32>, vector<4x8xf32>, vector<384x8xf32> -> vector<384x8xf32>
    %59 = arith.addf %55, %58 : vector<384x8xf32>
    %c0_77 = arith.constant 0 : index
    %c0_78 = arith.constant 0 : index
    %60 = vector.load %arg8[%c0_77, %c0_78] : memref<384x8xf32, #tpu.memory_space<vmem>>, vector<384x8xf32>
    tpu.vector_store %arg8[%c0_77, %c0_78], %59 {strides = array<i32>} : memref<384x8xf32, #tpu.memory_space<vmem>>, vector<384x8xf32>,
    %c24_79 = arith.constant 24 : index
    %c0_80 = arith.constant 0 : index
    %61 = vector.load %arg9[%c24_79, %c0_80] : memref<432x4xf32, #tpu.memory_space<vmem>>, vector<384x4xf32>
    %c0_81 = arith.constant 0 : index
    %c0_82 = arith.constant 0 : index
    %62 = vector.load %arg8[%c0_81, %c0_82] : memref<384x8xf32, #tpu.memory_space<vmem>>, vector<384x8xf32>
    %c5 = arith.constant 5 : index
    %c0_83 = arith.constant 0 : index
    %c0_84 = arith.constant 0 : index
    %63 = vector.load %arg5[%c5, %c0_83, %c0_84] : memref<9x4x8xf32, #tpu.memory_space<vmem>>, vector<1x4x8xf32>
    %64 = vector.shape_cast %63 : vector<1x4x8xf32> to vector<4x8xf32>
    %cst_85 = arith.constant dense<0.000000e+00> : vector<384x8xf32>
    %65 = tpu.matmul %61, %64, %cst_85 {dimension_numbers = #tpu.dot_dimension_numbers<[1], [0], [0], [1], [0, 0, 1, 1], [], []>} : vector<384x4xf32>, vector<4x8xf32>, vector<384x8xf32> -> vector<384x8xf32>
    %66 = arith.addf %62, %65 : vector<384x8xf32>
    %c0_86 = arith.constant 0 : index
    %c0_87 = arith.constant 0 : index
    %67 = vector.load %arg8[%c0_86, %c0_87] : memref<384x8xf32, #tpu.memory_space<vmem>>, vector<384x8xf32>
    tpu.vector_store %arg8[%c0_86, %c0_87], %66 {strides = array<i32>} : memref<384x8xf32, #tpu.memory_space<vmem>>, vector<384x8xf32>,
    %c48_88 = arith.constant 48 : index
    %c0_89 = arith.constant 0 : index
    %68 = vector.load %arg9[%c48_88, %c0_89] : memref<432x4xf32, #tpu.memory_space<vmem>>, vector<384x4xf32>
    %c0_90 = arith.constant 0 : index
    %c0_91 = arith.constant 0 : index
    %69 = vector.load %arg8[%c0_90, %c0_91] : memref<384x8xf32, #tpu.memory_space<vmem>>, vector<384x8xf32>
    %c8 = arith.constant 8 : index
    %c0_92 = arith.constant 0 : index
    %c0_93 = arith.constant 0 : index
    %70 = vector.load %arg5[%c8, %c0_92, %c0_93] : memref<9x4x8xf32, #tpu.memory_space<vmem>>, vector<1x4x8xf32>
    %71 = vector.shape_cast %70 : vector<1x4x8xf32> to vector<4x8xf32>
    %cst_94 = arith.constant dense<0.000000e+00> : vector<384x8xf32>
    %72 = tpu.matmul %68, %71, %cst_94 {dimension_numbers = #tpu.dot_dimension_numbers<[1], [0], [0], [1], [0, 0, 1, 1], [], []>} : vector<384x4xf32>, vector<4x8xf32>, vector<384x8xf32> -> vector<384x8xf32>
    %73 = arith.addf %69, %72 : vector<384x8xf32>
    %c0_95 = arith.constant 0 : index
    %c0_96 = arith.constant 0 : index
    %74 = vector.load %arg8[%c0_95, %c0_96] : memref<384x8xf32, #tpu.memory_space<vmem>>, vector<384x8xf32>
    tpu.vector_store %arg8[%c0_95, %c0_96], %73 {strides = array<i32>} : memref<384x8xf32, #tpu.memory_space<vmem>>, vector<384x8xf32>,
    %c0_i32_97 = arith.constant 0 : i32
    %75 = arith.cmpi eq, %arg3, %c0_i32_97 : i32
    %76 = arith.extui %75 : i1 to i32
    %c0_i32_98 = arith.constant 0 : i32
    %77 = arith.cmpi ne, %76, %c0_i32_98 : i32
    scf.if %77 {
      %c0_99 = arith.constant 0 : index
      %c0_100 = arith.constant 0 : index
      %78 = vector.load %arg8[%c0_99, %c0_100] : memref<384x8xf32, #tpu.memory_space<vmem>>, vector<384x8xf32>
      %cst_101 = arith.constant 0.166666672 : f32
      %79 = vector.broadcast %cst_101 : f32 to vector<384x8xf32>
      %80 = arith.mulf %78, %79 : vector<384x8xf32>
      %c0_102 = arith.constant 0 : index
      %c0_103 = arith.constant 0 : index
      %81 = vector.load %arg6[%c0_102, %c0_103] : memref<1x8xf32, #tpu.memory_space<vmem>>, vector<1x8xf32>
      %cst_104 = arith.constant 1.000000e+00 : f32
      %82 = vector.broadcast %cst_104 : f32 to vector<1x8xf32>
      %83 = arith.mulf %81, %82 : vector<1x8xf32>
      %84 = vector.broadcast %83 : vector<1x8xf32> to vector<384x8xf32>
      %85 = arith.addf %80, %84 : vector<384x8xf32>
      %c0_105 = arith.constant 0 : index
      %c0_106 = arith.constant 0 : index
      %c0_107 = arith.constant 0 : index
      %c0_108 = arith.constant 0 : index
      %86 = vector.load %arg7[%c0_105, %c0_106, %c0_107, %c0_108] : memref<1x1x384x8xf32, #tpu.memory_space<vmem>>, vector<1x1x384x8xf32>
      %87 = vector.shape_cast %86 : vector<1x1x384x8xf32> to vector<384x8xf32>
      %88 = vector.shape_cast %85 : vector<384x8xf32> to vector<1x1x384x8xf32>
      tpu.vector_store %arg7[%c0_105, %c0_106, %c0_107, %c0_108], %88 {strides = array<i32>} : memref<1x1x384x8xf32, #tpu.memory_space<vmem>>, vector<1x1x384x8xf32>,
    } else {
    }
    return
  }
  func.func @transform_0(%arg0: i32, %arg1: i32, %arg2: i32, %arg3: i32) -> (i32, i32, i32, i32) {
    %c0_i32 = arith.constant 0 : i32
    %c0_i32_0 = arith.constant 0 : i32
    return %arg0, %arg1, %c0_i32, %arg3 : i32, i32, i32, i32
  }
  func.func @transform_1(%arg0: i32, %arg1: i32, %arg2: i32, %arg3: i32) -> (i32, i32, i32) {
    %c0_i32 = arith.constant 0 : i32
    %c0_i32_0 = arith.constant 0 : i32
    return %c0_i32, %arg3, %arg2 : i32, i32, i32
  }
  func.func @transform_2(%arg0: i32, %arg1: i32, %arg2: i32, %arg3: i32) -> (i32, i32) {
    %c0_i32 = arith.constant 0 : i32
    %c0_i32_0 = arith.constant 0 : i32
    return %c0_i32, %arg2 : i32, i32
  }
  func.func @transform_3(%arg0: i32, %arg1: i32, %arg2: i32, %arg3: i32) -> (i32, i32, i32, i32) {
    %c0_i32 = arith.constant 0 : i32
    %c0_i32_0 = arith.constant 0 : i32
    return %arg0, %arg1, %c0_i32, %arg2 : i32, i32, i32, i32
  }
}

</mosaic_0001>

<bundles_post_ra>
// kernel: tpu_custom_call.1
= control target key start
LH: loop header
LB: loop body
LE: loop exit
PB: predicated region body
PF: predicated region fallthrough
CT: control target
= control target key end

     0   :  { %s5950_s12 = smov 0   ;;  %s5952_s13 = smov 0   ;;  %s7640_s0 = inlined_call_operand.vmem [shape: f32[2,1,456,4], index: 0, kind: input, shape index: {}]   ;;  %s7641_s1 = inlined_call_operand.vmem [shape: f32[9,4,8], index: 1, kind: input, shape index: {}]   ;;  %s7642_s2 = inlined_call_operand.vmem [shape: f32[1,8], index: 2, kind: input, shape index: {}]   ;;  %s7643_s3 = inlined_call_operand.vmem [shape: f32[2,1,384,8], index: 3, kind: output, shape index: {}]  }
   0x1   :  { %s5954_s14 = smov 0  }
   0x2 LB: > { %s39_s15 = sadd.s32 1, %s5923_s13  ;;  %p5418_p0 = scmp.ge.s32.totalorder %s5927_s14, 1  ;;  %s5927_s14 = sphi %s5954_s14, %s13_s14   ;;  %s5923_s13 = sphi %s5952_s13, %s7645_s13   ;;  %s5919_s12 = sphi %s5950_s12, %s7644_s12  }
   0x3   : > { %p41_p1 = scmp.ge.s32.totalorder %s39_s15, 2  ;;  %p200_p2 = scmp.lt.s32.totalorder %s5927_s14, 3 }
   0x5   : > { %s7647_s15 = smov (%p41_p1, %s39_s15), 0  ;;  %p201_p3 = pnand %p5418_p0, %p200_p2 }
   0x6   : > { %p248_p4 = scmp.lt.s32.totalorder (!%p201_p3), %s5919_s12, 1 }
   0x7   : > { %204 = sbr.rel (%p201_p3) target bundleno = 1045 (0x415), region = 32 }
   0xc   : > { %v431_v0 = vld [vmem:[%s7641_s1] sm:$0xf]  ;;  %vm577_vm0 = vcmask 1043456   ;;  %v5470_v1 = vld [vmem:[%s7641_s1 + $0xc] sm:$0xf]  ;;  %s7649_s12 = smov (!%p248_p4, %s5919_s12), 1 }
   0xd   : > { %5872 = vmatpush.msk.msra.mxu1 %vm577_vm0, %v431_v0  ;;  %5873 = vmatpush.msk.msra.mxu2 %vm577_vm0, %v431_v0  ;;  %v5520_v2 = vld [vmem:[%s7641_s1 + $0x18] sm:$0xf]  ;;  %v5570_v3 = vld [vmem:[%s7641_s1 + $0x4] sm:$0xf]  ;;  %v5620_v4 = vld [vmem:[%s7641_s1 + $0x10] sm:$0xf] }
   0xe   : > { %5874 = vmatpush.msk.msra.mxu3 %vm577_vm0, %v431_v0  ;;  %5421 = vmatpush.msk.msra.mxu0 %vm577_vm0, %v431_v0  ;;  %s5875_s26 = smul.u32 456, %s7649_s12  ;;  %vm432_vm1 = vcmask 31744   ;;  %v5670_v41 = vld [vmem:[%s7641_s1 + $0x1c] sm:$0xf]  ;;  %v5720_v42 = vld [vmem:[%s7641_s1 + $0x8] sm:$0xf] }
   0xf   : > { %5471 = vmatpush.msk.msrb.mxu1 %vm577_vm0, %v5470_v1  ;;  %5521 = vmatpush.msk.msrb.mxu2 %vm577_vm0, %v5520_v2  ;;  %v5770_v48 = vld [vmem:[%s7641_s1 + $0x14] sm:$0xf]  ;;  %vm286_vm2 = vcmask 64512   ;;  %v5929_v61 = vmov 0.0   ;;  %v5820_v63 = vld [vmem:[%s7641_s1 + $0x20] sm:$0xf] }
  0x10   : > { %5571 = vmatpush.msk.msrb.mxu3 %vm577_vm0, %v5570_v3  ;;  %5621 = vmatpush.msk.msrb.mxu0 %vm577_vm0, %v5620_v4  ;;  %s5997_s29 = scalar_lea.vmem %s7640_s0, %s5875_s26  ;;  %299 = vst.msk [vmem:[#allocation2 + $0x60] sm:$0xff] %vm286_vm2, %v5929_v61  ;;  %s5876_s11 = smul.u32 384, %s7649_s12 }
  0x11   : > { %v6000_v5 = vld [vmem:[%s5997_s29 + $0x60] sm:$0xff]  ;;  %v6011_v9 = vld [vmem:[%s5997_s29 + $0x68] sm:$0xff]  ;;  %v6022_v13 = vld [vmem:[%s5997_s29 + $0x70] sm:$0xff]  ;;  %287 = vst.msk [vmem:[#allocation2] sm:$0xff] %vm286_vm2, %v5929_v61 }
  0x12   : > { %v359_v6 = vld [vmem:[%s5997_s29 + $0xc0] sm:$0xff]  ;;  %5434 = vmatmul.msk.f32.vlgmr.msra.gmra.mxu1 %vm432_vm1, %v6000_v5  ;;  %v360_v10 = vld [vmem:[%s5997_s29 + $0xc8] sm:$0xff]  ;;  %v361_v14 = vld [vmem:[%s5997_s29 + $0xd0] sm:$0xff]  ;;  %288 = vst.msk [vmem:[#allocation2 + $0x8] sm:$0xff] %vm286_vm2, %v5929_v61  ;;  %s7151_s19 = scalar_lea.vmem %s7643_s3, %s5876_s11 }
  0x13   : > { %5446 = vmatmul.msk.f32.vlgmr.msra.gmra.mxu2 %vm432_vm1, %v359_v6  ;;  %v371_v7 = vld [vmem:[%s5997_s29 + $0x120] sm:$0xff]  ;;  %v372_v11 = vld [vmem:[%s5997_s29 + $0x128] sm:$0xff]  ;;  %v373_v15 = vld [vmem:[%s5997_s29 + $0x130] sm:$0xff]  ;;  %5671 = vmatpush.msk.msra.mxu1 %vm577_vm0, %v5670_v41  ;;  %289 = vst.msk [vmem:[#allocation2 + $0x10] sm:$0xff] %vm286_vm2, %v5929_v61 }
  0x14   : > { %5458 = vmatmul.msk.f32.vlgmr.msra.gmra.mxu3 %vm432_vm1, %v371_v7  ;;  %v335_v8 = vld [vmem:[%s5997_s29] sm:$0xff]  ;;  %v336_v12 = vld [vmem:[%s5997_s29 + $0x8] sm:$0xff]  ;;  %v337_v16 = vld [vmem:[%s5997_s29 + $0x10] sm:$0xff]  ;;  %5721 = vmatpush.msk.msra.mxu2 %vm577_vm0, %v5720_v42  ;;  %290 = vst.msk [vmem:[#allocation2 + $0x18] sm:$0xff] %vm286_vm2, %v5929_v61 }
  0x15   : > { %5422 = vmatmul.msk.f32.vlgmr.msra.gmra.mxu0 %vm432_vm1, %v335_v8  ;;  %v6033_v17 = vld [vmem:[%s5997_s29 + $0x78] sm:$0xff]  ;;  %v6047_v21 = vld [vmem:[%s5997_s29 + $0x80] sm:$0xff]  ;;  %v6061_v25 = vld [vmem:[%s5997_s29 + $0x88] sm:$0xff]  ;;  %5771 = vmatpush.msk.msra.mxu3 %vm577_vm0, %v5770_v48  ;;  %291 = vst.msk [vmem:[#allocation2 + $0x20] sm:$0xff] %vm286_vm2, %v5929_v61 }
  0x16   : > { %v362_v18 = vld [vmem:[%s5997_s29 + $0xd8] sm:$0xff]  ;;  %v363_v22 = vld [vmem:[%s5997_s29 + $0xe0] sm:$0xff]  ;;  %v364_v26 = vld [vmem:[%s5997_s29 + $0xe8] sm:$0xff]  ;;  %292 = vst.msk [vmem:[#allocation2 + $0x28] sm:$0xff] %vm286_vm2, %v5929_v61  ;;  %5821 = vmatpush.msk.msra.mxu0 %vm577_vm0, %v5820_v63 }
  0x17   : > { %v374_v19 = vld [vmem:[%s5997_s29 + $0x138] sm:$0xff]  ;;  %v375_v23 = vld [vmem:[%s5997_s29 + $0x140] sm:$0xff]  ;;  %v376_v27 = vld [vmem:[%s5997_s29 + $0x148] sm:$0xff]  ;;  %293 = vst.msk [vmem:[#allocation2 + $0x30] sm:$0xff] %vm286_vm2, %v5929_v61 }
  0x18   : > { %v6041_v20 = vld [vmem:[%s5997_s29 + $0x18] sm:$0xff]  ;;  %v6055_v24 = vld [vmem:[%s5997_s29 + $0x20] sm:$0xff]  ;;  %v6069_v28 = vld [vmem:[%s5997_s29 + $0x28] sm:$0xff]  ;;  %294 = vst.msk [vmem:[#allocation2 + $0x38] sm:$0xff] %vm286_vm2, %v5929_v61 }
  0x19   : > { %v6075_v29 = vld [vmem:[%s5997_s29 + $0x90] sm:$0xff]  ;;  %v6089_v33 = vld [vmem:[%s5997_s29 + $0x98] sm:$0xff]  ;;  %v6103_v37 = vld [vmem:[%s5997_s29 + $0xa0] sm:$0xff]  ;;  %295 = vst.msk [vmem:[#allocation2 + $0x40] sm:$0xff] %vm286_vm2, %v5929_v61 }
  0x1a   : > { %5435 = vmatmul.msk.f32.gmra.mxu1 %vm432_vm1, %v6011_v9  ;;  %v365_v30 = vld [vmem:[%s5997_s29 + $0xf0] sm:$0xff]  ;;  %v366_v34 = vld [vmem:[%s5997_s29 + $0xf8] sm:$0xff]  ;;  %v367_v38 = vld [vmem:[%s5997_s29 + $0x100] sm:$0xff]  ;;  %296 = vst.msk [vmem:[#allocation2 + $0x48] sm:$0xff] %vm286_vm2, %v5929_v61 }
  0x1b   : > { %5447 = vmatmul.msk.f32.gmra.mxu2 %vm432_vm1, %v360_v10  ;;  %v377_v31 = vld [vmem:[%s5997_s29 + $0x150] sm:$0xff]  ;;  %v378_v35 = vld [vmem:[%s5997_s29 + $0x158] sm:$0xff]  ;;  %v379_v39 = vld [vmem:[%s5997_s29 + $0x160] sm:$0xff]  ;;  %297 = vst.msk [vmem:[#allocation2 + $0x50] sm:$0xff] %vm286_vm2, %v5929_v61 }
  0x1c   : > { %5459 = vmatmul.msk.f32.gmra.mxu3 %vm432_vm1, %v372_v11  ;;  %v6083_v32 = vld [vmem:[%s5997_s29 + $0x30] sm:$0xff]  ;;  %v6097_v36 = vld [vmem:[%s5997_s29 + $0x38] sm:$0xff]  ;;  %v6111_v40 = vld [vmem:[%s5997_s29 + $0x40] sm:$0xff]  ;;  %298 = vst.msk [vmem:[#allocation2 + $0x58] sm:$0xff] %vm286_vm2, %v5929_v61 }
  0x1d   : > { %5423 = vmatmul.msk.f32.gmra.mxu0 %vm432_vm1, %v336_v12  ;;  %v6125_v43 = vld [vmem:[%s5997_s29 + $0xa8] sm:$0xff]  ;;  %v6146_v50 = vld [vmem:[%s5997_s29 + $0xb0] sm:$0xff]  ;;  %v6164_v57 = vld [vmem:[%s5997_s29 + $0xb8] sm:$0xff]  ;;  %300 = vst.msk [vmem:[#allocation2 + $0x68] sm:$0xff] %vm286_vm2, %v5929_v61 }
  0x1e   : > { %v368_v44 = vld [vmem:[%s5997_s29 + $0x108] sm:$0xff]  ;;  %v369_v51 = vld [vmem:[%s5997_s29 + $0x110] sm:$0xff]  ;;  %v370_v58 = vld [vmem:[%s5997_s29 + $0x118] sm:$0xff]  ;;  %301 = vst.msk [vmem:[#allocation2 + $0x70] sm:$0xff] %vm286_vm2, %v5929_v61 }
  0x1f   : > { %v1843_v45 = vld [vmem:[%s5997_s29 + $0x1] sm:$0xff]  ;;  %v1844_v53 = vld [vmem:[%s5997_s29 + $0x9] sm:$0xff]  ;;  %v382_v59 = vld [vmem:[%s5997_s29 + $0x178] sm:$0xff]  ;;  %302 = vst.msk [vmem:[#allocation2 + $0x78] sm:$0xff] %vm286_vm2, %v5929_v61 }
  0x20   : > { %v380_v46 = vld [vmem:[%s5997_s29 + $0x168] sm:$0xff]  ;;  %1897 = vst.msk [vmem:[#allocation3] sm:$0xff] %vm432_vm1, %v1843_v45  ;;  %v381_v54 = vld [vmem:[%s5997_s29 + $0x170] sm:$0xff]  ;;  %v6175_v62 = vld [vmem:[%s5997_s29 + $0x58] sm:$0xff] }
  0x21   : > { %v6135_v47 = vld [vmem:[%s5997_s29 + $0x48] sm:$0xff]  ;;  %1898 = vst.msk [vmem:[#allocation3 + $0x8] sm:$0xff] %vm432_vm1, %v1844_v53  ;;  %v6157_v55 = vld [vmem:[%s5997_s29 + $0x50] sm:$0xff]  ;;  %v395_v0 = vld [vmem:[#allocation2 + $0x60] sm:$0xff] }
  0x22   : > { %5436 = vmatmul.msk.f32.gmra.mxu1 %vm432_vm1, %v6022_v13  ;;  %v3457_v49 = vld [vmem:[%s5997_s29 + $0x2] sm:$0xff]  ;;  %v3458_v56 = vld [vmem:[%s5997_s29 + $0xa] sm:$0xff]  ;;  %303 = vst.msk [vmem:[#allocation2 + $0x80] sm:$0xff] %vm286_vm2, %v5929_v61  ;;  %v1846_v11 = vld [vmem:[%s5997_s29 + $0x19] sm:$0xff] }
  0x23   : > { %5448 = vmatmul.msk.f32.gmra.mxu2 %vm432_vm1, %v361_v14  ;;  %304 = vst.msk [vmem:[#allocation2 + $0x88] sm:$0xff] %vm286_vm2, %v5929_v61  ;;  %v1845_v7 = vld [vmem:[%s5997_s29 + $0x11] sm:$0xff]  ;;  %v1847_v14 = vld [vmem:[%s5997_s29 + $0x21] sm:$0xff] }
  0x24   : > { %5460 = vmatmul.msk.f32.gmra.mxu3 %vm432_vm1, %v373_v15  ;;  %305 = vst.msk [vmem:[#allocation2 + $0x90] sm:$0xff] %vm286_vm2, %v5929_v61  ;;  %v396_v3 = vld [vmem:[#allocation2 + $0x68] sm:$0xff]  ;;  %v383_v45 = vld [vmem:[#allocation2] sm:$0xff] }
  0x25   : > { %5424 = vmatmul.msk.f32.gmra.mxu0 %vm432_vm1, %v337_v16  ;;  %306 = vst.msk [vmem:[#allocation2 + $0x98] sm:$0xff] %vm286_vm2, %v5929_v61 }
  0x26   : > { %307 = vst.msk [vmem:[#allocation2 + $0xa0] sm:$0xff] %vm286_vm2, %v5929_v61 }
  0x27   : > { %v1951_v52 = vld [vmem:[#allocation3] sm:$0xff]  ;;  %308 = vst.msk [vmem:[#allocation2 + $0xa8] sm:$0xff] %vm286_vm2, %v5929_v61 }
  0x28   : > { %3511 = vst.msk [vmem:[#allocation3] sm:$0xff] %vm432_vm1, %v3457_v49  ;;  %v1952_v60 = vld [vmem:[#allocation3 + $0x8] sm:$0xff] }
  0x29   : > { %3512 = vst.msk [vmem:[#allocation3 + $0x8] sm:$0xff] %vm432_vm1, %v3458_v56 }
  0x2a   : > { %5437 = vmatmul.msk.f32.gmra.mxu1 %vm432_vm1, %v6033_v17  ;;  %309 = vst.msk [vmem:[#allocation2 + $0xb0] sm:$0xff] %vm286_vm2, %v5929_v61 }
  0x2b   : > { %5449 = vmatmul.msk.f32.gmra.mxu2 %vm432_vm1, %v362_v18  ;;  %310 = vst.msk [vmem:[#allocation2 + $0xb8] sm:$0xff] %vm286_vm2, %v5929_v61 }
  0x2c   : > { %5461 = vmatmul.msk.f32.gmra.mxu3 %vm432_vm1, %v374_v19  ;;  %311 = vst.msk [vmem:[#allocation2 + $0xc0] sm:$0xff] %vm286_vm2, %v5929_v61 }
  0x2d   : > { %5425 = vmatmul.msk.f32.gmra.mxu0 %vm432_vm1, %v6041_v20  ;;  %312 = vst.msk [vmem:[#allocation2 + $0xc8] sm:$0xff] %vm286_vm2, %v5929_v61 }
  0x2e   : > { %313 = vst.msk [vmem:[#allocation2 + $0xd0] sm:$0xff] %vm286_vm2, %v5929_v61 }
  0x2f   : > { %314 = vst.msk [vmem:[#allocation2 + $0xd8] sm:$0xff] %vm286_vm2, %v5929_v61 }
  0x30   : > { %315 = vst.msk [vmem:[#allocation2 + $0xe0] sm:$0xff] %vm286_vm2, %v5929_v61 }
  0x31   : > { %316 = vst.msk [vmem:[#allocation2 + $0xe8] sm:$0xff] %vm286_vm2, %v5929_v61 }
  0x32   : > { %5438 = vmatmul.msk.f32.gmra.mxu1 %vm432_vm1, %v6047_v21  ;;  %317 = vst.msk [vmem:[#allocation2 + $0xf0] sm:$0xff] %vm286_vm2, %v5929_v61 }
  0x33   : > { %5450 = vmatmul.msk.f32.gmra.mxu2 %vm432_vm1, %v363_v22  ;;  %318 = vst.msk [vmem:[#allocation2 + $0xf8] sm:$0xff] %vm286_vm2, %v5929_v61  ;;  %v407_v10 = vld [vmem:[#allocation2 + $0xc0] sm:$0xff]  ;;  %v397_v22 = vld [vmem:[#allocation2 + $0x70] sm:$0xff] }
  0x34   : > { %5462 = vmatmul.msk.f32.gmra.mxu3 %vm432_vm1, %v375_v23  ;;  %319 = vst.msk [vmem:[#allocation2 + $0x100] sm:$0xff] %vm286_vm2, %v5929_v61  ;;  %v408_v18 = vld [vmem:[#allocation2 + $0xc8] sm:$0xff] }
  0x35   : > { %5426 = vmatmul.msk.f32.gmra.mxu0 %vm432_vm1, %v6055_v24  ;;  %320 = vst.msk [vmem:[#allocation2 + $0x108] sm:$0xff] %vm286_vm2, %v5929_v61 }
  0x36   : > { %321 = vst.msk [vmem:[#allocation2 + $0x110] sm:$0xff] %vm286_vm2, %v5929_v61 }
  0x37   : > { %322 = vst.msk [vmem:[#allocation2 + $0x118] sm:$0xff] %vm286_vm2, %v5929_v61 }
  0x38   : > { %323 = vst.msk [vmem:[#allocation2 + $0x120] sm:$0xff] %vm286_vm2, %v5929_v61 }
  0x39   : > { %324 = vst.msk [vmem:[#allocation2 + $0x128] sm:$0xff] %vm286_vm2, %v5929_v61 }
  0x3a   : > { %5439 = vmatmul.msk.f32.gmra.mxu1 %vm432_vm1, %v6061_v25  ;;  %325 = vst.msk [vmem:[#allocation2 + $0x130] sm:$0xff] %vm286_vm2, %v5929_v61 }
  0x3b   : > { %5451 = vmatmul.msk.f32.gmra.mxu2 %vm432_vm1, %v364_v26  ;;  %326 = vst.msk [vmem:[#allocation2 + $0x138] sm:$0xff] %vm286_vm2, %v5929_v61 }
  0x3c   : > { %5463 = vmatmul.msk.f32.gmra.mxu3 %vm432_vm1, %v376_v27  ;;  %327 = vst.msk [vmem:[#allocation2 + $0x140] sm:$0xff] %vm286_vm2, %v5929_v61 }
  0x3d   : > { %5427 = vmatmul.msk.f32.gmra.mxu0 %vm432_vm1, %v6069_v28  ;;  %328 = vst.msk [vmem:[#allocation2 + $0x148] sm:$0xff] %vm286_vm2, %v5929_v61 }
  0x3e   : > { %329 = vst.msk [vmem:[#allocation2 + $0x150] sm:$0xff] %vm286_vm2, %v5929_v61 }
  0x3f   : > { %330 = vst.msk [vmem:[#allocation2 + $0x158] sm:$0xff] %vm286_vm2, %v5929_v61  ;;  %v419_v16 = vld [vmem:[#allocation2 + $0x120] sm:$0xff] }
  0x40   : > { %331 = vst.msk [vmem:[#allocation2 + $0x160] sm:$0xff] %vm286_vm2, %v5929_v61 }
  0x41   : > { %332 = vst.msk [vmem:[#allocation2 + $0x168] sm:$0xff] %vm286_vm2, %v5929_v61 }
  0x42   : > { %5440 = vmatmul.msk.f32.gmra.mxu1 %vm432_vm1, %v6075_v29  ;;  %333 = vst.msk [vmem:[#allocation2 + $0x170] sm:$0xff] %vm286_vm2, %v5929_v61 }
  0x43   : > { %5452 = vmatmul.msk.f32.gmra.mxu2 %vm432_vm1, %v365_v30  ;;  %334 = vst.msk [vmem:[#allocation2 + $0x178] sm:$0xff] %vm286_vm2, %v5929_v61 }
  0x44   : > { %5464 = vmatmul.msk.f32.gmra.mxu3 %vm432_vm1, %v377_v31  ;;  %1899 = vst.msk [vmem:[#allocation3 + $0x10] sm:$0xff] %vm432_vm1, %v1845_v7  ;;  %v3460_v31 = vld [vmem:[%s5997_s29 + $0x1a] sm:$0xff] }
  0x45   : > { %5428 = vmatmul.msk.f32.gmra.mxu0 %vm432_vm1, %v6083_v32  ;;  %1900 = vst.msk [vmem:[#allocation3 + $0x18] sm:$0xff] %vm432_vm1, %v1846_v11 }
  0x46   : > { %1901 = vst.msk [vmem:[#allocation3 + $0x20] sm:$0xff] %vm432_vm1, %v1847_v14 }
  0x4a   : > { %5441 = vmatmul.msk.f32.gmra.mxu1 %vm432_vm1, %v6089_v33 }
  0x4b   : > { %5453 = vmatmul.msk.f32.gmra.mxu2 %vm432_vm1, %v366_v34  ;;  %v1953_v34 = vld [vmem:[#allocation3 + $0x10] sm:$0xff] }
  0x4c   : > { %5465 = vmatmul.msk.f32.gmra.mxu3 %vm432_vm1, %v378_v35  ;;  %v2453_v35 = vld [vmem:[#allocation3 + $0x18] sm:$0xff] }
  0x4d   : > { %5429 = vmatmul.msk.f32.gmra.mxu0 %vm432_vm1, %v6097_v36  ;;  %3514 = vst.msk [vmem:[#allocation3 + $0x18] sm:$0xff] %vm432_vm1, %v3460_v31  ;;  %v2454_v42 = vld [vmem:[#allocation3 + $0x20] sm:$0xff] }
  0x52   : > { %5442 = vmatmul.msk.f32.gmra.mxu1 %vm432_vm1, %v6103_v37 }
  0x53   : > { %5454 = vmatmul.msk.f32.gmra.mxu2 %vm432_vm1, %v367_v38  ;;  %v420_v38 = vld [vmem:[#allocation2 + $0x128] sm:$0xff] }
  0x54   : > { %5466 = vmatmul.msk.f32.gmra.mxu3 %vm432_vm1, %v379_v39  ;;  %v1849_v39 = vld [vmem:[%s5997_s29 + $0x31] sm:$0xff] }
  0x55   : > { %5430 = vmatmul.msk.f32.gmra.mxu0 %vm432_vm1, %v6111_v40  ;;  %1903 = vst.msk [vmem:[#allocation3 + $0x30] sm:$0xff] %vm432_vm1, %v1849_v39  ;;  %v387_v39 = vld [vmem:[#allocation2 + $0x20] sm:$0xff] }
  0x5a   : > { %5443 = vmatmul.msk.f32.gmra.mxu1 %vm432_vm1, %v6125_v43 }
  0x5b   : > { %5455 = vmatmul.msk.f32.gmra.mxu2 %vm432_vm1, %v368_v44  ;;  %v3462_v44 = vld [vmem:[%s5997_s29 + $0x2a] sm:$0xff] }
  0x5c   : > { %5467 = vmatmul.msk.f32.gmra.mxu3 %vm432_vm1, %v380_v46  ;;  %v398_v46 = vld [vmem:[#allocation2 + $0x78] sm:$0xff]  ;;  %v2456_v31 = vld [vmem:[#allocation3 + $0x30] sm:$0xff] }
  0x5d   : > { %5431 = vmatmul.msk.f32.gmra.mxu0 %vm432_vm1, %v6135_v47 }
  0x62   : > { %5444 = vmatmul.msk.f32.gmra.mxu1 %vm432_vm1, %v6146_v50 }
  0x63   : > { %5456 = vmatmul.msk.f32.gmra.mxu2 %vm432_vm1, %v369_v51 }
  0x64   : > { %5468 = vmatmul.msk.f32.gmra.mxu3 %vm432_vm1, %v381_v54 }
  0x65   : > { %5432 = vmatmul.msk.f32.gmra.mxu0 %vm432_vm1, %v6157_v55 }
  0x6a   : > { %5445 = vmatmul.msk.f32.gmra.mxu1 %vm432_vm1, %v6164_v57 }
  0x6b   : > { %5457 = vmatmul.msk.f32.gmra.mxu2 %vm432_vm1, %v370_v58  ;;  %v384_v58 = vld [vmem:[#allocation2 + $0x8] sm:$0xff] }
  0x6c   : > { %5469 = vmatmul.msk.f32.gmra.mxu3 %vm432_vm1, %v382_v59 }
  0x6d   : > { %5433 = vmatmul.msk.f32.gmra.mxu0 %vm432_vm1, %v6175_v62 }
  0x72   : > { %5472 = vmatmul.msk.f32.vlgmr.msrb.gmra.mxu1 %vm432_vm1, %v6041_v20  ;;  %v1848_v20 = vld [vmem:[%s5997_s29 + $0x29] sm:$0xff] }
  0x73   : > { %5522 = vmatmul.msk.f32.vlgmr.msrb.gmra.mxu2 %vm432_vm1, %v6083_v32  ;;  %1902 = vst.msk [vmem:[#allocation3 + $0x28] sm:$0xff] %vm432_vm1, %v1848_v20  ;;  %v423_v20 = vld [vmem:[#allocation2 + $0x140] sm:$0xff] }
  0x74   : > { %5572 = vmatmul.msk.f32.vlgmr.msrb.gmra.mxu3 %vm432_vm1, %v1951_v52  ;;  %v421_v52 = vld [vmem:[#allocation2 + $0x130] sm:$0xff] }
  0x75   : > { %5622 = vmatmul.msk.f32.vlgmr.msrb.gmra.mxu0 %vm432_vm1, %v2453_v35 }
  0x7a   : > { %5473 = vmatmul.msk.f32.gmra.mxu1 %vm432_vm1, %v6055_v24  ;;  %v6332_v49 = vld [vmem:[#allocation3 + $0x28] sm:$0xff] }
  0x7b   : > { %5523 = vmatmul.msk.f32.gmra.mxu2 %vm432_vm1, %v6097_v36  ;;  %3516 = vst.msk [vmem:[#allocation3 + $0x28] sm:$0xff] %vm432_vm1, %v3462_v44 }
  0x7c   : > { %5573 = vmatmul.msk.f32.gmra.mxu3 %vm432_vm1, %v1952_v60  ;;  %v1850_v60 = vld [vmem:[%s5997_s29 + $0x39] sm:$0xff] }
  0x7d   : > { %5623 = vmatmul.msk.f32.gmra.mxu0 %vm432_vm1, %v2454_v42  ;;  %1904 = vst.msk [vmem:[#allocation3 + $0x38] sm:$0xff] %vm432_vm1, %v1850_v60 }
  0x82   : > { %5474 = vmatmul.msk.f32.gmra.mxu1 %vm432_vm1, %v6069_v28  ;;  %v3459_v28 = vld [vmem:[%s5997_s29 + $0x12] sm:$0xff] }
  0x83   : > { %5524 = vmatmul.msk.f32.gmra.mxu2 %vm432_vm1, %v6111_v40  ;;  %3513 = vst.msk [vmem:[#allocation3 + $0x10] sm:$0xff] %vm432_vm1, %v3459_v28 }
  0x84   : > { %5574 = vmatmul.msk.f32.gmra.mxu3 %vm432_vm1, %v1953_v34  ;;  %v1854_v34 = vld [vmem:[%s5997_s29 + $0x59] sm:$0xff] }
  0x85   : > { %5624 = vmatmul.msk.f32.gmra.mxu0 %vm432_vm1, %v6332_v49  ;;  %1908 = vst.msk [vmem:[#allocation3 + $0x58] sm:$0xff] %vm432_vm1, %v1854_v34  ;;  %v1858_v34 = vld [vmem:[%s5997_s29 + $0x79] sm:$0xff] }
  0x86   : > { %1912 = vst.msk [vmem:[#allocation3 + $0x78] sm:$0xff] %vm432_vm1, %v1858_v34  ;;  %v1359_v34 = vld [vmem:[%s5997_s29 + $0xc0] sm:$0xff] }
  0x8a   : > { %5475 = vmatmul.msk.f32.gmra.mxu1 %vm432_vm1, %v6083_v32 }
  0x8b   : > { %5525 = vmatmul.msk.f32.gmra.mxu2 %vm432_vm1, %v6135_v47 }
  0x8c   : > { %5575 = vmatmul.msk.f32.gmra.mxu3 %vm432_vm1, %v2453_v35  ;;  %v412_v35 = vld [vmem:[#allocation2 + $0xe8] sm:$0xff] }
  0x8d   : > { %5625 = vmatmul.msk.f32.gmra.mxu0 %vm432_vm1, %v2456_v31 }
  0x8f   : > { %v634_v1 = vpop.f32.mrf.mxu1 }
  0x90   : > { %v754_v2 = vadd.f32 %v634_v1, %v395_v0  ;;  %v410_v0 = vld [vmem:[#allocation2 + $0xd8] sm:$0xff] }
  0x92   : > { %803 = vst.msk [vmem:[#allocation2 + $0x60] sm:$0xff] %vm286_vm2, %v754_v2  ;;  %5476 = vmatmul.msk.f32.gmra.mxu1 %vm432_vm1, %v6097_v36  ;;  %v598_v19 = vpop.f32.mrf.mxu0  ;;  %v3461_v36 = vld [vmem:[%s5997_s29 + $0x22] sm:$0xff] }
  0x93   : > { %5526 = vmatmul.msk.f32.gmra.mxu2 %vm432_vm1, %v6157_v55  ;;  %3515 = vst.msk [vmem:[#allocation3 + $0x20] sm:$0xff] %vm432_vm1, %v3461_v36  ;;  %v742_v56 = vadd.f32 %v598_v19, %v383_v45  ;;  %v1851_v2 = vld [vmem:[%s5997_s29 + $0x41] sm:$0xff] }
  0x94   : > { %1905 = vst.msk [vmem:[#allocation3 + $0x40] sm:$0xff] %vm432_vm1, %v1851_v2  ;;  %5576 = vmatmul.msk.f32.gmra.mxu3 %vm432_vm1, %v2454_v42  ;;  %v1856_v2 = vld [vmem:[%s5997_s29 + $0x69] sm:$0xff] }
  0x95   : > { %791 = vst.msk [vmem:[#allocation2] sm:$0xff] %vm286_vm2, %v742_v56 }
  0x96   : > { %v670_v4 = vpop.f32.mrf.mxu2  ;;  %1910 = vst.msk [vmem:[#allocation3 + $0x68] sm:$0xff] %vm432_vm1, %v1856_v2  ;;  %v393_v2 = vld [vmem:[#allocation2 + $0x50] sm:$0xff] }
  0x97   : > { %v706_v6 = vpop.f32.mrf.mxu3  ;;  %v637_v8 = vpop.f32.mrf.mxu1  ;;  %v766_v15 = vadd.f32 %v670_v4, %v407_v10  ;;  %v385_v4 = vld [vmem:[#allocation2 + $0x10] sm:$0xff] }
  0x98   : > { %v755_v12 = vadd.f32 %v637_v8, %v396_v3  ;;  %v778_v24 = vadd.f32 %v706_v6, %v419_v16  ;;  %v422_v3 = vld [vmem:[#allocation2 + $0x138] sm:$0xff]  ;;  %v399_v6 = vld [vmem:[#allocation2 + $0x80] sm:$0xff] }
  0x99   : > { %815 = vst.msk [vmem:[#allocation2 + $0xc0] sm:$0xff] %vm286_vm2, %v766_v15  ;;  %v1852_v15 = vld [vmem:[%s5997_s29 + $0x49] sm:$0xff]  ;;  %v1853_v16 = vld [vmem:[%s5997_s29 + $0x51] sm:$0xff] }
  0x9a   : > { %5477 = vmatmul.msk.f32.gmra.mxu1 %vm432_vm1, %v6111_v40  ;;  %804 = vst.msk [vmem:[#allocation2 + $0x68] sm:$0xff] %vm286_vm2, %v755_v12  ;;  %v409_v40 = vld [vmem:[#allocation2 + $0xd0] sm:$0xff]  ;;  %v601_v41 = vpop.f32.mrf.mxu0 }
  0x9b   : > { %5527 = vmatmul.msk.f32.gmra.mxu2 %vm432_vm1, %v6175_v62  ;;  %827 = vst.msk [vmem:[#allocation2 + $0x120] sm:$0xff] %vm286_vm2, %v778_v24  ;;  %v743_v63 = vadd.f32 %v601_v41, %v384_v58  ;;  %v402_v58 = vld [vmem:[#allocation2 + $0x98] sm:$0xff] }
  0x9c   : > { %1906 = vst.msk [vmem:[#allocation3 + $0x48] sm:$0xff] %vm432_vm1, %v1852_v15  ;;  %5577 = vmatmul.msk.f32.gmra.mxu3 %vm432_vm1, %v6332_v49  ;;  %v1855_v49 = vld [vmem:[%s5997_s29 + $0x61] sm:$0xff] }
  0x9d   : > { %792 = vst.msk [vmem:[#allocation2 + $0x8] sm:$0xff] %vm286_vm2, %v743_v63 }
  0x9e   : > { %v673_v23 = vpop.f32.mrf.mxu2  ;;  %1907 = vst.msk [vmem:[#allocation3 + $0x50] sm:$0xff] %vm432_vm1, %v1853_v16 }
  0x9f   : > { %v767_v26 = vadd.f32 %v673_v23, %v408_v18  ;;  %v709_v27 = vpop.f32.mrf.mxu3  ;;  %v640_v30 = vpop.f32.mrf.mxu1  ;;  %v411_v18 = vld [vmem:[#allocation2 + $0xe0] sm:$0xff]  ;;  %v400_v23 = vld [vmem:[#allocation2 + $0x88] sm:$0xff]  ;;  %1909 = vst.msk [vmem:[#allocation3 + $0x60] sm:$0xff] %vm432_vm1, %v1855_v49  ;;  %v417_v49 = vld [vmem:[#allocation2 + $0x110] sm:$0xff] }
  0xa0   : > { %v756_v32 = vadd.f32 %v640_v30, %v397_v22  ;;  %v779_v48 = vadd.f32 %v709_v27, %v420_v38  ;;  %v386_v22 = vld [vmem:[#allocation2 + $0x18] sm:$0xff]  ;;  %v424_v38 = vld [vmem:[#allocation2 + $0x148] sm:$0xff] }
  0xa1   : > { %816 = vst.msk [vmem:[#allocation2 + $0xc8] sm:$0xff] %vm286_vm2, %v767_v26 }
  0xa2   : > { %5478 = vmatmul.msk.f32.gmra.mxu1 %vm432_vm1, %v6135_v47  ;;  %805 = vst.msk [vmem:[#allocation2 + $0x70] sm:$0xff] %vm286_vm2, %v756_v32  ;;  %v604_v1 = vpop.f32.mrf.mxu0 }
  0xa3   : > { %5528 = vmatmul.msk.f32.gmra.mxu2 %vm432_vm1, %v6000_v5  ;;  %828 = vst.msk [vmem:[#allocation2 + $0x128] sm:$0xff] %vm286_vm2, %v779_v48  ;;  %v744_v12 = vadd.f32 %v604_v1, %v385_v4  ;;  %v389_v4 = vld [vmem:[#allocation2 + $0x30] sm:$0xff]  ;;  %v2459_v15 = vld [vmem:[#allocation3 + $0x48] sm:$0xff] }
  0xa4   : > { %5578 = vmatmul.msk.f32.gmra.mxu3 %vm432_vm1, %v2456_v31 }
  0xa5   : > { %793 = vst.msk [vmem:[#allocation2 + $0x10] sm:$0xff] %vm286_vm2, %v744_v12  ;;  %v2460_v31 = vld [vmem:[#allocation3 + $0x50] sm:$0xff] }
  0xa6   : > { %v676_v47 = vpop.f32.mrf.mxu2 }
  0xa7   : > { %v768_v51 = vadd.f32 %v676_v47, %v409_v40  ;;  %v712_v53 = vpop.f32.mrf.mxu3  ;;  %v643_v54 = vpop.f32.mrf.mxu1  ;;  %v401_v40 = vld [vmem:[#allocation2 + $0x90] sm:$0xff]  ;;  %v2457_v47 = vld [vmem:[#allocation3 + $0x38] sm:$0xff] }
  0xa8   : > { %v757_v59 = vadd.f32 %v643_v54, %v398_v46  ;;  %v780_v61 = vadd.f32 %v712_v53, %v421_v52  ;;  %5626 = vmatmul.msk.f32.gmra.mxu0 %vm432_vm1, %v2457_v47  ;;  %v388_v52 = vld [vmem:[#allocation2 + $0x28] sm:$0xff]  ;;  %v425_v54 = vld [vmem:[#allocation2 + $0x150] sm:$0xff] }
  0xa9   : > { %817 = vst.msk [vmem:[#allocation2 + $0xd0] sm:$0xff] %vm286_vm2, %v768_v51  ;;  %v413_v51 = vld [vmem:[#allocation2 + $0xf0] sm:$0xff] }
  0xaa   : > { %806 = vst.msk [vmem:[#allocation2 + $0x78] sm:$0xff] %vm286_vm2, %v757_v59  ;;  %5479 = vmatmul.msk.f32.gmra.mxu1 %vm432_vm1, %v6157_v55  ;;  %v607_v19 = vpop.f32.mrf.mxu0 }
  0xab   : > { %5529 = vmatmul.msk.f32.gmra.mxu2 %vm432_vm1, %v6011_v9  ;;  %829 = vst.msk [vmem:[#allocation2 + $0x130] sm:$0xff] %vm286_vm2, %v780_v61  ;;  %v745_v26 = vadd.f32 %v607_v19, %v386_v22  ;;  %v415_v19 = vld [vmem:[#allocation2 + $0x100] sm:$0xff] }
  0xac   : > { %5579 = vmatmul.msk.f32.gmra.mxu3 %vm432_vm1, %v2457_v47 }
  0xad   : > { %794 = vst.msk [vmem:[#allocation2 + $0x18] sm:$0xff] %vm286_vm2, %v745_v26  ;;  %v404_v26 = vld [vmem:[#allocation2 + $0xa8] sm:$0xff] }
  0xae   : > { %v679_v7 = vpop.f32.mrf.mxu2 }
  0xaf   : > { %v769_v55 = vadd.f32 %v679_v7, %v410_v0  ;;  %v715_v8 = vpop.f32.mrf.mxu3  ;;  %v646_v10 = vpop.f32.mrf.mxu1  ;;  %v2458_v0 = vld [vmem:[#allocation3 + $0x40] sm:$0xff]  ;;  %v426_v7 = vld [vmem:[#allocation2 + $0x158] sm:$0xff] }
  0xb0   : > { %v781_v11 = vadd.f32 %v715_v8, %v422_v3  ;;  %v758_v14 = vadd.f32 %v646_v10, %v399_v6  ;;  %5627 = vmatmul.msk.f32.gmra.mxu0 %vm432_vm1, %v2458_v0  ;;  %v414_v3 = vld [vmem:[#allocation2 + $0xf8] sm:$0xff]  ;;  %v403_v8 = vld [vmem:[#allocation2 + $0xa0] sm:$0xff] }
  0xb1   : > { %818 = vst.msk [vmem:[#allocation2 + $0xd8] sm:$0xff] %vm286_vm2, %v769_v55 }
  0xb2   : > { %830 = vst.msk [vmem:[#allocation2 + $0x138] sm:$0xff] %vm286_vm2, %v781_v11  ;;  %5480 = vmatmul.msk.f32.gmra.mxu1 %vm432_vm1, %v6175_v62  ;;  %v610_v36 = vpop.f32.mrf.mxu0 }
  0xb3   : > { %807 = vst.msk [vmem:[#allocation2 + $0x80] sm:$0xff] %vm286_vm2, %v758_v14  ;;  %5530 = vmatmul.msk.f32.gmra.mxu2 %vm432_vm1, %v6022_v13  ;;  %v746_v42 = vadd.f32 %v610_v36, %v387_v39  ;;  %v391_v36 = vld [vmem:[#allocation2 + $0x40] sm:$0xff]  ;;  %v428_v39 = vld [vmem:[#allocation2 + $0x168] sm:$0xff] }
  0xb4   : > { %5580 = vmatmul.msk.f32.gmra.mxu3 %vm432_vm1, %v2458_v0  ;;  %v1860_v0 = vld [vmem:[%s5997_s29 + $0x89] sm:$0xff] }
  0xb5   : > { %795 = vst.msk [vmem:[#allocation2 + $0x20] sm:$0xff] %vm286_vm2, %v746_v42 }
  0xb6   : > { %v682_v24 = vpop.f32.mrf.mxu2  ;;  %1914 = vst.msk [vmem:[#allocation3 + $0x88] sm:$0xff] %vm432_vm1, %v1860_v0 }
  0xb7   : > { %v770_v62 = vadd.f32 %v682_v24, %v411_v18  ;;  %v718_v27 = vpop.f32.mrf.mxu3  ;;  %v649_v28 = vpop.f32.mrf.mxu1  ;;  %v1857_v18 = vld [vmem:[%s5997_s29 + $0x71] sm:$0xff] }
  0xb8   : > { %v782_v30 = vadd.f32 %v718_v27, %v423_v20  ;;  %v759_v32 = vadd.f32 %v649_v28, %v400_v23  ;;  %5628 = vmatmul.msk.f32.gmra.mxu0 %vm432_vm1, %v2459_v15  ;;  %v390_v20 = vld [vmem:[#allocation2 + $0x38] sm:$0xff]  ;;  %1911 = vst.msk [vmem:[#allocation3 + $0x70] sm:$0xff] %vm432_vm1, %v1857_v18  ;;  %v427_v23 = vld [vmem:[#allocation2 + $0x160] sm:$0xff] }
  0xb9   : > { %819 = vst.msk [vmem:[#allocation2 + $0xe0] sm:$0xff] %vm286_vm2, %v770_v62 }
  0xba   : > { %831 = vst.msk [vmem:[#allocation2 + $0x140] sm:$0xff] %vm286_vm2, %v782_v30  ;;  %5481 = vmatmul.msk.f32.gmra.mxu1 %vm432_vm1, %v6000_v5  ;;  %v613_v53 = vpop.f32.mrf.mxu0 }
  0xbb   : > { %808 = vst.msk [vmem:[#allocation2 + $0x88] sm:$0xff] %vm286_vm2, %v759_v32  ;;  %5531 = vmatmul.msk.f32.gmra.mxu2 %vm432_vm1, %v6033_v17  ;;  %v747_v56 = vadd.f32 %v613_v53, %v388_v52  ;;  %v429_v53 = vld [vmem:[#allocation2 + $0x170] sm:$0xff] }
  0xbc   : > { %5581 = vmatmul.msk.f32.gmra.mxu3 %vm432_vm1, %v2459_v15  ;;  %v394_v15 = vld [vmem:[#allocation2 + $0x58] sm:$0xff] }
  0xbd   : > { %796 = vst.msk [vmem:[#allocation2 + $0x28] sm:$0xff] %vm286_vm2, %v747_v56  ;;  %v406_v56 = vld [vmem:[#allocation2 + $0xb8] sm:$0xff] }
  0xbe   : > { %v685_v41 = vpop.f32.mrf.mxu2 }
  0xbf   : > { %v771_v44 = vadd.f32 %v685_v41, %v412_v35  ;;  %v721_v45 = vpop.f32.mrf.mxu3  ;;  %v652_v46 = vpop.f32.mrf.mxu1  ;;  %v416_v35 = vld [vmem:[#allocation2 + $0x108] sm:$0xff]  ;;  %v405_v41 = vld [vmem:[#allocation2 + $0xb0] sm:$0xff] }
  0xc0   : > { %v783_v5 = vadd.f32 %v721_v45, %v424_v38  ;;  %v760_v48 = vadd.f32 %v652_v46, %v401_v40  ;;  %5629 = vmatmul.msk.f32.gmra.mxu0 %vm432_vm1, %v2460_v31 }
  0xc1   : > { %820 = vst.msk [vmem:[#allocation2 + $0xe8] sm:$0xff] %vm286_vm2, %v771_v44 }
  0xc2   : > { %832 = vst.msk [vmem:[#allocation2 + $0x148] sm:$0xff] %vm286_vm2, %v783_v5  ;;  %5482 = vmatmul.msk.f32.gmra.mxu1 %vm432_vm1, %v6011_v9  ;;  %v616_v6 = vpop.f32.mrf.mxu0  ;;  %v2461_v5 = vld [vmem:[#allocation3 + $0x58] sm:$0xff] }
  0xc3   : > { %809 = vst.msk [vmem:[#allocation2 + $0x90] sm:$0xff] %vm286_vm2, %v760_v48  ;;  %5532 = vmatmul.msk.f32.gmra.mxu2 %vm432_vm1, %v6047_v21  ;;  %v748_v55 = vadd.f32 %v616_v6, %v389_v4  ;;  %v1859_v48 = vld [vmem:[%s5997_s29 + $0x81] sm:$0xff]  ;;  %v430_v4 = vld [vmem:[#allocation2 + $0x178] sm:$0xff] }
  0xc4   : > { %5582 = vmatmul.msk.f32.gmra.mxu3 %vm432_vm1, %v2460_v31  ;;  %1913 = vst.msk [vmem:[#allocation3 + $0x80] sm:$0xff] %vm432_vm1, %v1859_v48  ;;  %v2465_v31 = vld [vmem:[#allocation3 + $0x78] sm:$0xff] }
  0xc5   : > { %797 = vst.msk [vmem:[#allocation2 + $0x30] sm:$0xff] %vm286_vm2, %v748_v55 }
  0xc6   : > { %v688_v59 = vpop.f32.mrf.mxu2 }
  0xc7   : > { %v772_v60 = vadd.f32 %v688_v59, %v413_v51  ;;  %v724_v61 = vpop.f32.mrf.mxu3  ;;  %v655_v9 = vpop.f32.mrf.mxu1  ;;  %v392_v51 = vld [vmem:[#allocation2 + $0x48] sm:$0xff] }
  0xc8   : > { %v784_v63 = vadd.f32 %v724_v61, %v425_v54  ;;  %v761_v1 = vadd.f32 %v655_v9, %v402_v58  ;;  %5630 = vmatmul.msk.f32.gmra.mxu0 %vm432_vm1, %v2461_v5  ;;  %v2462_v9 = vld [vmem:[#allocation3 + $0x60] sm:$0xff] }
  0xc9   : > { %821 = vst.msk [vmem:[#allocation2 + $0xf0] sm:$0xff] %vm286_vm2, %v772_v60 }
  0xca   : > { %833 = vst.msk [vmem:[#allocation2 + $0x150] sm:$0xff] %vm286_vm2, %v784_v63  ;;  %5483 = vmatmul.msk.f32.gmra.mxu1 %vm432_vm1, %v6022_v13  ;;  %v619_v22 = vpop.f32.mrf.mxu0 }
  0xcb   : > { %810 = vst.msk [vmem:[#allocation2 + $0x98] sm:$0xff] %vm286_vm2, %v761_v1  ;;  %5533 = vmatmul.msk.f32.gmra.mxu2 %vm432_vm1, %v6061_v25  ;;  %v749_v24 = vadd.f32 %v619_v22, %v390_v20  ;;  %v418_v1 = vld [vmem:[#allocation2 + $0x118] sm:$0xff]  ;;  %v888_v20 = vld [vmem:[#allocation2 + $0x8] sm:$0xff] }
  0xcc   : > { %5583 = vmatmul.msk.f32.gmra.mxu3 %vm432_vm1, %v2461_v5  ;;  %v1864_v5 = vld [vmem:[%s5997_s29 + $0xa9] sm:$0xff] }
  0xcd   : > { %798 = vst.msk [vmem:[#allocation2 + $0x38] sm:$0xff] %vm286_vm2, %v749_v24 }
  0xce   : > { %v691_v10 = vpop.f32.mrf.mxu2  ;;  %1918 = vst.msk [vmem:[#allocation3 + $0xa8] sm:$0xff] %vm432_vm1, %v1864_v5 }
  0xcf   : > { %v773_v11 = vadd.f32 %v691_v10, %v414_v3  ;;  %v727_v12 = vpop.f32.mrf.mxu3  ;;  %v658_v13 = vpop.f32.mrf.mxu1 }
  0xd0   : > { %v785_v14 = vadd.f32 %v727_v12, %v426_v7  ;;  %v762_v16 = vadd.f32 %v658_v13, %v403_v8  ;;  %5631 = vmatmul.msk.f32.gmra.mxu0 %vm432_vm1, %v2462_v9  ;;  %v2463_v12 = vld [vmem:[#allocation3 + $0x68] sm:$0xff] }
  0xd1   : > { %822 = vst.msk [vmem:[#allocation2 + $0xf8] sm:$0xff] %vm286_vm2, %v773_v11 }
  0xd2   : > { %834 = vst.msk [vmem:[#allocation2 + $0x158] sm:$0xff] %vm286_vm2, %v785_v14  ;;  %5484 = vmatmul.msk.f32.gmra.mxu1 %vm432_vm1, %v6033_v17  ;;  %v622_v38 = vpop.f32.mrf.mxu0  ;;  %v1861_v14 = vld [vmem:[%s5997_s29 + $0x91] sm:$0xff] }
  0xd3   : > { %811 = vst.msk [vmem:[#allocation2 + $0xa0] sm:$0xff] %vm286_vm2, %v762_v16  ;;  %5534 = vmatmul.msk.f32.gmra.mxu2 %vm432_vm1, %v6075_v29  ;;  %v750_v40 = vadd.f32 %v622_v38, %v391_v36 }
  0xd4   : > { %5584 = vmatmul.msk.f32.gmra.mxu3 %vm432_vm1, %v2462_v9  ;;  %1915 = vst.msk [vmem:[#allocation3 + $0x90] sm:$0xff] %vm432_vm1, %v1861_v14 }
  0xd5   : > { %799 = vst.msk [vmem:[#allocation2 + $0x40] sm:$0xff] %vm286_vm2, %v750_v40  ;;  %v890_v40 = vld [vmem:[#allocation2 + $0x18] sm:$0xff] }
  0xd6   : > { %v694_v62 = vpop.f32.mrf.mxu2 }
  0xd7   : > { %v774_v27 = vadd.f32 %v694_v62, %v415_v19  ;;  %v730_v28 = vpop.f32.mrf.mxu3  ;;  %v661_v17 = vpop.f32.mrf.mxu1  ;;  %v1862_v62 = vld [vmem:[%s5997_s29 + $0x99] sm:$0xff] }
  0xd8   : > { %v786_v30 = vadd.f32 %v730_v28, %v427_v23  ;;  %v763_v32 = vadd.f32 %v661_v17, %v404_v26  ;;  %5632 = vmatmul.msk.f32.gmra.mxu0 %vm432_vm1, %v2463_v12  ;;  %v2464_v23 = vld [vmem:[#allocation3 + $0x70] sm:$0xff]  ;;  %1916 = vst.msk [vmem:[#allocation3 + $0x98] sm:$0xff] %vm432_vm1, %v1862_v62 }
  0xd9   : > { %823 = vst.msk [vmem:[#allocation2 + $0x100] sm:$0xff] %vm286_vm2, %v774_v27  ;;  %v889_v28 = vld [vmem:[#allocation2 + $0x10] sm:$0xff] }
  0xda   : > { %835 = vst.msk [vmem:[#allocation2 + $0x160] sm:$0xff] %vm286_vm2, %v786_v30  ;;  %5485 = vmatmul.msk.f32.gmra.mxu1 %vm432_vm1, %v6047_v21  ;;  %v625_v52 = vpop.f32.mrf.mxu0 }
  0xdb   : > { %812 = vst.msk [vmem:[#allocation2 + $0xa8] sm:$0xff] %vm286_vm2, %v763_v32  ;;  %5535 = vmatmul.msk.f32.gmra.mxu2 %vm432_vm1, %v6089_v33  ;;  %v751_v54 = vadd.f32 %v625_v52, %v392_v51  ;;  %v891_v51 = vld [vmem:[#allocation2 + $0x20] sm:$0xff] }
  0xdc   : > { %5585 = vmatmul.msk.f32.gmra.mxu3 %vm432_vm1, %v2463_v12  ;;  %v6523_v12 = vld [vmem:[%s5997_s29 + $0xe0] sm:$0xff] }
  0xdd   : > { %800 = vst.msk [vmem:[#allocation2 + $0x48] sm:$0xff] %vm286_vm2, %v751_v54  ;;  %v2467_v54 = vld [vmem:[#allocation3 + $0x88] sm:$0xff] }
  0xde   : > { %v697_v42 = vpop.f32.mrf.mxu2 }
  0xdf   : > { %v775_v44 = vadd.f32 %v697_v42, %v416_v35  ;;  %v733_v45 = vpop.f32.mrf.mxu3  ;;  %v664_v21 = vpop.f32.mrf.mxu1  ;;  %v2466_v42 = vld [vmem:[#allocation3 + $0x80] sm:$0xff] }
  0xe0   : > { %v787_v46 = vadd.f32 %v733_v45, %v428_v39  ;;  %v764_v47 = vadd.f32 %v664_v21, %v405_v41  ;;  %5633 = vmatmul.msk.f32.gmra.mxu0 %vm432_vm1, %v2464_v23 }
  0xe1   : > { %824 = vst.msk [vmem:[#allocation2 + $0x108] sm:$0xff] %vm286_vm2, %v775_v44 }
  0xe2   : > { %836 = vst.msk [vmem:[#allocation2 + $0x168] sm:$0xff] %vm286_vm2, %v787_v46  ;;  %5486 = vmatmul.msk.f32.gmra.mxu1 %vm432_vm1, %v6061_v25  ;;  %v628_v3 = vpop.f32.mrf.mxu0 }
  0xe3   : > { %813 = vst.msk [vmem:[#allocation2 + $0xb0] sm:$0xff] %vm286_vm2, %v764_v47  ;;  %5536 = vmatmul.msk.f32.gmra.mxu2 %vm432_vm1, %v6103_v37  ;;  %v752_v6 = vadd.f32 %v628_v3, %v393_v2 }
  0xe4   : > { %5586 = vmatmul.msk.f32.gmra.mxu3 %vm432_vm1, %v2464_v23 }
  0xe5   : > { %801 = vst.msk [vmem:[#allocation2 + $0x50] sm:$0xff] %vm286_vm2, %v752_v6 }
  0xe6   : > { %v700_v58 = vpop.f32.mrf.mxu2 }
  0xe7   : > { %v776_v59 = vadd.f32 %v700_v58, %v417_v49  ;;  %v736_v60 = vpop.f32.mrf.mxu3  ;;  %v667_v25 = vpop.f32.mrf.mxu1 }
  0xe8   : > { %v788_v61 = vadd.f32 %v736_v60, %v429_v53  ;;  %v765_v63 = vadd.f32 %v667_v25, %v406_v56  ;;  %5634 = vmatmul.msk.f32.gmra.mxu0 %vm432_vm1, %v2465_v31  ;;  %v859_v53 = vld [vmem:[%s5997_s29 + $0xb8] sm:$0xff]  ;;  %v6499_v56 = vld [vmem:[%s5997_s29 + $0xd0] sm:$0xff] }
  0xe9   : > { %825 = vst.msk [vmem:[#allocation2 + $0x110] sm:$0xff] %vm286_vm2, %v776_v59  ;;  %v1865_v60 = vld [vmem:[%s5997_s29 + $0xb1] sm:$0xff] }
  0xea   : > { %837 = vst.msk [vmem:[#allocation2 + $0x170] sm:$0xff] %vm286_vm2, %v788_v61  ;;  %5487 = vmatmul.msk.f32.gmra.mxu1 %vm432_vm1, %v6075_v29  ;;  %v887_v29 = vld [vmem:[#allocation2] sm:$0xff]  ;;  %v631_v16 = vpop.f32.mrf.mxu0  ;;  %v892_v61 = vld [vmem:[#allocation2 + $0x28] sm:$0xff] }
  0xeb   : > { %814 = vst.msk [vmem:[#allocation2 + $0xb8] sm:$0xff] %vm286_vm2, %v765_v63  ;;  %5537 = vmatmul.msk.f32.gmra.mxu2 %vm432_vm1, %v6125_v43  ;;  %v753_v18 = vadd.f32 %v631_v16, %v394_v15  ;;  %v2468_v63 = vld [vmem:[#allocation3 + $0x90] sm:$0xff]  ;;  %v1867_v16 = vld [vmem:[%s5997_s29 + $0xc1] sm:$0xff] }
  0xec   : > { %5587 = vmatmul.msk.f32.gmra.mxu3 %vm432_vm1, %v2465_v31  ;;  %1919 = vst.msk [vmem:[#allocation3 + $0xb0] sm:$0xff] %vm432_vm1, %v1865_v60 }
  0xed   : > { %802 = vst.msk [vmem:[#allocation2 + $0x58] sm:$0xff] %vm286_vm2, %v753_v18 }
  0xee   : > { %v703_v7 = vpop.f32.mrf.mxu2  ;;  %1921 = vst.msk [vmem:[#allocation3 + $0xc0] sm:$0xff] %vm432_vm1, %v1867_v16 }
  0xef   : > { %v777_v55 = vadd.f32 %v703_v7, %v418_v1  ;;  %v739_v8 = vpop.f32.mrf.mxu3  ;;  %v1101_v10 = vpop.f32.mrf.mxu1  ;;  %v6511_v1 = vld [vmem:[%s5997_s29 + $0xd8] sm:$0xff] }
  0xf0   : > { %v789_v11 = vadd.f32 %v739_v8, %v430_v4  ;;  %v1245_v13 = vadd.f32 %v1101_v10, %v887_v29  ;;  %5635 = vmatmul.msk.f32.gmra.mxu0 %vm432_vm1, %v2466_v42  ;;  %v1866_v4 = vld [vmem:[%s5997_s29 + $0xb9] sm:$0xff] }
  0xf1   : > { %826 = vst.msk [vmem:[#allocation2 + $0x118] sm:$0xff] %vm286_vm2, %v777_v55  ;;  %v893_v55 = vld [vmem:[#allocation2 + $0x30] sm:$0xff]  ;;  %v2469_v10 = vld [vmem:[#allocation3 + $0x98] sm:$0xff] }
  0xf2   : > { %838 = vst.msk [vmem:[#allocation2 + $0x178] sm:$0xff] %vm286_vm2, %v789_v11  ;;  %5488 = vmatmul.msk.f32.gmra.mxu1 %vm432_vm1, %v6089_v33  ;;  %v2715_v29 = vpop.f32.mrf.mxu0 }
  0xf3   : > { %1293 = vst.msk [vmem:[#allocation2] sm:$0xff] %vm286_vm2, %v1245_v13  ;;  %5538 = vmatmul.msk.f32.gmra.mxu2 %vm432_vm1, %v6146_v50 }
  0xf4   : > { %5588 = vmatmul.msk.f32.gmra.mxu3 %vm432_vm1, %v2466_v42  ;;  %1920 = vst.msk [vmem:[#allocation3 + $0xb8] sm:$0xff] %vm432_vm1, %v1866_v4 }
  0xf6   : > { %v1603_v19 = vpop.f32.mrf.mxu2 }
  0xf7   : > { %v1104_v22 = vpop.f32.mrf.mxu1  ;;  %v2213_v30 = vpop.f32.mrf.mxu3 }
  0xf8   : > { %v1246_v24 = vadd.f32 %v1104_v22, %v888_v20  ;;  %5636 = vmatmul.msk.f32.gmra.mxu0 %vm432_vm1, %v2467_v54 }
  0xfa   : > { %v1389_v33 = vld [vmem:[#allocation2] sm:$0xff]  ;;  %1294 = vst.msk [vmem:[#allocation2 + $0x8] sm:$0xff] %vm286_vm2, %v1246_v24  ;;  %5489 = vmatmul.msk.f32.gmra.mxu1 %vm432_vm1, %v6103_v37  ;;  %v894_v24 = vld [vmem:[#allocation2 + $0x38] sm:$0xff] }
  0xfb   : > { %v1747_v26 = vadd.f32 %v1603_v19, %v1389_v33  ;;  %5539 = vmatmul.msk.f32.gmra.mxu2 %vm432_vm1, %v6164_v57  ;;  %v1863_v57 = vld [vmem:[%s5997_s29 + $0xa1] sm:$0xff] }
  0xfc   : > { %1917 = vst.msk [vmem:[#allocation3 + $0xa0] sm:$0xff] %vm432_vm1, %v1863_v57  ;;  %5589 = vmatmul.msk.f32.gmra.mxu3 %vm432_vm1, %v2467_v54 }
  0xfd   : > { %1795 = vst.msk [vmem:[#allocation2] sm:$0xff] %vm286_vm2, %v1747_v26  ;;  %v2718_v26 = vpop.f32.mrf.mxu0 }
  0xfe   : > { %v1606_v27 = vpop.f32.mrf.mxu2 }
  0xff   : > { %v1107_v17 = vpop.f32.mrf.mxu1  ;;  %v2216_v21 = vpop.f32.mrf.mxu3 }
 0x100   : > { %v1247_v32 = vadd.f32 %v1107_v17, %v889_v28  ;;  %5637 = vmatmul.msk.f32.gmra.mxu0 %vm432_vm1, %v2468_v63  ;;  %v6537_v28 = vld [vmem:[%s5997_s29 + $0xe8] sm:$0xff] }
 0x101   : > { %v1390_v35 = vld [vmem:[#allocation2 + $0x8] sm:$0xff] }
 0x102   : > { %1295 = vst.msk [vmem:[#allocation2 + $0x10] sm:$0xff] %vm286_vm2, %v1247_v32  ;;  %v1748_v37 = vadd.f32 %v1606_v27, %v1390_v35  ;;  %5490 = vmatmul.msk.f32.gmra.mxu1 %vm432_vm1, %v6125_v43  ;;  %v1360_v43 = vld [vmem:[%s5997_s29 + $0xc8] sm:$0xff] }
 0x103   : > { %5540 = vmatmul.msk.f32.gmra.mxu2 %vm432_vm1, %v1359_v34  ;;  %v2470_v62 = vld [vmem:[#allocation3 + $0xa0] sm:$0xff]  ;;  %v1868_v32 = vld [vmem:[%s5997_s29 + $0xc9] sm:$0xff] }
 0x104   : > { %v1999_v36 = vld [vmem:[#allocation2] sm:$0xff]  ;;  %1796 = vst.msk [vmem:[#allocation2 + $0x8] sm:$0xff] %vm286_vm2, %v1748_v37  ;;  %5590 = vmatmul.msk.f32.gmra.mxu3 %vm432_vm1, %v2468_v63 }
 0x105   : > { %v2357_v38 = vadd.f32 %v2213_v30, %v1999_v36  ;;  %1922 = vst.msk [vmem:[#allocation3 + $0xc8] sm:$0xff] %vm432_vm1, %v1868_v32 }
 0x106   : > { %v1609_v39 = vpop.f32.mrf.mxu2 }
 0x107   : > { %2405 = vst.msk [vmem:[#allocation2] sm:$0xff] %vm286_vm2, %v2357_v38  ;;  %v1110_v41 = vpop.f32.mrf.mxu1  ;;  %v2219_v19 = vpop.f32.mrf.mxu3  ;;  %v895_v38 = vld [vmem:[#allocation2 + $0x40] sm:$0xff] }
 0x108   : > { %v1248_v44 = vadd.f32 %v1110_v41, %v890_v40  ;;  %5638 = vmatmul.msk.f32.gmra.mxu0 %vm432_vm1, %v2469_v10  ;;  %v2721_v40 = vpop.f32.mrf.mxu0  ;;  %v2471_v41 = vld [vmem:[#allocation3 + $0xa8] sm:$0xff] }
 0x109   : > { %v1391_v45 = vld [vmem:[#allocation2 + $0x10] sm:$0xff] }
 0x10a   : > { %1296 = vst.msk [vmem:[#allocation2 + $0x18] sm:$0xff] %vm286_vm2, %v1248_v44  ;;  %v1749_v46 = vadd.f32 %v1609_v39, %v1391_v45  ;;  %5491 = vmatmul.msk.f32.gmra.mxu1 %vm432_vm1, %v6146_v50  ;;  %v6552_v44 = vld [vmem:[%s5997_s29 + $0xf0] sm:$0xff] }
 0x10b   : > { %v2000_v47 = vld [vmem:[#allocation2 + $0x8] sm:$0xff]  ;;  %5541 = vmatmul.msk.f32.gmra.mxu2 %vm432_vm1, %v1360_v43 }
 0x10c   : > { %1797 = vst.msk [vmem:[#allocation2 + $0x10] sm:$0xff] %vm286_vm2, %v1749_v46  ;;  %v2358_v48 = vadd.f32 %v2216_v21, %v2000_v47  ;;  %5591 = vmatmul.msk.f32.gmra.mxu3 %vm432_vm1, %v2469_v10  ;;  %v1869_v46 = vld [vmem:[%s5997_s29 + $0xd1] sm:$0xff] }
 0x10d   : > { %1923 = vst.msk [vmem:[#allocation3 + $0xd0] sm:$0xff] %vm432_vm1, %v1869_v46 }
 0x10e   : > { %v1612_v49 = vpop.f32.mrf.mxu2  ;;  %2406 = vst.msk [vmem:[#allocation2 + $0x8] sm:$0xff] %vm286_vm2, %v2358_v48  ;;  %v2501_v7 = vld [vmem:[#allocation2] sm:$0xff] }
 0x10f   : > { %v1113_v52 = vpop.f32.mrf.mxu1  ;;  %v2859_v13 = vadd.f32 %v2715_v29, %v2501_v7  ;;  %v2222_v35 = vpop.f32.mrf.mxu3  ;;  %v2473_v7 = vld [vmem:[#allocation3 + $0xb8] sm:$0xff] }
 0x110   : > { %v1249_v50 = vadd.f32 %v1113_v52, %v891_v51  ;;  %5639 = vmatmul.msk.f32.gmra.mxu0 %vm432_vm1, %v2470_v62  ;;  %v896_v52 = vld [vmem:[#allocation2 + $0x48] sm:$0xff]  ;;  %v2724_v54 = vpop.f32.mrf.mxu0 }
 0x111   : > { %v1392_v58 = vld [vmem:[#allocation2 + $0x18] sm:$0xff]  ;;  %2907 = vst.msk [vmem:[#allocation2] sm:$0xff] %vm286_vm2, %v2859_v13 }
 0x112   : > { %1297 = vst.msk [vmem:[#allocation2 + $0x20] sm:$0xff] %vm286_vm2, %v1249_v50  ;;  %v1750_v59 = vadd.f32 %v1612_v49, %v1392_v58  ;;  %5492 = vmatmul.msk.f32.gmra.mxu1 %vm432_vm1, %v859_v53  ;;  %v2472_v50 = vld [vmem:[#allocation3 + $0xb0] sm:$0xff]  ;;  %v6567_v58 = vld [vmem:[%s5997_s29 + $0xf8] sm:$0xff] }
 0x113   : > { %5542 = vmatmul.msk.f32.gmra.mxu2 %vm432_vm1, %v6499_v56  ;;  %v2001_v18 = vld [vmem:[#allocation2 + $0x10] sm:$0xff] }
 0x114   : > { %1798 = vst.msk [vmem:[#allocation2 + $0x18] sm:$0xff] %vm286_vm2, %v1750_v59  ;;  %v2359_v20 = vadd.f32 %v2219_v19, %v2001_v18  ;;  %5592 = vmatmul.msk.f32.gmra.mxu3 %vm432_vm1, %v2470_v62  ;;  %v898_v19 = vld [vmem:[#allocation2 + $0x58] sm:$0xff] }
 0x115   : > { %v2502_v22 = vld [vmem:[#allocation2 + $0x8] sm:$0xff] }
 0x116   : > { %v1615_v25 = vpop.f32.mrf.mxu2  ;;  %2407 = vst.msk [vmem:[#allocation2 + $0x10] sm:$0xff] %vm286_vm2, %v2359_v20  ;;  %v2860_v17 = vadd.f32 %v2718_v26, %v2502_v22 }
 0x117   : > { %v1116_v9 = vpop.f32.mrf.mxu1  ;;  %v2225_v47 = vpop.f32.mrf.mxu3 }
 0x118   : > { %v1250_v0 = vadd.f32 %v1116_v9, %v892_v61  ;;  %2908 = vst.msk [vmem:[#allocation2 + $0x8] sm:$0xff] %vm286_vm2, %v2860_v17  ;;  %5640 = vmatmul.msk.f32.gmra.mxu0 %vm432_vm1, %v2471_v41  ;;  %v1870_v61 = vld [vmem:[%s5997_s29 + $0xd9] sm:$0xff] }
 0x119   : > { %v1393_v2 = vld [vmem:[#allocation2 + $0x20] sm:$0xff]  ;;  %1924 = vst.msk [vmem:[#allocation3 + $0xd8] sm:$0xff] %vm432_vm1, %v1870_v61 }
 0x11a   : > { %1298 = vst.msk [vmem:[#allocation2 + $0x28] sm:$0xff] %vm286_vm2, %v1250_v0  ;;  %v1751_v3 = vadd.f32 %v1615_v25, %v1393_v2  ;;  %5493 = vmatmul.msk.f32.gmra.mxu1 %vm432_vm1, %v1359_v34 }
 0x11b   : > { %5543 = vmatmul.msk.f32.gmra.mxu2 %vm432_vm1, %v6511_v1  ;;  %v2002_v34 = vld [vmem:[#allocation2 + $0x18] sm:$0xff] }
 0x11c   : > { %1799 = vst.msk [vmem:[#allocation2 + $0x20] sm:$0xff] %vm286_vm2, %v1751_v3  ;;  %v2360_v37 = vadd.f32 %v2222_v35, %v2002_v34  ;;  %5593 = vmatmul.msk.f32.gmra.mxu3 %vm432_vm1, %v2471_v41  ;;  %v897_v3 = vld [vmem:[#allocation2 + $0x50] sm:$0xff]  ;;  %v899_v35 = vld [vmem:[#allocation2 + $0x60] sm:$0xff] }
 0x11d   : > { %v2503_v36 = vld [vmem:[#allocation2 + $0x10] sm:$0xff] }
 0x11e   : > { %v1618_v6 = vpop.f32.mrf.mxu2  ;;  %2408 = vst.msk [vmem:[#allocation2 + $0x18] sm:$0xff] %vm286_vm2, %v2360_v37 }
 0x11f   : > { %v1119_v8 = vpop.f32.mrf.mxu1  ;;  %v2228_v63 = vpop.f32.mrf.mxu3 }
 0x120   : > { %v1251_v11 = vadd.f32 %v1119_v8, %v893_v55  ;;  %5641 = vmatmul.msk.f32.gmra.mxu0 %vm432_vm1, %v2472_v50  ;;  %v6582_v8 = vld [vmem:[%s5997_s29 + $0x100] sm:$0xff] }
 0x121   : > { %v1394_v14 = vld [vmem:[#allocation2 + $0x28] sm:$0xff] }
 0x122   : > { %1299 = vst.msk [vmem:[#allocation2 + $0x30] sm:$0xff] %vm286_vm2, %v1251_v11  ;;  %v1752_v15 = vadd.f32 %v1618_v6, %v1394_v14  ;;  %5494 = vmatmul.msk.f32.gmra.mxu1 %vm432_vm1, %v1360_v43  ;;  %v2861_v43 = vadd.f32 %v2721_v40, %v2503_v36  ;;  %v2475_v36 = vld [vmem:[#allocation3 + $0xc8] sm:$0xff] }
 0x123   : > { %5544 = vmatmul.msk.f32.gmra.mxu2 %vm432_vm1, %v6523_v12  ;;  %v2003_v5 = vld [vmem:[#allocation2 + $0x20] sm:$0xff] }
 0x124   : > { %1800 = vst.msk [vmem:[#allocation2 + $0x28] sm:$0xff] %vm286_vm2, %v1752_v15  ;;  %v2361_v48 = vadd.f32 %v2225_v47, %v2003_v5  ;;  %5594 = vmatmul.msk.f32.gmra.mxu3 %vm432_vm1, %v2472_v50  ;;  %v900_v47 = vld [vmem:[#allocation2 + $0x68] sm:$0xff] }
 0x125   : > { %2909 = vst.msk [vmem:[#allocation2 + $0x10] sm:$0xff] %vm286_vm2, %v2861_v43  ;;  %v2504_v51 = vld [vmem:[#allocation2 + $0x18] sm:$0xff]  ;;  %v2727_v6 = vpop.f32.mrf.mxu0 }
 0x126   : > { %v1621_v23 = vpop.f32.mrf.mxu2  ;;  %2409 = vst.msk [vmem:[#allocation2 + $0x20] sm:$0xff] %vm286_vm2, %v2361_v48  ;;  %v2862_v59 = vadd.f32 %v2724_v54, %v2504_v51  ;;  %v2476_v51 = vld [vmem:[#allocation3 + $0xd0] sm:$0xff] }
 0x127   : > { %v1122_v33 = vpop.f32.mrf.mxu1  ;;  %v2231_v14 = vpop.f32.mrf.mxu3 }
 0x128   : > { %v1252_v27 = vadd.f32 %v1122_v33, %v894_v24  ;;  %2910 = vst.msk [vmem:[#allocation2 + $0x18] sm:$0xff] %vm286_vm2, %v2862_v59  ;;  %5642 = vmatmul.msk.f32.gmra.mxu0 %vm432_vm1, %v2473_v7  ;;  %v6597_v33 = vld [vmem:[%s5997_s29 + $0x108] sm:$0xff] }
 0x129   : > { %v1395_v30 = vld [vmem:[#allocation2 + $0x30] sm:$0xff] }
 0x12a   : > { %1300 = vst.msk [vmem:[#allocation2 + $0x38] sm:$0xff] %vm286_vm2, %v1252_v27  ;;  %v1753_v31 = vadd.f32 %v1621_v23, %v1395_v30  ;;  %5495 = vmatmul.msk.f32.gmra.mxu1 %vm432_vm1, %v6499_v56  ;;  %v2474_v23 = vld [vmem:[#allocation3 + $0xc0] sm:$0xff] }
 0x12b   : > { %5545 = vmatmul.msk.f32.gmra.mxu2 %vm432_vm1, %v6537_v28  ;;  %v2004_v9 = vld [vmem:[#allocation2 + $0x28] sm:$0xff] }
 0x12c   : > { %1801 = vst.msk [vmem:[#allocation2 + $0x30] sm:$0xff] %vm286_vm2, %v1753_v31  ;;  %v2362_v0 = vadd.f32 %v2228_v63, %v2004_v9  ;;  %5595 = vmatmul.msk.f32.gmra.mxu3 %vm432_vm1, %v2473_v7  ;;  %v901_v63 = vld [vmem:[#allocation2 + $0x70] sm:$0xff] }
 0x12d   : > { %v2505_v2 = vld [vmem:[#allocation2 + $0x20] sm:$0xff]  ;;  %v2730_v22 = vpop.f32.mrf.mxu0 }
 0x12e   : > { %v1624_v57 = vpop.f32.mrf.mxu2  ;;  %2410 = vst.msk [vmem:[#allocation2 + $0x28] sm:$0xff] %vm286_vm2, %v2362_v0  ;;  %v2863_v29 = vadd.f32 %v2727_v6, %v2505_v2  ;;  %v2477_v2 = vld [vmem:[#allocation3 + $0xd8] sm:$0xff] }
 0x12f   : > { %v1125_v39 = vpop.f32.mrf.mxu1  ;;  %v2234_v30 = vpop.f32.mrf.mxu3 }
 0x130   : > { %v1253_v42 = vadd.f32 %v1125_v39, %v895_v38  ;;  %2911 = vst.msk [vmem:[#allocation2 + $0x20] sm:$0xff] %vm286_vm2, %v2863_v29  ;;  %5643 = vmatmul.msk.f32.gmra.mxu0 %vm432_vm1, %v2474_v23  ;;  %v6612_v39 = vld [vmem:[%s5997_s29 + $0x110] sm:$0xff] }
 0x131   : > { %v1396_v45 = vld [vmem:[#allocation2 + $0x38] sm:$0xff] }
 0x132   : > { %1301 = vst.msk [vmem:[#allocation2 + $0x40] sm:$0xff] %vm286_vm2, %v1253_v42  ;;  %v1754_v21 = vadd.f32 %v1624_v57, %v1396_v45  ;;  %5496 = vmatmul.msk.f32.gmra.mxu1 %vm432_vm1, %v6511_v1 }
 0x133   : > { %5546 = vmatmul.msk.f32.gmra.mxu2 %vm432_vm1, %v6552_v44  ;;  %v2005_v13 = vld [vmem:[#allocation2 + $0x30] sm:$0xff] }
 0x134   : > { %1802 = vst.msk [vmem:[#allocation2 + $0x38] sm:$0xff] %vm286_vm2, %v1754_v21  ;;  %v2363_v15 = vadd.f32 %v2231_v14, %v2005_v13  ;;  %5596 = vmatmul.msk.f32.gmra.mxu3 %vm432_vm1, %v2474_v23  ;;  %v902_v14 = vld [vmem:[#allocation2 + $0x78] sm:$0xff] }
 0x135   : > { %v2506_v18 = vld [vmem:[#allocation2 + $0x28] sm:$0xff]  ;;  %v2733_v57 = vpop.f32.mrf.mxu0 }
 0x136   : > { %v1627_v49 = vpop.f32.mrf.mxu2  ;;  %2411 = vst.msk [vmem:[#allocation2 + $0x30] sm:$0xff] %vm286_vm2, %v2363_v15  ;;  %v2864_v26 = vadd.f32 %v2730_v22, %v2506_v18 }
 0x137   : > { %v1128_v53 = vpop.f32.mrf.mxu1  ;;  %v2237_v45 = vpop.f32.mrf.mxu3 }
 0x138   : > { %v1254_v56 = vadd.f32 %v1128_v53, %v896_v52  ;;  %2912 = vst.msk [vmem:[#allocation2 + $0x28] sm:$0xff] %vm286_vm2, %v2864_v26  ;;  %5644 = vmatmul.msk.f32.gmra.mxu0 %vm432_vm1, %v2475_v36  ;;  %v6627_v53 = vld [vmem:[%s5997_s29 + $0x118] sm:$0xff] }
 0x139   : > { %v1397_v60 = vld [vmem:[#allocation2 + $0x40] sm:$0xff] }
 0x13a   : > { %1302 = vst.msk [vmem:[#allocation2 + $0x48] sm:$0xff] %vm286_vm2, %v1254_v56  ;;  %v1755_v25 = vadd.f32 %v1627_v49, %v1397_v60  ;;  %5497 = vmatmul.msk.f32.gmra.mxu1 %vm432_vm1, %v6523_v12  ;;  %v1871_v12 = vld [vmem:[%s5997_s29 + $0xe1] sm:$0xff] }
 0x13b   : > { %5547 = vmatmul.msk.f32.gmra.mxu2 %vm432_vm1, %v6567_v58  ;;  %1925 = vst.msk [vmem:[#allocation3 + $0xe0] sm:$0xff] %vm432_vm1, %v1871_v12  ;;  %v2006_v17 = vld [vmem:[#allocation2 + $0x38] sm:$0xff] }
 0x13c   : > { %1803 = vst.msk [vmem:[#allocation2 + $0x40] sm:$0xff] %vm286_vm2, %v1755_v25  ;;  %v2364_v31 = vadd.f32 %v2234_v30, %v2006_v17  ;;  %5597 = vmatmul.msk.f32.gmra.mxu3 %vm432_vm1, %v2475_v36  ;;  %v903_v30 = vld [vmem:[#allocation2 + $0x80] sm:$0xff] }
 0x13d   : > { %v2507_v34 = vld [vmem:[#allocation2 + $0x30] sm:$0xff]  ;;  %v2736_v49 = vpop.f32.mrf.mxu0 }
 0x13e   : > { %v1630_v1 = vpop.f32.mrf.mxu2  ;;  %2412 = vst.msk [vmem:[#allocation2 + $0x38] sm:$0xff] %vm286_vm2, %v2364_v31  ;;  %v2865_v40 = vadd.f32 %v2733_v57, %v2507_v34 }
 0x13f   : > { %v1131_v4 = vpop.f32.mrf.mxu1  ;;  %v2240_v60 = vpop.f32.mrf.mxu3 }
 0x140   : > { %v1255_v55 = vadd.f32 %v1131_v4, %v897_v3  ;;  %2913 = vst.msk [vmem:[#allocation2 + $0x30] sm:$0xff] %vm286_vm2, %v2865_v40  ;;  %5645 = vmatmul.msk.f32.gmra.mxu0 %vm432_vm1, %v2476_v51  ;;  %v6642_v4 = vld [vmem:[%s5997_s29 + $0x120] sm:$0xff] }
 0x141   : > { %v1398_v10 = vld [vmem:[#allocation2 + $0x48] sm:$0xff] }
 0x142   : > { %1303 = vst.msk [vmem:[#allocation2 + $0x50] sm:$0xff] %vm286_vm2, %v1255_v55  ;;  %v1756_v11 = vadd.f32 %v1630_v1, %v1398_v10  ;;  %5498 = vmatmul.msk.f32.gmra.mxu1 %vm432_vm1, %v6537_v28  ;;  %v1872_v28 = vld [vmem:[%s5997_s29 + $0xe9] sm:$0xff]  ;;  %v2478_v18 = vld [vmem:[#allocation3 + $0xe0] sm:$0xff] }
 0x143   : > { %5548 = vmatmul.msk.f32.gmra.mxu2 %vm432_vm1, %v6582_v8  ;;  %1926 = vst.msk [vmem:[#allocation3 + $0xe8] sm:$0xff] %vm432_vm1, %v1872_v28  ;;  %v2007_v43 = vld [vmem:[#allocation2 + $0x40] sm:$0xff] }
 0x144   : > { %1804 = vst.msk [vmem:[#allocation2 + $0x48] sm:$0xff] %vm286_vm2, %v1756_v11  ;;  %v2365_v21 = vadd.f32 %v2237_v45, %v2007_v43  ;;  %5598 = vmatmul.msk.f32.gmra.mxu3 %vm432_vm1, %v2476_v51  ;;  %v904_v45 = vld [vmem:[#allocation2 + $0x88] sm:$0xff] }
 0x145   : > { %v2508_v5 = vld [vmem:[#allocation2 + $0x38] sm:$0xff]  ;;  %v2739_v1 = vpop.f32.mrf.mxu0 }
 0x146   : > { %v1633_v16 = vpop.f32.mrf.mxu2  ;;  %2413 = vst.msk [vmem:[#allocation2 + $0x40] sm:$0xff] %vm286_vm2, %v2365_v21  ;;  %v2866_v54 = vadd.f32 %v2736_v49, %v2508_v5 }
 0x147   : > { %v1134_v20 = vpop.f32.mrf.mxu1  ;;  %v2243_v10 = vpop.f32.mrf.mxu3 }
 0x148   : > { %v1256_v24 = vadd.f32 %v1134_v20, %v898_v19  ;;  %2914 = vst.msk [vmem:[#allocation2 + $0x38] sm:$0xff] %vm286_vm2, %v2866_v54  ;;  %5646 = vmatmul.msk.f32.gmra.mxu0 %vm432_vm1, %v2477_v2  ;;  %v6657_v20 = vld [vmem:[%s5997_s29 + $0x128] sm:$0xff] }
 0x149   : > { %v1399_v62 = vld [vmem:[#allocation2 + $0x50] sm:$0xff] }
 0x14a   : > { %1304 = vst.msk [vmem:[#allocation2 + $0x58] sm:$0xff] %vm286_vm2, %v1256_v24  ;;  %v1757_v27 = vadd.f32 %v1633_v16, %v1399_v62  ;;  %5499 = vmatmul.msk.f32.gmra.mxu1 %vm432_vm1, %v6552_v44  ;;  %v1873_v44 = vld [vmem:[%s5997_s29 + $0xf1] sm:$0xff]  ;;  %v2479_v34 = vld [vmem:[#allocation3 + $0xe8] sm:$0xff] }
 0x14b   : > { %5549 = vmatmul.msk.f32.gmra.mxu2 %vm432_vm1, %v6597_v33  ;;  %1927 = vst.msk [vmem:[#allocation3 + $0xf0] sm:$0xff] %vm432_vm1, %v1873_v44  ;;  %v2008_v59 = vld [vmem:[#allocation2 + $0x48] sm:$0xff] }
 0x14c   : > { %1805 = vst.msk [vmem:[#allocation2 + $0x50] sm:$0xff] %vm286_vm2, %v1757_v27  ;;  %v2366_v25 = vadd.f32 %v2240_v60, %v2008_v59  ;;  %5599 = vmatmul.msk.f32.gmra.mxu3 %vm432_vm1, %v2477_v2  ;;  %v905_v60 = vld [vmem:[#allocation2 + $0x90] sm:$0xff] }
 0x14d   : > { %v2509_v9 = vld [vmem:[#allocation2 + $0x40] sm:$0xff]  ;;  %v2742_v16 = vpop.f32.mrf.mxu0 }
 0x14e   : > { %v1636_v32 = vpop.f32.mrf.mxu2  ;;  %2414 = vst.msk [vmem:[#allocation2 + $0x48] sm:$0xff] %vm286_vm2, %v2366_v25  ;;  %v2867_v6 = vadd.f32 %v2739_v1, %v2509_v9 }
 0x14f   : > { %v1137_v37 = vpop.f32.mrf.mxu1  ;;  %v2246_v62 = vpop.f32.mrf.mxu3 }
 0x150   : > { %v1257_v38 = vadd.f32 %v1137_v37, %v899_v35  ;;  %2915 = vst.msk [vmem:[#allocation2 + $0x40] sm:$0xff] %vm286_vm2, %v2867_v6  ;;  %5647 = vmatmul.msk.f32.gmra.mxu0 %vm432_vm1, %v2478_v18  ;;  %v6672_v37 = vld [vmem:[%s5997_s29 + $0x130] sm:$0xff] }
 0x151   : > { %v1400_v41 = vld [vmem:[#allocation2 + $0x58] sm:$0xff] }
 0x152   : > { %1305 = vst.msk [vmem:[#allocation2 + $0x60] sm:$0xff] %vm286_vm2, %v1257_v38  ;;  %v1758_v42 = vadd.f32 %v1636_v32, %v1400_v41  ;;  %5500 = vmatmul.msk.f32.gmra.mxu1 %vm432_vm1, %v6567_v58  ;;  %v1874_v58 = vld [vmem:[%s5997_s29 + $0xf9] sm:$0xff]  ;;  %v2480_v5 = vld [vmem:[#allocation3 + $0xf0] sm:$0xff] }
 0x153   : > { %5550 = vmatmul.msk.f32.gmra.mxu2 %vm432_vm1, %v6612_v39  ;;  %1928 = vst.msk [vmem:[#allocation3 + $0xf8] sm:$0xff] %vm432_vm1, %v1874_v58  ;;  %v2009_v29 = vld [vmem:[#allocation2 + $0x50] sm:$0xff] }
 0x154   : > { %1806 = vst.msk [vmem:[#allocation2 + $0x58] sm:$0xff] %vm286_vm2, %v1758_v42  ;;  %v2367_v11 = vadd.f32 %v2243_v10, %v2009_v29  ;;  %5600 = vmatmul.msk.f32.gmra.mxu3 %vm432_vm1, %v2478_v18  ;;  %v906_v10 = vld [vmem:[#allocation2 + $0x98] sm:$0xff] }
 0x155   : > { %v2510_v13 = vld [vmem:[#allocation2 + $0x48] sm:$0xff]  ;;  %v2745_v32 = vpop.f32.mrf.mxu0 }
 0x156   : > { %v1639_v46 = vpop.f32.mrf.mxu2  ;;  %2415 = vst.msk [vmem:[#allocation2 + $0x50] sm:$0xff] %vm286_vm2, %v2367_v11  ;;  %v2868_v22 = vadd.f32 %v2742_v16, %v2510_v13 }
 0x157   : > { %v1140_v48 = vpop.f32.mrf.mxu1  ;;  %v2249_v41 = vpop.f32.mrf.mxu3 }
 0x158   : > { %v1258_v52 = vadd.f32 %v1140_v48, %v900_v47  ;;  %2916 = vst.msk [vmem:[#allocation2 + $0x48] sm:$0xff] %vm286_vm2, %v2868_v22  ;;  %5648 = vmatmul.msk.f32.gmra.mxu0 %vm432_vm1, %v2479_v34  ;;  %v6687_v48 = vld [vmem:[%s5997_s29 + $0x138] sm:$0xff] }
 0x159   : > { %v1401_v50 = vld [vmem:[#allocation2 + $0x60] sm:$0xff] }
 0x15a   : > { %1306 = vst.msk [vmem:[#allocation2 + $0x68] sm:$0xff] %vm286_vm2, %v1258_v52  ;;  %v1759_v56 = vadd.f32 %v1639_v46, %v1401_v50  ;;  %5501 = vmatmul.msk.f32.gmra.mxu1 %vm432_vm1, %v6582_v8  ;;  %v1875_v8 = vld [vmem:[%s5997_s29 + $0x101] sm:$0xff]  ;;  %v2481_v9 = vld [vmem:[#allocation3 + $0xf8] sm:$0xff] }
 0x15b   : > { %5551 = vmatmul.msk.f32.gmra.mxu2 %vm432_vm1, %v6627_v53  ;;  %1929 = vst.msk [vmem:[#allocation3 + $0x100] sm:$0xff] %vm432_vm1, %v1875_v8  ;;  %v2010_v26 = vld [vmem:[#allocation2 + $0x58] sm:$0xff] }
 0x15c   : > { %1807 = vst.msk [vmem:[#allocation2 + $0x60] sm:$0xff] %vm286_vm2, %v1759_v56  ;;  %v2368_v27 = vadd.f32 %v2246_v62, %v2010_v26  ;;  %5601 = vmatmul.msk.f32.gmra.mxu3 %vm432_vm1, %v2479_v34  ;;  %v907_v62 = vld [vmem:[#allocation2 + $0xa0] sm:$0xff] }
 0x15d   : > { %v2511_v17 = vld [vmem:[#allocation2 + $0x50] sm:$0xff]  ;;  %v2748_v46 = vpop.f32.mrf.mxu0 }
 0x15e   : > { %v1642_v61 = vpop.f32.mrf.mxu2  ;;  %2416 = vst.msk [vmem:[#allocation2 + $0x58] sm:$0xff] %vm286_vm2, %v2368_v27  ;;  %v2869_v57 = vadd.f32 %v2745_v32, %v2511_v17 }
 0x15f   : > { %v1143_v0 = vpop.f32.mrf.mxu1  ;;  %v2252_v50 = vpop.f32.mrf.mxu3 }
 0x160   : > { %v1259_v3 = vadd.f32 %v1143_v0, %v901_v63  ;;  %2917 = vst.msk [vmem:[#allocation2 + $0x50] sm:$0xff] %vm286_vm2, %v2869_v57  ;;  %5649 = vmatmul.msk.f32.gmra.mxu0 %vm432_vm1, %v2480_v5  ;;  %v6702_v0 = vld [vmem:[%s5997_s29 + $0x140] sm:$0xff] }
 0x161   : > { %v1402_v7 = vld [vmem:[#allocation2 + $0x68] sm:$0xff] }
 0x162   : > { %1307 = vst.msk [vmem:[#allocation2 + $0x70] sm:$0xff] %vm286_vm2, %v1259_v3  ;;  %v1760_v55 = vadd.f32 %v1642_v61, %v1402_v7  ;;  %5502 = vmatmul.msk.f32.gmra.mxu1 %vm432_vm1, %v6597_v33  ;;  %v1876_v33 = vld [vmem:[%s5997_s29 + $0x109] sm:$0xff]  ;;  %v2482_v13 = vld [vmem:[#allocation3 + $0x100] sm:$0xff] }
 0x163   : > { %5552 = vmatmul.msk.f32.gmra.mxu2 %vm432_vm1, %v6642_v4  ;;  %1930 = vst.msk [vmem:[#allocation3 + $0x108] sm:$0xff] %vm432_vm1, %v1876_v33  ;;  %v2011_v40 = vld [vmem:[#allocation2 + $0x60] sm:$0xff] }
 0x164   : > { %1808 = vst.msk [vmem:[#allocation2 + $0x68] sm:$0xff] %vm286_vm2, %v1760_v55  ;;  %v2369_v42 = vadd.f32 %v2249_v41, %v2011_v40  ;;  %5602 = vmatmul.msk.f32.gmra.mxu3 %vm432_vm1, %v2480_v5  ;;  %v908_v41 = vld [vmem:[#allocation2 + $0xa8] sm:$0xff] }
 0x165   : > { %v2512_v43 = vld [vmem:[#allocation2 + $0x58] sm:$0xff]  ;;  %v2751_v61 = vpop.f32.mrf.mxu0 }
 0x166   : > { %v1645_v12 = vpop.f32.mrf.mxu2  ;;  %2417 = vst.msk [vmem:[#allocation2 + $0x60] sm:$0xff] %vm286_vm2, %v2369_v42  ;;  %v2870_v49 = vadd.f32 %v2748_v46, %v2512_v43 }
 0x167   : > { %v1146_v15 = vpop.f32.mrf.mxu1  ;;  %v2255_v7 = vpop.f32.mrf.mxu3 }
 0x168   : > { %v1260_v19 = vadd.f32 %v1146_v15, %v902_v14  ;;  %2918 = vst.msk [vmem:[#allocation2 + $0x58] sm:$0xff] %vm286_vm2, %v2870_v49  ;;  %5650 = vmatmul.msk.f32.gmra.mxu0 %vm432_vm1, %v2481_v9  ;;  %v6717_v15 = vld [vmem:[%s5997_s29 + $0x148] sm:$0xff] }
 0x169   : > { %v1403_v23 = vld [vmem:[#allocation2 + $0x70] sm:$0xff] }
 0x16a   : > { %1308 = vst.msk [vmem:[#allocation2 + $0x78] sm:$0xff] %vm286_vm2, %v1260_v19  ;;  %v1761_v24 = vadd.f32 %v1645_v12, %v1403_v23  ;;  %5503 = vmatmul.msk.f32.gmra.mxu1 %vm432_vm1, %v6612_v39  ;;  %v1877_v39 = vld [vmem:[%s5997_s29 + $0x111] sm:$0xff]  ;;  %v2483_v17 = vld [vmem:[#allocation3 + $0x108] sm:$0xff] }
 0x16b   : > { %5553 = vmatmul.msk.f32.gmra.mxu2 %vm432_vm1, %v6657_v20  ;;  %1931 = vst.msk [vmem:[#allocation3 + $0x110] sm:$0xff] %vm432_vm1, %v1877_v39  ;;  %v2012_v54 = vld [vmem:[#allocation2 + $0x68] sm:$0xff] }
 0x16c   : > { %1809 = vst.msk [vmem:[#allocation2 + $0x70] sm:$0xff] %vm286_vm2, %v1761_v24  ;;  %v2370_v56 = vadd.f32 %v2252_v50, %v2012_v54  ;;  %5603 = vmatmul.msk.f32.gmra.mxu3 %vm432_vm1, %v2481_v9  ;;  %v909_v50 = vld [vmem:[#allocation2 + $0xb0] sm:$0xff] }
 0x16d   : > { %v2513_v59 = vld [vmem:[#allocation2 + $0x60] sm:$0xff]  ;;  %v2754_v12 = vpop.f32.mrf.mxu0 }
 0x16e   : > { %v1648_v28 = vpop.f32.mrf.mxu2  ;;  %2418 = vst.msk [vmem:[#allocation2 + $0x68] sm:$0xff] %vm286_vm2, %v2370_v56  ;;  %v2871_v1 = vadd.f32 %v2751_v61, %v2513_v59 }
 0x16f   : > { %v1149_v31 = vpop.f32.mrf.mxu1  ;;  %v2258_v23 = vpop.f32.mrf.mxu3 }
 0x170   : > { %v1261_v35 = vadd.f32 %v1149_v31, %v903_v30  ;;  %2919 = vst.msk [vmem:[#allocation2 + $0x60] sm:$0xff] %vm286_vm2, %v2871_v1  ;;  %5651 = vmatmul.msk.f32.gmra.mxu0 %vm432_vm1, %v2482_v13  ;;  %v6732_v31 = vld [vmem:[%s5997_s29 + $0x150] sm:$0xff] }
 0x171   : > { %v1404_v36 = vld [vmem:[#allocation2 + $0x78] sm:$0xff] }
 0x172   : > { %1309 = vst.msk [vmem:[#allocation2 + $0x80] sm:$0xff] %vm286_vm2, %v1261_v35  ;;  %v1762_v38 = vadd.f32 %v1648_v28, %v1404_v36  ;;  %5504 = vmatmul.msk.f32.gmra.mxu1 %vm432_vm1, %v6627_v53  ;;  %v1878_v53 = vld [vmem:[%s5997_s29 + $0x119] sm:$0xff]  ;;  %v2484_v43 = vld [vmem:[#allocation3 + $0x110] sm:$0xff] }
 0x173   : > { %5554 = vmatmul.msk.f32.gmra.mxu2 %vm432_vm1, %v6672_v37  ;;  %1932 = vst.msk [vmem:[#allocation3 + $0x118] sm:$0xff] %vm432_vm1, %v1878_v53  ;;  %v2013_v6 = vld [vmem:[#allocation2 + $0x70] sm:$0xff] }
 0x174   : > { %1810 = vst.msk [vmem:[#allocation2 + $0x78] sm:$0xff] %vm286_vm2, %v1762_v38  ;;  %v2371_v55 = vadd.f32 %v2255_v7, %v2013_v6  ;;  %5604 = vmatmul.msk.f32.gmra.mxu3 %vm432_vm1, %v2482_v13  ;;  %v910_v7 = vld [vmem:[#allocation2 + $0xb8] sm:$0xff] }
 0x175   : > { %v2514_v29 = vld [vmem:[#allocation2 + $0x68] sm:$0xff]  ;;  %v2757_v28 = vpop.f32.mrf.mxu0 }
 0x176   : > { %v1651_v44 = vpop.f32.mrf.mxu2  ;;  %2419 = vst.msk [vmem:[#allocation2 + $0x70] sm:$0xff] %vm286_vm2, %v2371_v55  ;;  %v2872_v16 = vadd.f32 %v2754_v12, %v2514_v29 }
 0x177   : > { %v1152_v21 = vpop.f32.mrf.mxu1  ;;  %v2261_v36 = vpop.f32.mrf.mxu3 }
 0x178   : > { %v1262_v47 = vadd.f32 %v1152_v21, %v904_v45  ;;  %2920 = vst.msk [vmem:[#allocation2 + $0x68] sm:$0xff] %vm286_vm2, %v2872_v16  ;;  %5652 = vmatmul.msk.f32.gmra.mxu0 %vm432_vm1, %v2483_v17  ;;  %v6747_v21 = vld [vmem:[%s5997_s29 + $0x158] sm:$0xff] }
 0x179   : > { %v1405_v51 = vld [vmem:[#allocation2 + $0x80] sm:$0xff] }
 0x17a   : > { %1310 = vst.msk [vmem:[#allocation2 + $0x88] sm:$0xff] %vm286_vm2, %v1262_v47  ;;  %v1763_v52 = vadd.f32 %v1651_v44, %v1405_v51  ;;  %5505 = vmatmul.msk.f32.gmra.mxu1 %vm432_vm1, %v6642_v4  ;;  %v1879_v4 = vld [vmem:[%s5997_s29 + $0x121] sm:$0xff]  ;;  %v2485_v59 = vld [vmem:[#allocation3 + $0x118] sm:$0xff] }
 0x17b   : > { %5555 = vmatmul.msk.f32.gmra.mxu2 %vm432_vm1, %v6687_v48  ;;  %1933 = vst.msk [vmem:[#allocation3 + $0x120] sm:$0xff] %vm432_vm1, %v1879_v4  ;;  %v2014_v22 = vld [vmem:[#allocation2 + $0x78] sm:$0xff] }
 0x17c   : > { %1811 = vst.msk [vmem:[#allocation2 + $0x80] sm:$0xff] %vm286_vm2, %v1763_v52  ;;  %v2372_v24 = vadd.f32 %v2258_v23, %v2014_v22  ;;  %5605 = vmatmul.msk.f32.gmra.mxu3 %vm432_vm1, %v2483_v17  ;;  %v911_v23 = vld [vmem:[#allocation2 + $0xc0] sm:$0xff] }
 0x17d   : > { %v2515_v26 = vld [vmem:[#allocation2 + $0x70] sm:$0xff]  ;;  %v2760_v44 = vpop.f32.mrf.mxu0 }
 0x17e   : > { %v1654_v58 = vpop.f32.mrf.mxu2  ;;  %2420 = vst.msk [vmem:[#allocation2 + $0x78] sm:$0xff] %vm286_vm2, %v2372_v24  ;;  %v2873_v32 = vadd.f32 %v2757_v28, %v2515_v26 }
 0x17f   : > { %v1155_v25 = vpop.f32.mrf.mxu1  ;;  %v2264_v51 = vpop.f32.mrf.mxu3 }
 0x180   : > { %v1263_v63 = vadd.f32 %v1155_v25, %v905_v60  ;;  %2921 = vst.msk [vmem:[#allocation2 + $0x70] sm:$0xff] %vm286_vm2, %v2873_v32  ;;  %5653 = vmatmul.msk.f32.gmra.mxu0 %vm432_vm1, %v2484_v43  ;;  %v6762_v25 = vld [vmem:[%s5997_s29 + $0x160] sm:$0xff] }
 0x181   : > { %v1406_v2 = vld [vmem:[#allocation2 + $0x88] sm:$0xff] }
 0x182   : > { %1311 = vst.msk [vmem:[#allocation2 + $0x90] sm:$0xff] %vm286_vm2, %v1263_v63  ;;  %v1764_v3 = vadd.f32 %v1654_v58, %v1406_v2  ;;  %5506 = vmatmul.msk.f32.gmra.mxu1 %vm432_vm1, %v6657_v20  ;;  %v1880_v20 = vld [vmem:[%s5997_s29 + $0x129] sm:$0xff]  ;;  %v2486_v29 = vld [vmem:[#allocation3 + $0x120] sm:$0xff] }
 0x183   : > { %5556 = vmatmul.msk.f32.gmra.mxu2 %vm432_vm1, %v6702_v0  ;;  %1934 = vst.msk [vmem:[#allocation3 + $0x128] sm:$0xff] %vm432_vm1, %v1880_v20  ;;  %v2015_v57 = vld [vmem:[#allocation2 + $0x80] sm:$0xff] }
 0x184   : > { %1812 = vst.msk [vmem:[#allocation2 + $0x88] sm:$0xff] %vm286_vm2, %v1764_v3  ;;  %v2373_v38 = vadd.f32 %v2261_v36, %v2015_v57  ;;  %5606 = vmatmul.msk.f32.gmra.mxu3 %vm432_vm1, %v2484_v43  ;;  %v912_v36 = vld [vmem:[#allocation2 + $0xc8] sm:$0xff] }
 0x185   : > { %v2516_v40 = vld [vmem:[#allocation2 + $0x78] sm:$0xff]  ;;  %v2763_v58 = vpop.f32.mrf.mxu0 }
 0x186   : > { %v1657_v8 = vpop.f32.mrf.mxu2  ;;  %2421 = vst.msk [vmem:[#allocation2 + $0x80] sm:$0xff] %vm286_vm2, %v2373_v38  ;;  %v2874_v46 = vadd.f32 %v2760_v44, %v2516_v40 }
 0x187   : > { %v1158_v11 = vpop.f32.mrf.mxu1  ;;  %v2267_v2 = vpop.f32.mrf.mxu3 }
 0x188   : > { %v1264_v14 = vadd.f32 %v1158_v11, %v906_v10  ;;  %2922 = vst.msk [vmem:[#allocation2 + $0x78] sm:$0xff] %vm286_vm2, %v2874_v46  ;;  %5654 = vmatmul.msk.f32.gmra.mxu0 %vm432_vm1, %v2485_v59  ;;  %v6777_v11 = vld [vmem:[%s5997_s29 + $0x168] sm:$0xff] }
 0x189   : > { %v1407_v18 = vld [vmem:[#allocation2 + $0x90] sm:$0xff] }
 0x18a   : > { %1312 = vst.msk [vmem:[#allocation2 + $0x98] sm:$0xff] %vm286_vm2, %v1264_v14  ;;  %v1765_v19 = vadd.f32 %v1657_v8, %v1407_v18  ;;  %5507 = vmatmul.msk.f32.gmra.mxu1 %vm432_vm1, %v6672_v37  ;;  %v1881_v37 = vld [vmem:[%s5997_s29 + $0x131] sm:$0xff]  ;;  %v2487_v26 = vld [vmem:[#allocation3 + $0x128] sm:$0xff] }
 0x18b   : > { %5557 = vmatmul.msk.f32.gmra.mxu2 %vm432_vm1, %v6717_v15  ;;  %1935 = vst.msk [vmem:[#allocation3 + $0x130] sm:$0xff] %vm432_vm1, %v1881_v37  ;;  %v2016_v49 = vld [vmem:[#allocation2 + $0x88] sm:$0xff] }
 0x18c   : > { %1813 = vst.msk [vmem:[#allocation2 + $0x90] sm:$0xff] %vm286_vm2, %v1765_v19  ;;  %v2374_v52 = vadd.f32 %v2264_v51, %v2016_v49  ;;  %5607 = vmatmul.msk.f32.gmra.mxu3 %vm432_vm1, %v2485_v59  ;;  %v913_v51 = vld [vmem:[#allocation2 + $0xd0] sm:$0xff] }
 0x18d   : > { %v2517_v54 = vld [vmem:[#allocation2 + $0x80] sm:$0xff]  ;;  %v2766_v8 = vpop.f32.mrf.mxu0 }
 0x18e   : > { %v1660_v33 = vpop.f32.mrf.mxu2  ;;  %2422 = vst.msk [vmem:[#allocation2 + $0x88] sm:$0xff] %vm286_vm2, %v2374_v52  ;;  %v2875_v61 = vadd.f32 %v2763_v58, %v2517_v54 }
 0x18f   : > { %v1161_v27 = vpop.f32.mrf.mxu1  ;;  %v2270_v18 = vpop.f32.mrf.mxu3 }
 0x190   : > { %v1265_v30 = vadd.f32 %v1161_v27, %v907_v62  ;;  %2923 = vst.msk [vmem:[#allocation2 + $0x80] sm:$0xff] %vm286_vm2, %v2875_v61  ;;  %5655 = vmatmul.msk.f32.gmra.mxu0 %vm432_vm1, %v2486_v29  ;;  %v6792_v27 = vld [vmem:[%s5997_s29 + $0x170] sm:$0xff] }
 0x191   : > { %v1408_v34 = vld [vmem:[#allocation2 + $0x98] sm:$0xff] }
 0x192   : > { %1313 = vst.msk [vmem:[#allocation2 + $0xa0] sm:$0xff] %vm286_vm2, %v1265_v30  ;;  %v1766_v35 = vadd.f32 %v1660_v33, %v1408_v34  ;;  %5508 = vmatmul.msk.f32.gmra.mxu1 %vm432_vm1, %v6687_v48  ;;  %v1882_v48 = vld [vmem:[%s5997_s29 + $0x139] sm:$0xff]  ;;  %v2488_v40 = vld [vmem:[#allocation3 + $0x130] sm:$0xff] }
 0x193   : > { %5558 = vmatmul.msk.f32.gmra.mxu2 %vm432_vm1, %v6732_v31  ;;  %1936 = vst.msk [vmem:[#allocation3 + $0x138] sm:$0xff] %vm432_vm1, %v1882_v48  ;;  %v2017_v1 = vld [vmem:[#allocation2 + $0x90] sm:$0xff] }
 0x194   : > { %1814 = vst.msk [vmem:[#allocation2 + $0x98] sm:$0xff] %vm286_vm2, %v1766_v35  ;;  %v2375_v3 = vadd.f32 %v2267_v2, %v2017_v1  ;;  %5608 = vmatmul.msk.f32.gmra.mxu3 %vm432_vm1, %v2486_v29  ;;  %v914_v2 = vld [vmem:[#allocation2 + $0xd8] sm:$0xff] }
 0x195   : > { %v2518_v6 = vld [vmem:[#allocation2 + $0x88] sm:$0xff]  ;;  %v2769_v33 = vpop.f32.mrf.mxu0 }
 0x196   : > { %v1663_v39 = vpop.f32.mrf.mxu2  ;;  %2423 = vst.msk [vmem:[#allocation2 + $0x90] sm:$0xff] %vm286_vm2, %v2375_v3  ;;  %v2876_v12 = vadd.f32 %v2766_v8, %v2518_v6 }
 0x197   : > { %v1164_v42 = vpop.f32.mrf.mxu1  ;;  %v2273_v34 = vpop.f32.mrf.mxu3 }
 0x198   : > { %v1266_v45 = vadd.f32 %v1164_v42, %v908_v41  ;;  %2924 = vst.msk [vmem:[#allocation2 + $0x88] sm:$0xff] %vm286_vm2, %v2876_v12  ;;  %5656 = vmatmul.msk.f32.gmra.mxu0 %vm432_vm1, %v2487_v26  ;;  %v6807_v42 = vld [vmem:[%s5997_s29 + $0x178] sm:$0xff] }
 0x199   : > { %v1409_v5 = vld [vmem:[#allocation2 + $0xa0] sm:$0xff] }
 0x19a   : > { %1314 = vst.msk [vmem:[#allocation2 + $0xa8] sm:$0xff] %vm286_vm2, %v1266_v45  ;;  %v1767_v47 = vadd.f32 %v1663_v39, %v1409_v5  ;;  %5509 = vmatmul.msk.f32.gmra.mxu1 %vm432_vm1, %v6702_v0  ;;  %v1883_v0 = vld [vmem:[%s5997_s29 + $0x141] sm:$0xff]  ;;  %v2489_v54 = vld [vmem:[#allocation3 + $0x138] sm:$0xff] }
 0x19b   : > { %5559 = vmatmul.msk.f32.gmra.mxu2 %vm432_vm1, %v6747_v21  ;;  %1937 = vst.msk [vmem:[#allocation3 + $0x140] sm:$0xff] %vm432_vm1, %v1883_v0  ;;  %v2018_v16 = vld [vmem:[#allocation2 + $0x98] sm:$0xff] }
 0x19c   : > { %1815 = vst.msk [vmem:[#allocation2 + $0xa0] sm:$0xff] %vm286_vm2, %v1767_v47  ;;  %v2376_v19 = vadd.f32 %v2270_v18, %v2018_v16  ;;  %5609 = vmatmul.msk.f32.gmra.mxu3 %vm432_vm1, %v2487_v26  ;;  %v915_v18 = vld [vmem:[#allocation2 + $0xe0] sm:$0xff] }
 0x19d   : > { %v2519_v22 = vld [vmem:[#allocation2 + $0x90] sm:$0xff]  ;;  %v2772_v39 = vpop.f32.mrf.mxu0 }
 0x19e   : > { %v1666_v53 = vpop.f32.mrf.mxu2  ;;  %2424 = vst.msk [vmem:[#allocation2 + $0x98] sm:$0xff] %vm286_vm2, %v2376_v19  ;;  %v2877_v28 = vadd.f32 %v2769_v33, %v2519_v22 }
 0x19f   : > { %v1167_v56 = vpop.f32.mrf.mxu1  ;;  %v2276_v5 = vpop.f32.mrf.mxu3 }
 0x1a0   : > { %v1267_v60 = vadd.f32 %v1167_v56, %v909_v50  ;;  %2925 = vst.msk [vmem:[#allocation2 + $0x90] sm:$0xff] %vm286_vm2, %v2877_v28  ;;  %5657 = vmatmul.msk.f32.gmra.mxu0 %vm432_vm1, %v2488_v40  ;;  %v6822_v56 = vld [vmem:[%s5997_s29 + $0x180] sm:$0xff] }
 0x1a1   : > { %v1410_v9 = vld [vmem:[#allocation2 + $0xa8] sm:$0xff] }
 0x1a2   : > { %1315 = vst.msk [vmem:[#allocation2 + $0xb0] sm:$0xff] %vm286_vm2, %v1267_v60  ;;  %v1768_v63 = vadd.f32 %v1666_v53, %v1410_v9  ;;  %5510 = vmatmul.msk.f32.gmra.mxu1 %vm432_vm1, %v6717_v15  ;;  %v1884_v15 = vld [vmem:[%s5997_s29 + $0x149] sm:$0xff]  ;;  %v2490_v6 = vld [vmem:[#allocation3 + $0x140] sm:$0xff] }
 0x1a3   : > { %5560 = vmatmul.msk.f32.gmra.mxu2 %vm432_vm1, %v6762_v25  ;;  %1938 = vst.msk [vmem:[#allocation3 + $0x148] sm:$0xff] %vm432_vm1, %v1884_v15  ;;  %v2019_v32 = vld [vmem:[#allocation2 + $0xa0] sm:$0xff] }
 0x1a4   : > { %1816 = vst.msk [vmem:[#allocation2 + $0xa8] sm:$0xff] %vm286_vm2, %v1768_v63  ;;  %v2377_v35 = vadd.f32 %v2273_v34, %v2019_v32  ;;  %5610 = vmatmul.msk.f32.gmra.mxu3 %vm432_vm1, %v2488_v40  ;;  %v916_v34 = vld [vmem:[#allocation2 + $0xe8] sm:$0xff] }
 0x1a5   : > { %v2520_v57 = vld [vmem:[#allocation2 + $0x98] sm:$0xff]  ;;  %v2775_v53 = vpop.f32.mrf.mxu0 }
 0x1a6   : > { %v1669_v4 = vpop.f32.mrf.mxu2  ;;  %2425 = vst.msk [vmem:[#allocation2 + $0xa0] sm:$0xff] %vm286_vm2, %v2377_v35  ;;  %v2878_v44 = vadd.f32 %v2772_v39, %v2520_v57 }
 0x1a7   : > { %v1170_v55 = vpop.f32.mrf.mxu1  ;;  %v2279_v9 = vpop.f32.mrf.mxu3 }
 0x1a8   : > { %v1268_v10 = vadd.f32 %v1170_v55, %v910_v7  ;;  %2926 = vst.msk [vmem:[#allocation2 + $0x98] sm:$0xff] %vm286_vm2, %v2878_v44  ;;  %5658 = vmatmul.msk.f32.gmra.mxu0 %vm432_vm1, %v2489_v54  ;;  %v6837_v55 = vld [vmem:[%s5997_s29 + $0x188] sm:$0xff] }
 0x1a9   : > { %v1411_v13 = vld [vmem:[#allocation2 + $0xb0] sm:$0xff] }
 0x1aa   : > { %1316 = vst.msk [vmem:[#allocation2 + $0xb8] sm:$0xff] %vm286_vm2, %v1268_v10  ;;  %v1769_v14 = vadd.f32 %v1669_v4, %v1411_v13  ;;  %5511 = vmatmul.msk.f32.gmra.mxu1 %vm432_vm1, %v6732_v31  ;;  %v1885_v31 = vld [vmem:[%s5997_s29 + $0x151] sm:$0xff]  ;;  %v2491_v22 = vld [vmem:[#allocation3 + $0x148] sm:$0xff] }
 0x1ab   : > { %5561 = vmatmul.msk.f32.gmra.mxu2 %vm432_vm1, %v6777_v11  ;;  %1939 = vst.msk [vmem:[#allocation3 + $0x150] sm:$0xff] %vm432_vm1, %v1885_v31  ;;  %v2020_v46 = vld [vmem:[#allocation2 + $0xa8] sm:$0xff] }
 0x1ac   : > { %1817 = vst.msk [vmem:[#allocation2 + $0xb0] sm:$0xff] %vm286_vm2, %v1769_v14  ;;  %v2378_v47 = vadd.f32 %v2276_v5, %v2020_v46  ;;  %5611 = vmatmul.msk.f32.gmra.mxu3 %vm432_vm1, %v2489_v54  ;;  %v917_v5 = vld [vmem:[#allocation2 + $0xf0] sm:$0xff] }
 0x1ad   : > { %v2521_v49 = vld [vmem:[#allocation2 + $0xa0] sm:$0xff]  ;;  %v2778_v4 = vpop.f32.mrf.mxu0 }
 0x1ae   : > { %v1672_v20 = vpop.f32.mrf.mxu2  ;;  %2426 = vst.msk [vmem:[#allocation2 + $0xa8] sm:$0xff] %vm286_vm2, %v2378_v47  ;;  %v2879_v58 = vadd.f32 %v2775_v53, %v2521_v49 }
 0x1af   : > { %v1173_v24 = vpop.f32.mrf.mxu1  ;;  %v2282_v13 = vpop.f32.mrf.mxu3 }
 0x1b0   : > { %v1269_v62 = vadd.f32 %v1173_v24, %v911_v23  ;;  %2927 = vst.msk [vmem:[#allocation2 + $0xa0] sm:$0xff] %vm286_vm2, %v2879_v58  ;;  %5659 = vmatmul.msk.f32.gmra.mxu0 %vm432_vm1, %v2490_v6  ;;  %v6852_v24 = vld [vmem:[%s5997_s29 + $0x190] sm:$0xff] }
 0x1b1   : > { %v1412_v17 = vld [vmem:[#allocation2 + $0xb8] sm:$0xff] }
 0x1b2   : > { %1317 = vst.msk [vmem:[#allocation2 + $0xc0] sm:$0xff] %vm286_vm2, %v1269_v62  ;;  %v1770_v30 = vadd.f32 %v1672_v20, %v1412_v17  ;;  %5512 = vmatmul.msk.f32.gmra.mxu1 %vm432_vm1, %v6747_v21  ;;  %v1886_v21 = vld [vmem:[%s5997_s29 + $0x159] sm:$0xff]  ;;  %v2492_v57 = vld [vmem:[#allocation3 + $0x150] sm:$0xff] }
 0x1b3   : > { %5562 = vmatmul.msk.f32.gmra.mxu2 %vm432_vm1, %v6792_v27  ;;  %1940 = vst.msk [vmem:[#allocation3 + $0x158] sm:$0xff] %vm432_vm1, %v1886_v21  ;;  %v2021_v61 = vld [vmem:[#allocation2 + $0xb0] sm:$0xff] }
 0x1b4   : > { %1818 = vst.msk [vmem:[#allocation2 + $0xb8] sm:$0xff] %vm286_vm2, %v1770_v30  ;;  %v2379_v63 = vadd.f32 %v2279_v9, %v2021_v61  ;;  %5612 = vmatmul.msk.f32.gmra.mxu3 %vm432_vm1, %v2490_v6  ;;  %v3463_v58 = vld [vmem:[%s5997_s29 + $0x32] sm:$0xff]  ;;  %v1388_v6 = vld [vmem:[%s5997_s29 + $0x1a8] sm:$0xff] }
 0x1b5   : > { %v2522_v1 = vld [vmem:[#allocation2 + $0xa8] sm:$0xff]  ;;  %v2781_v20 = vpop.f32.mrf.mxu0 }
 0x1b6   : > { %v1675_v37 = vpop.f32.mrf.mxu2  ;;  %2427 = vst.msk [vmem:[#allocation2 + $0xb0] sm:$0xff] %vm286_vm2, %v2379_v63  ;;  %v2880_v8 = vadd.f32 %v2778_v4, %v2522_v1 }
 0x1b7   : > { %v1176_v38 = vpop.f32.mrf.mxu1  ;;  %v2285_v17 = vpop.f32.mrf.mxu3 }
 0x1b8   : > { %v1270_v41 = vadd.f32 %v1176_v38, %v912_v36  ;;  %2928 = vst.msk [vmem:[#allocation2 + $0xa8] sm:$0xff] %vm286_vm2, %v2880_v8  ;;  %5660 = vmatmul.msk.f32.gmra.mxu0 %vm432_vm1, %v2491_v22  ;;  %v1386_v38 = vld [vmem:[%s5997_s29 + $0x198] sm:$0xff] }
 0x1b9   : > { %v1413_v43 = vld [vmem:[#allocation2 + $0xc0] sm:$0xff] }
 0x1ba   : > { %1318 = vst.msk [vmem:[#allocation2 + $0xc8] sm:$0xff] %vm286_vm2, %v1270_v41  ;;  %v1771_v45 = vadd.f32 %v1675_v37, %v1413_v43  ;;  %5513 = vmatmul.msk.f32.gmra.mxu1 %vm432_vm1, %v6762_v25  ;;  %v1887_v25 = vld [vmem:[%s5997_s29 + $0x161] sm:$0xff]  ;;  %v2493_v49 = vld [vmem:[#allocation3 + $0x158] sm:$0xff] }
 0x1bb   : > { %5563 = vmatmul.msk.f32.gmra.mxu2 %vm432_vm1, %v6807_v42  ;;  %1941 = vst.msk [vmem:[#allocation3 + $0x160] sm:$0xff] %vm432_vm1, %v1887_v25  ;;  %v2022_v12 = vld [vmem:[#allocation2 + $0xb8] sm:$0xff] }
 0x1bc   : > { %1819 = vst.msk [vmem:[#allocation2 + $0xc0] sm:$0xff] %vm286_vm2, %v1771_v45  ;;  %v2380_v14 = vadd.f32 %v2282_v13, %v2022_v12  ;;  %5613 = vmatmul.msk.f32.gmra.mxu3 %vm432_vm1, %v2491_v22  ;;  %v2956_v12 = vld [vmem:[#allocation3 + $0x38] sm:$0xff] }
 0x1bd   : > { %v2523_v16 = vld [vmem:[#allocation2 + $0xb0] sm:$0xff]  ;;  %v2784_v37 = vpop.f32.mrf.mxu0 }
 0x1be   : > { %v1678_v48 = vpop.f32.mrf.mxu2  ;;  %2428 = vst.msk [vmem:[#allocation2 + $0xb8] sm:$0xff] %vm286_vm2, %v2380_v14  ;;  %v2881_v33 = vadd.f32 %v2781_v20, %v2523_v16 }
 0x1bf   : > { %v1179_v52 = vpop.f32.mrf.mxu1  ;;  %v2288_v43 = vpop.f32.mrf.mxu3 }
 0x1c0   : > { %v1271_v50 = vadd.f32 %v1179_v52, %v913_v51  ;;  %2929 = vst.msk [vmem:[#allocation2 + $0xb0] sm:$0xff] %vm286_vm2, %v2881_v33  ;;  %5661 = vmatmul.msk.f32.gmra.mxu0 %vm432_vm1, %v2492_v57  ;;  %v1387_v52 = vld [vmem:[%s5997_s29 + $0x1a0] sm:$0xff] }
 0x1c1   : > { %v1414_v59 = vld [vmem:[#allocation2 + $0xc8] sm:$0xff] }
 0x1c2   : > { %1319 = vst.msk [vmem:[#allocation2 + $0xd0] sm:$0xff] %vm286_vm2, %v1271_v50  ;;  %v1772_v60 = vadd.f32 %v1678_v48, %v1414_v59  ;;  %5514 = vmatmul.msk.f32.gmra.mxu1 %vm432_vm1, %v6777_v11  ;;  %v1888_v11 = vld [vmem:[%s5997_s29 + $0x169] sm:$0xff]  ;;  %v1891_v59 = vld [vmem:[%s5997_s29 + $0x181] sm:$0xff] }
 0x1c3   : > { %5564 = vmatmul.msk.f32.gmra.mxu2 %vm432_vm1, %v6822_v56  ;;  %1942 = vst.msk [vmem:[#allocation3 + $0x168] sm:$0xff] %vm432_vm1, %v1888_v11  ;;  %v2023_v28 = vld [vmem:[#allocation2 + $0xc0] sm:$0xff]  ;;  %v1892_v11 = vld [vmem:[%s5997_s29 + $0x189] sm:$0xff] }
 0x1c4   : > { %1820 = vst.msk [vmem:[#allocation2 + $0xc8] sm:$0xff] %vm286_vm2, %v1772_v60  ;;  %v2381_v30 = vadd.f32 %v2285_v17, %v2023_v28  ;;  %5614 = vmatmul.msk.f32.gmra.mxu3 %vm432_vm1, %v2492_v57  ;;  %v2955_v60 = vld [vmem:[#allocation3 + $0x30] sm:$0xff]  ;;  %v3465_v28 = vld [vmem:[%s5997_s29 + $0x42] sm:$0xff] }
 0x1c5   : > { %v2524_v32 = vld [vmem:[#allocation2 + $0xb8] sm:$0xff]  ;;  %v2787_v48 = vpop.f32.mrf.mxu0  ;;  %3517 = vst.msk [vmem:[#allocation3 + $0x30] sm:$0xff] %vm432_vm1, %v3463_v58 }
 0x1c6   : > { %v1681_v0 = vpop.f32.mrf.mxu2  ;;  %2429 = vst.msk [vmem:[#allocation2 + $0xc0] sm:$0xff] %vm286_vm2, %v2381_v30  ;;  %v2882_v39 = vadd.f32 %v2784_v37, %v2524_v32  ;;  %v1893_v17 = vld [vmem:[%s5997_s29 + $0x191] sm:$0xff]  ;;  %v2957_v30 = vld [vmem:[#allocation3 + $0x40] sm:$0xff]  ;;  %v920_v37 = vld [vmem:[#allocation2 + $0x108] sm:$0xff] }
 0x1c7   : > { %v1182_v3 = vpop.f32.mrf.mxu1  ;;  %v2291_v25 = vpop.f32.mrf.mxu3  ;;  %1945 = vst.msk [vmem:[#allocation3 + $0x180] sm:$0xff] %vm432_vm1, %v1891_v59 }
 0x1c8   : > { %v1272_v7 = vadd.f32 %v1182_v3, %v914_v2  ;;  %2930 = vst.msk [vmem:[#allocation2 + $0xb8] sm:$0xff] %vm286_vm2, %v2882_v39  ;;  %5662 = vmatmul.msk.f32.gmra.mxu0 %vm432_vm1, %v2493_v49  ;;  %v2494_v3 = vld [vmem:[#allocation3 + $0x160] sm:$0xff] }
 0x1c9   : > { %v1415_v29 = vld [vmem:[#allocation2 + $0xd0] sm:$0xff]  ;;  %1946 = vst.msk [vmem:[#allocation3 + $0x188] sm:$0xff] %vm432_vm1, %v1892_v11 }
 0x1ca   : > { %1320 = vst.msk [vmem:[#allocation2 + $0xd8] sm:$0xff] %vm286_vm2, %v1272_v7  ;;  %v1773_v10 = vadd.f32 %v1681_v0, %v1415_v29  ;;  %5515 = vmatmul.msk.f32.gmra.mxu1 %vm432_vm1, %v6792_v27  ;;  %v1889_v27 = vld [vmem:[%s5997_s29 + $0x171] sm:$0xff]  ;;  %v2495_v22 = vld [vmem:[#allocation3 + $0x168] sm:$0xff] }
 0x1cb   : > { %5565 = vmatmul.msk.f32.gmra.mxu2 %vm432_vm1, %v6837_v55  ;;  %1943 = vst.msk [vmem:[#allocation3 + $0x170] sm:$0xff] %vm432_vm1, %v1889_v27  ;;  %v2024_v44 = vld [vmem:[#allocation2 + $0xc8] sm:$0xff]  ;;  %v918_v0 = vld [vmem:[#allocation2 + $0xf8] sm:$0xff] }
 0x1cc   : > { %1821 = vst.msk [vmem:[#allocation2 + $0xd0] sm:$0xff] %vm286_vm2, %v1773_v10  ;;  %v2382_v45 = vadd.f32 %v2288_v43, %v2024_v44  ;;  %5615 = vmatmul.msk.f32.gmra.mxu3 %vm432_vm1, %v2493_v49  ;;  %v3464_v10 = vld [vmem:[%s5997_s29 + $0x3a] sm:$0xff]  ;;  %v921_v49 = vld [vmem:[#allocation2 + $0x110] sm:$0xff] }
 0x1cd   : > { %v2525_v46 = vld [vmem:[#allocation2 + $0xc0] sm:$0xff]  ;;  %v2790_v2 = vpop.f32.mrf.mxu0  ;;  %3518 = vst.msk [vmem:[#allocation3 + $0x38] sm:$0xff] %vm432_vm1, %v3464_v10 }
 0x1ce   : > { %v1684_v15 = vpop.f32.mrf.mxu2  ;;  %2430 = vst.msk [vmem:[#allocation2 + $0xc8] sm:$0xff] %vm286_vm2, %v2382_v45  ;;  %v2883_v53 = vadd.f32 %v2787_v48, %v2525_v46  ;;  %v3466_v45 = vld [vmem:[%s5997_s29 + $0x4a] sm:$0xff] }
 0x1cf   : > { %v1185_v19 = vpop.f32.mrf.mxu1  ;;  %v2294_v13 = vpop.f32.mrf.mxu3  ;;  %3519 = vst.msk [vmem:[#allocation3 + $0x40] sm:$0xff] %vm432_vm1, %v3465_v28 }
 0x1d0   : > { %v1273_v23 = vadd.f32 %v1185_v19, %v915_v18  ;;  %2931 = vst.msk [vmem:[#allocation2 + $0xc0] sm:$0xff] %vm286_vm2, %v2883_v53  ;;  %5663 = vmatmul.msk.f32.gmra.mxu0 %vm432_vm1, %v2494_v3  ;;  %v919_v18 = vld [vmem:[#allocation2 + $0x100] sm:$0xff] }
 0x1d1   : > { %v1416_v26 = vld [vmem:[#allocation2 + $0xd8] sm:$0xff]  ;;  %1947 = vst.msk [vmem:[#allocation3 + $0x190] sm:$0xff] %vm432_vm1, %v1893_v17  ;;  %v3469_v17 = vld [vmem:[%s5997_s29 + $0x62] sm:$0xff] }
 0x1d2   : > { %1321 = vst.msk [vmem:[#allocation2 + $0xe0] sm:$0xff] %vm286_vm2, %v1273_v23  ;;  %v1774_v62 = vadd.f32 %v1684_v15, %v1416_v26  ;;  %5516 = vmatmul.msk.f32.gmra.mxu1 %vm432_vm1, %v6807_v42  ;;  %v1890_v42 = vld [vmem:[%s5997_s29 + $0x179] sm:$0xff] }
 0x1d3   : > { %5566 = vmatmul.msk.f32.gmra.mxu2 %vm432_vm1, %v6852_v24  ;;  %1944 = vst.msk [vmem:[#allocation3 + $0x178] sm:$0xff] %vm432_vm1, %v1890_v42 }
 0x1d4   : > { %1822 = vst.msk [vmem:[#allocation2 + $0xd8] sm:$0xff] %vm286_vm2, %v1774_v62  ;;  %5616 = vmatmul.msk.f32.gmra.mxu3 %vm432_vm1, %v2494_v3 }
 0x1d5   : > { %v2526_v63 = vld [vmem:[#allocation2 + $0xc8] sm:$0xff]  ;;  %v2793_v20 = vpop.f32.mrf.mxu0 }
 0x1d6   : > { %v1687_v31 = vpop.f32.mrf.mxu2  ;;  %v2884_v7 = vadd.f32 %v2790_v2, %v2526_v63  ;;  %v922_v2 = vld [vmem:[#allocation2 + $0x118] sm:$0xff] }
 0x1d7   : > { %v1188_v35 = vpop.f32.mrf.mxu1 }
 0x1d8   : > { %v1274_v36 = vadd.f32 %v1188_v35, %v916_v34  ;;  %2932 = vst.msk [vmem:[#allocation2 + $0xc8] sm:$0xff] %vm286_vm2, %v2884_v7  ;;  %5664 = vmatmul.msk.f32.gmra.mxu0 %vm432_vm1, %v2495_v22 }
 0x1d9   : > { %v1417_v40 = vld [vmem:[#allocation2 + $0xe0] sm:$0xff] }
 0x1da   : > { %1322 = vst.msk [vmem:[#allocation2 + $0xe8] sm:$0xff] %vm286_vm2, %v1274_v36  ;;  %v1775_v41 = vadd.f32 %v1687_v31, %v1417_v40  ;;  %5517 = vmatmul.msk.f32.gmra.mxu1 %vm432_vm1, %v6822_v56  ;;  %v2025_v56 = vld [vmem:[#allocation2 + $0xd0] sm:$0xff]  ;;  %v2297_v31 = vpop.f32.mrf.mxu3  ;;  %v3566_v40 = vld [vmem:[#allocation3 + $0x8] sm:$0xff]  ;;  %v2497_v53 = vld [vmem:[#allocation3 + $0x178] sm:$0xff] }
 0x1db   : > { %5567 = vmatmul.msk.f32.gmra.mxu2 %vm432_vm1, %v1386_v38  ;;  %v2383_v61 = vadd.f32 %v2291_v25, %v2025_v56  ;;  %v2026_v29 = vld [vmem:[#allocation2 + $0xd8] sm:$0xff]  ;;  %v2496_v38 = vld [vmem:[#allocation3 + $0x170] sm:$0xff] }
 0x1dc   : > { %1823 = vst.msk [vmem:[#allocation2 + $0xe0] sm:$0xff] %vm286_vm2, %v1775_v41  ;;  %v2384_v14 = vadd.f32 %v2294_v13, %v2026_v29  ;;  %5617 = vmatmul.msk.f32.gmra.mxu3 %vm432_vm1, %v2495_v22  ;;  %v3467_v25 = vld [vmem:[%s5997_s29 + $0x52] sm:$0xff] }
 0x1dd   : > { %2431 = vst.msk [vmem:[#allocation2 + $0xd0] sm:$0xff] %vm286_vm2, %v2383_v61  ;;  %v2796_v36 = vpop.f32.mrf.mxu0  ;;  %v2959_v61 = vld [vmem:[#allocation3 + $0x50] sm:$0xff]  ;;  %v4067_v29 = vld [vmem:[#allocation3 + $0x18] sm:$0xff] }
 0x1de   : > { %v1690_v21 = vpop.f32.mrf.mxu2  ;;  %2432 = vst.msk [vmem:[#allocation2 + $0xd8] sm:$0xff] %vm286_vm2, %v2384_v14  ;;  %v2960_v13 = vld [vmem:[#allocation3 + $0x58] sm:$0xff] }
 0x1df   : > { %v1191_v47 = vpop.f32.mrf.mxu1  ;;  %3521 = vst.msk [vmem:[#allocation3 + $0x50] sm:$0xff] %vm432_vm1, %v3467_v25  ;;  %v2963_v25 = vld [vmem:[#allocation3 + $0x70] sm:$0xff] }
 0x1e0   : > { %v1275_v51 = vadd.f32 %v1191_v47, %v917_v5  ;;  %5665 = vmatmul.msk.f32.gmra.mxu0 %vm432_vm1, %v2496_v38 }
 0x1e1   : > { %v1418_v54 = vld [vmem:[#allocation2 + $0xe8] sm:$0xff] }
 0x1e2   : > { %1323 = vst.msk [vmem:[#allocation2 + $0xf0] sm:$0xff] %vm286_vm2, %v1275_v51  ;;  %v1776_v50 = vadd.f32 %v1690_v21, %v1418_v54  ;;  %5518 = vmatmul.msk.f32.gmra.mxu1 %vm432_vm1, %v6837_v55  ;;  %v2958_v21 = vld [vmem:[#allocation3 + $0x48] sm:$0xff]  ;;  %v2300_v46 = vpop.f32.mrf.mxu3 }
 0x1e3   : > { %5568 = vmatmul.msk.f32.gmra.mxu2 %vm432_vm1, %v1387_v52  ;;  %v2027_v27 = vld [vmem:[#allocation2 + $0xe0] sm:$0xff]  ;;  %3520 = vst.msk [vmem:[#allocation3 + $0x48] sm:$0xff] %vm432_vm1, %v3466_v45  ;;  %v3470_v45 = vld [vmem:[%s5997_s29 + $0x6a] sm:$0xff] }
 0x1e4   : > { %1824 = vst.msk [vmem:[#allocation2 + $0xe8] sm:$0xff] %vm286_vm2, %v1776_v50  ;;  %v2527_v16 = vld [vmem:[#allocation2 + $0xd0] sm:$0xff]  ;;  %v2385_v32 = vadd.f32 %v2297_v31, %v2027_v27  ;;  %5618 = vmatmul.msk.f32.gmra.mxu3 %vm432_vm1, %v2496_v38 }
 0x1e5   : > { %v2885_v33 = vadd.f32 %v2793_v20, %v2527_v16  ;;  %v2528_v35 = vld [vmem:[#allocation2 + $0xd8] sm:$0xff]  ;;  %v2799_v52 = vpop.f32.mrf.mxu0  ;;  %v3567_v50 = vld [vmem:[#allocation3 + $0x10] sm:$0xff] }
 0x1e6   : > { %v1693_v9 = vpop.f32.mrf.mxu2  ;;  %2433 = vst.msk [vmem:[#allocation2 + $0xe0] sm:$0xff] %vm286_vm2, %v2385_v32  ;;  %v2886_v41 = vadd.f32 %v2796_v36, %v2528_v35  ;;  %v2500_v38 = vld [vmem:[#allocation3 + $0x190] sm:$0xff] }
 0x1e7   : > { %v1194_v1 = vpop.f32.mrf.mxu1  ;;  %2933 = vst.msk [vmem:[#allocation2 + $0xd0] sm:$0xff] %vm286_vm2, %v2885_v33 }
 0x1e8   : > { %v1276_v4 = vadd.f32 %v1194_v1, %v918_v0  ;;  %2934 = vst.msk [vmem:[#allocation2 + $0xd8] sm:$0xff] %vm286_vm2, %v2886_v41  ;;  %5666 = vmatmul.msk.f32.gmra.mxu0 %vm432_vm1, %v2497_v53 }
 0x1e9   : > { %v1419_v55 = vld [vmem:[#allocation2 + $0xf0] sm:$0xff] }
 0x1ea   : > { %1324 = vst.msk [vmem:[#allocation2 + $0xf8] sm:$0xff] %vm286_vm2, %v1276_v4  ;;  %v1777_v8 = vadd.f32 %v1693_v9, %v1419_v55  ;;  %5519 = vmatmul.msk.f32.gmra.mxu1 %vm432_vm1, %v6852_v24  ;;  %v3565_v24 = vld [vmem:[#allocation3] sm:$0xff]  ;;  %v2303_v9 = vpop.f32.mrf.mxu3 }
 0x1eb   : > { %5569 = vmatmul.msk.f32.gmra.mxu2 %vm432_vm1, %v1388_v6  ;;  %v2028_v43 = vld [vmem:[#allocation2 + $0xe8] sm:$0xff]  ;;  %v2498_v6 = vld [vmem:[#allocation3 + $0x180] sm:$0xff] }
 0x1ec   : > { %1825 = vst.msk [vmem:[#allocation2 + $0xf0] sm:$0xff] %vm286_vm2, %v1777_v8  ;;  %v2386_v5 = vadd.f32 %v2300_v46, %v2028_v43  ;;  %5619 = vmatmul.msk.f32.gmra.mxu3 %vm432_vm1, %v2497_v53  ;;  %v4569_v53 = vld [vmem:[#allocation3 + $0x30] sm:$0xff] }
 0x1ed   : > { %v2529_v48 = vld [vmem:[#allocation2 + $0xe0] sm:$0xff]  ;;  %v2802_v4 = vpop.f32.mrf.mxu0 }
 0x1ee   : > { %v1696_v15 = vpop.f32.mrf.mxu2  ;;  %2434 = vst.msk [vmem:[#allocation2 + $0xe8] sm:$0xff] %vm286_vm2, %v2386_v5  ;;  %v2887_v56 = vadd.f32 %v2799_v52, %v2529_v48 }
 0x1ef   : > { %v1197_v19 = vpop.f32.mrf.mxu1 }
 0x1f0   : > { %v1277_v23 = vadd.f32 %v1197_v19, %v919_v18  ;;  %2935 = vst.msk [vmem:[#allocation2 + $0xe0] sm:$0xff] %vm286_vm2, %v2887_v56  ;;  %5667 = vmatmul.msk.f32.gmra.mxu0 %vm432_vm1, %v2498_v6  ;;  %v923_v19 = vld [vmem:[#allocation2 + $0x120] sm:$0xff] }
 0x1f1   : > { %v1420_v26 = vld [vmem:[#allocation2 + $0xf8] sm:$0xff] }
 0x1f2   : > { %1325 = vst.msk [vmem:[#allocation2 + $0x100] sm:$0xff] %vm286_vm2, %v1277_v23  ;;  %v1778_v62 = vadd.f32 %v1696_v15, %v1420_v26  ;;  %5672 = vmatmul.msk.f32.vlgmr.msra.gmra.mxu1 %vm432_vm1, %v2955_v60  ;;  %v2306_v14 = vpop.f32.mrf.mxu3  ;;  %v2499_v23 = vld [vmem:[#allocation3 + $0x188] sm:$0xff] }
 0x1f3   : > { %5722 = vmatmul.msk.f32.vlgmr.msra.gmra.mxu2 %vm432_vm1, %v3565_v24  ;;  %v2029_v60 = vld [vmem:[#allocation2 + $0xf0] sm:$0xff] }
 0x1f4   : > { %1826 = vst.msk [vmem:[#allocation2 + $0xf8] sm:$0xff] %vm286_vm2, %v1778_v62  ;;  %v2387_v63 = vadd.f32 %v2303_v9, %v2029_v60  ;;  %5772 = vmatmul.msk.f32.vlgmr.msra.gmra.mxu3 %vm432_vm1, %v4067_v29  ;;  %v4068_v62 = vld [vmem:[#allocation3 + $0x20] sm:$0xff]  ;;  %v3471_v60 = vld [vmem:[%s5997_s29 + $0x72] sm:$0xff] }
 0x1f5   : > { %v2530_v1 = vld [vmem:[#allocation2 + $0xe8] sm:$0xff]  ;;  %v2805_v22 = vpop.f32.mrf.mxu0  ;;  %3525 = vst.msk [vmem:[#allocation3 + $0x70] sm:$0xff] %vm432_vm1, %v3471_v60 }
 0x1f6   : > { %v1699_v34 = vpop.f32.mrf.mxu2  ;;  %2435 = vst.msk [vmem:[#allocation2 + $0xf0] sm:$0xff] %vm286_vm2, %v2387_v63  ;;  %v2888_v55 = vadd.f32 %v2802_v4, %v2530_v1  ;;  %v926_v1 = vld [vmem:[#allocation2 + $0x138] sm:$0xff] }
 0x1f7   : > { %v1200_v57 = vpop.f32.mrf.mxu1  ;;  %v4570_v4 = vld [vmem:[#allocation3 + $0x38] sm:$0xff] }
 0x1f8   : > { %v1278_v39 = vadd.f32 %v1200_v57, %v920_v37  ;;  %2936 = vst.msk [vmem:[#allocation2 + $0xe8] sm:$0xff] %vm286_vm2, %v2888_v55  ;;  %5668 = vmatmul.msk.f32.gmra.mxu0 %vm432_vm1, %v2499_v23  ;;  %v924_v37 = vld [vmem:[#allocation2 + $0x128] sm:$0xff] }
 0x1f9   : > { %v1421_v42 = vld [vmem:[#allocation2 + $0x100] sm:$0xff] }
 0x1fa   : > { %1326 = vst.msk [vmem:[#allocation2 + $0x108] sm:$0xff] %vm286_vm2, %v1278_v39  ;;  %v1779_v44 = vadd.f32 %v1699_v34, %v1421_v42  ;;  %5673 = vmatmul.msk.f32.gmra.mxu1 %vm432_vm1, %v2956_v12  ;;  %v3468_v12 = vld [vmem:[%s5997_s29 + $0x5a] sm:$0xff]  ;;  %v2309_v31 = vpop.f32.mrf.mxu3  ;;  %v4069_v42 = vld [vmem:[#allocation3 + $0x28] sm:$0xff] }
 0x1fb   : > { %5723 = vmatmul.msk.f32.gmra.mxu2 %vm432_vm1, %v3566_v40  ;;  %v2030_v11 = vld [vmem:[#allocation2 + $0xf8] sm:$0xff]  ;;  %3522 = vst.msk [vmem:[#allocation3 + $0x58] sm:$0xff] %vm432_vm1, %v3468_v12 }
 0x1fc   : > { %1827 = vst.msk [vmem:[#allocation2 + $0x100] sm:$0xff] %vm286_vm2, %v1779_v44  ;;  %v2388_v15 = vadd.f32 %v2306_v14, %v2030_v11  ;;  %5773 = vmatmul.msk.f32.gmra.mxu3 %vm432_vm1, %v4068_v62  ;;  %v2964_v11 = vld [vmem:[#allocation3 + $0x78] sm:$0xff] }
 0x1fd   : > { %v2531_v18 = vld [vmem:[#allocation2 + $0xf0] sm:$0xff]  ;;  %v2808_v36 = vpop.f32.mrf.mxu0 }
 0x1fe   : > { %v1702_v47 = vpop.f32.mrf.mxu2  ;;  %2436 = vst.msk [vmem:[#allocation2 + $0xf8] sm:$0xff] %vm286_vm2, %v2388_v15  ;;  %v2889_v33 = vadd.f32 %v2805_v22, %v2531_v18 }
 0x1ff   : > { %v1203_v51 = vpop.f32.mrf.mxu1 }
 0x200   : > { %v1279_v54 = vadd.f32 %v1203_v51, %v921_v49  ;;  %2937 = vst.msk [vmem:[#allocation2 + $0xf0] sm:$0xff] %vm286_vm2, %v2889_v33  ;;  %5669 = vmatmul.msk.f32.gmra.mxu0 %vm432_vm1, %v2500_v38  ;;  %v925_v49 = vld [vmem:[#allocation2 + $0x130] sm:$0xff] }
 0x201   : > { %v1422_v58 = vld [vmem:[#allocation2 + $0x108] sm:$0xff] }
 0x202   : > { %1327 = vst.msk [vmem:[#allocation2 + $0x110] sm:$0xff] %vm286_vm2, %v1279_v54  ;;  %v1780_v59 = vadd.f32 %v1702_v47, %v1422_v58  ;;  %5674 = vmatmul.msk.f32.gmra.mxu1 %vm432_vm1, %v2957_v30  ;;  %v2961_v30 = vld [vmem:[#allocation3 + $0x60] sm:$0xff]  ;;  %v2312_v46 = vpop.f32.mrf.mxu3 }
 0x203   : > { %5724 = vmatmul.msk.f32.gmra.mxu2 %vm432_vm1, %v3567_v50  ;;  %v2031_v28 = vld [vmem:[#allocation2 + $0x100] sm:$0xff]  ;;  %3523 = vst.msk [vmem:[#allocation3 + $0x60] sm:$0xff] %vm432_vm1, %v3469_v17 }
 0x204   : > { %1828 = vst.msk [vmem:[#allocation2 + $0x108] sm:$0xff] %vm286_vm2, %v1780_v59  ;;  %v2389_v32 = vadd.f32 %v2309_v31, %v2031_v28  ;;  %5774 = vmatmul.msk.f32.gmra.mxu3 %vm432_vm1, %v4069_v42 }
 0x205   : > { %v2532_v35 = vld [vmem:[#allocation2 + $0xf8] sm:$0xff]  ;;  %v2811_v52 = vpop.f32.mrf.mxu0 }
 0x206   : > { %v1705_v0 = vpop.f32.mrf.mxu2  ;;  %2437 = vst.msk [vmem:[#allocation2 + $0x100] sm:$0xff] %vm286_vm2, %v2389_v32  ;;  %v2890_v40 = vadd.f32 %v2808_v36, %v2532_v35  ;;  %v928_v32 = vld [vmem:[#allocation2 + $0x148] sm:$0xff] }
 0x207   : > { %v1206_v3 = vpop.f32.mrf.mxu1 }
 0x208   : > { %v1280_v7 = vadd.f32 %v1206_v3, %v922_v2  ;;  %2938 = vst.msk [vmem:[#allocation2 + $0xf8] sm:$0xff] %vm286_vm2, %v2890_v40  ;;  %5822 = vmatmul.msk.f32.vlgmr.msra.gmra.mxu0 %vm432_vm1, %v4569_v53 }
 0x209   : > { %v1423_v8 = vld [vmem:[#allocation2 + $0x110] sm:$0xff] }
 0x20a   : > { %1328 = vst.msk [vmem:[#allocation2 + $0x118] sm:$0xff] %vm286_vm2, %v1280_v7  ;;  %v1781_v10 = vadd.f32 %v1705_v0, %v1423_v8  ;;  %5675 = vmatmul.msk.f32.gmra.mxu1 %vm432_vm1, %v2958_v21  ;;  %v2962_v21 = vld [vmem:[#allocation3 + $0x68] sm:$0xff] }
 0x20b   : > { %5725 = vmatmul.msk.f32.gmra.mxu2 %vm432_vm1, %v4067_v29  ;;  %v2032_v43 = vld [vmem:[#allocation2 + $0x108] sm:$0xff]  ;;  %3524 = vst.msk [vmem:[#allocation3 + $0x68] sm:$0xff] %vm432_vm1, %v3470_v45 }
 0x20c   : > { %1829 = vst.msk [vmem:[#allocation2 + $0x110] sm:$0xff] %vm286_vm2, %v1781_v10  ;;  %v2390_v5 = vadd.f32 %v2312_v46, %v2032_v43  ;;  %5775 = vmatmul.msk.f32.gmra.mxu3 %vm432_vm1, %v4569_v53  ;;  %v3472_v10 = vld [vmem:[%s5997_s29 + $0x7a] sm:$0xff]  ;;  %v929_v46 = vld [vmem:[#allocation2 + $0x150] sm:$0xff] }
 0x20d   : > { %v2533_v48 = vld [vmem:[#allocation2 + $0x100] sm:$0xff]  ;;  %v2814_v3 = vpop.f32.mrf.mxu0  ;;  %3526 = vst.msk [vmem:[#allocation3 + $0x78] sm:$0xff] %vm432_vm1, %v3472_v10 }
 0x20e   : > { %v1708_v16 = vpop.f32.mrf.mxu2  ;;  %2438 = vst.msk [vmem:[#allocation2 + $0x108] sm:$0xff] %vm286_vm2, %v2390_v5  ;;  %v2891_v50 = vadd.f32 %v2811_v52, %v2533_v48  ;;  %v4573_v48 = vld [vmem:[#allocation3 + $0x50] sm:$0xff] }
 0x20f   : > { %v1209_v20 = vpop.f32.mrf.mxu1 }
 0x210   : > { %v1281_v24 = vadd.f32 %v1209_v20, %v923_v19  ;;  %2939 = vst.msk [vmem:[#allocation2 + $0x100] sm:$0xff] %vm286_vm2, %v2891_v50  ;;  %5823 = vmatmul.msk.f32.gmra.mxu0 %vm432_vm1, %v4570_v4  ;;  %v4571_v20 = vld [vmem:[#allocation3 + $0x40] sm:$0xff]  ;;  %v3475_v50 = vld [vmem:[%s5997_s29 + $0x92] sm:$0xff] }
 0x211   : > { %v1424_v26 = vld [vmem:[#allocation2 + $0x118] sm:$0xff] }
 0x212   : > { %1329 = vst.msk [vmem:[#allocation2 + $0x120] sm:$0xff] %vm286_vm2, %v1281_v24  ;;  %v1782_v27 = vadd.f32 %v1708_v16, %v1424_v26  ;;  %5676 = vmatmul.msk.f32.gmra.mxu1 %vm432_vm1, %v2959_v61  ;;  %v2315_v61 = vpop.f32.mrf.mxu3  ;;  %v927_v16 = vld [vmem:[#allocation2 + $0x140] sm:$0xff] }
 0x213   : > { %5726 = vmatmul.msk.f32.gmra.mxu2 %vm432_vm1, %v4068_v62  ;;  %v2033_v59 = vld [vmem:[#allocation2 + $0x110] sm:$0xff]  ;;  %v3473_v62 = vld [vmem:[%s5997_s29 + $0x82] sm:$0xff] }
 0x214   : > { %1830 = vst.msk [vmem:[#allocation2 + $0x118] sm:$0xff] %vm286_vm2, %v1782_v27  ;;  %v2391_v9 = vadd.f32 %v2315_v61, %v2033_v59  ;;  %5776 = vmatmul.msk.f32.gmra.mxu3 %vm432_vm1, %v4570_v4  ;;  %v2965_v27 = vld [vmem:[#allocation3 + $0x80] sm:$0xff]  ;;  %v930_v61 = vld [vmem:[#allocation2 + $0x158] sm:$0xff] }
 0x215   : > { %v2534_v0 = vld [vmem:[#allocation2 + $0x108] sm:$0xff]  ;;  %v2817_v19 = vpop.f32.mrf.mxu0  ;;  %3527 = vst.msk [vmem:[#allocation3 + $0x80] sm:$0xff] %vm432_vm1, %v3473_v62 }
 0x216   : > { %v1711_v34 = vpop.f32.mrf.mxu2  ;;  %2439 = vst.msk [vmem:[#allocation2 + $0x110] sm:$0xff] %vm286_vm2, %v2391_v9  ;;  %v2892_v7 = vadd.f32 %v2814_v3, %v2534_v0  ;;  %v4574_v0 = vld [vmem:[#allocation3 + $0x58] sm:$0xff] }
 0x217   : > { %v1212_v57 = vpop.f32.mrf.mxu1 }
 0x218   : > { %v1282_v39 = vadd.f32 %v1212_v57, %v924_v37  ;;  %2940 = vst.msk [vmem:[#allocation2 + $0x108] sm:$0xff] %vm286_vm2, %v2892_v7  ;;  %5824 = vmatmul.msk.f32.gmra.mxu0 %vm432_vm1, %v4571_v20  ;;  %v4572_v37 = vld [vmem:[#allocation3 + $0x48] sm:$0xff]  ;;  %v3476_v7 = vld [vmem:[%s5997_s29 + $0x9a] sm:$0xff] }
 0x219   : > { %v1425_v41 = vld [vmem:[#allocation2 + $0x120] sm:$0xff] }
 0x21a   : > { %1330 = vst.msk [vmem:[#allocation2 + $0x128] sm:$0xff] %vm286_vm2, %v1282_v39  ;;  %v1783_v44 = vadd.f32 %v1711_v34, %v1425_v41  ;;  %5677 = vmatmul.msk.f32.gmra.mxu1 %vm432_vm1, %v2960_v13  ;;  %v2318_v12 = vpop.f32.mrf.mxu3  ;;  %v3474_v41 = vld [vmem:[%s5997_s29 + $0x8a] sm:$0xff] }
 0x21b   : > { %5727 = vmatmul.msk.f32.gmra.mxu2 %vm432_vm1, %v4069_v42  ;;  %v2034_v29 = vld [vmem:[#allocation2 + $0x118] sm:$0xff]  ;;  %v2966_v42 = vld [vmem:[#allocation3 + $0x88] sm:$0xff] }
 0x21c   : > { %1831 = vst.msk [vmem:[#allocation2 + $0x120] sm:$0xff] %vm286_vm2, %v1783_v44  ;;  %v2392_v13 = vadd.f32 %v2318_v12, %v2034_v29  ;;  %5777 = vmatmul.msk.f32.gmra.mxu3 %vm432_vm1, %v4571_v20  ;;  %v931_v12 = vld [vmem:[#allocation2 + $0x160] sm:$0xff] }
 0x21d   : > { %v2535_v15 = vld [vmem:[#allocation2 + $0x110] sm:$0xff]  ;;  %v2820_v35 = vpop.f32.mrf.mxu0  ;;  %3528 = vst.msk [vmem:[#allocation3 + $0x88] sm:$0xff] %vm432_vm1, %v3474_v41 }
 0x21e   : > { %v1714_v47 = vpop.f32.mrf.mxu2  ;;  %2440 = vst.msk [vmem:[#allocation2 + $0x118] sm:$0xff] %vm286_vm2, %v2392_v13  ;;  %v2893_v23 = vadd.f32 %v2817_v19, %v2535_v15  ;;  %v4575_v15 = vld [vmem:[#allocation3 + $0x60] sm:$0xff] }
 0x21f   : > { %v1215_v51 = vpop.f32.mrf.mxu1 }
 0x220   : > { %v1283_v54 = vadd.f32 %v1215_v51, %v925_v49  ;;  %2941 = vst.msk [vmem:[#allocation2 + $0x110] sm:$0xff] %vm286_vm2, %v2893_v23  ;;  %5825 = vmatmul.msk.f32.gmra.mxu0 %vm432_vm1, %v4572_v37  ;;  %v3477_v23 = vld [vmem:[%s5997_s29 + $0xa2] sm:$0xff] }
 0x221   : > { %v1426_v56 = vld [vmem:[#allocation2 + $0x128] sm:$0xff] }
 0x222   : > { %1331 = vst.msk [vmem:[#allocation2 + $0x130] sm:$0xff] %vm286_vm2, %v1283_v54  ;;  %v1784_v58 = vadd.f32 %v1714_v47, %v1426_v56  ;;  %5678 = vmatmul.msk.f32.gmra.mxu1 %vm432_vm1, %v2961_v30  ;;  %v2321_v28 = vpop.f32.mrf.mxu3  ;;  %v2967_v56 = vld [vmem:[#allocation3 + $0x90] sm:$0xff] }
 0x223   : > { %5728 = vmatmul.msk.f32.gmra.mxu2 %vm432_vm1, %v4569_v53  ;;  %v2035_v26 = vld [vmem:[#allocation2 + $0x120] sm:$0xff]  ;;  %3529 = vst.msk [vmem:[#allocation3 + $0x90] sm:$0xff] %vm432_vm1, %v3475_v50 }
 0x224   : > { %1832 = vst.msk [vmem:[#allocation2 + $0x128] sm:$0xff] %vm286_vm2, %v1784_v58  ;;  %v2393_v17 = vadd.f32 %v2321_v28, %v2035_v26  ;;  %5778 = vmatmul.msk.f32.gmra.mxu3 %vm432_vm1, %v4572_v37  ;;  %v932_v28 = vld [vmem:[#allocation2 + $0x168] sm:$0xff] }
 0x225   : > { %v2536_v31 = vld [vmem:[#allocation2 + $0x118] sm:$0xff]  ;;  %v2823_v47 = vpop.f32.mrf.mxu0 }
 0x226   : > { %v1717_v63 = vpop.f32.mrf.mxu2  ;;  %2441 = vst.msk [vmem:[#allocation2 + $0x120] sm:$0xff] %vm286_vm2, %v2393_v17  ;;  %v2894_v36 = vadd.f32 %v2820_v35, %v2536_v31  ;;  %v4576_v31 = vld [vmem:[#allocation3 + $0x68] sm:$0xff] }
 0x227   : > { %v1218_v2 = vpop.f32.mrf.mxu1 }
 0x228   : > { %v1284_v6 = vadd.f32 %v1218_v2, %v926_v1  ;;  %2942 = vst.msk [vmem:[#allocation2 + $0x118] sm:$0xff] %vm286_vm2, %v2894_v36  ;;  %5826 = vmatmul.msk.f32.gmra.mxu0 %vm432_vm1, %v4573_v48  ;;  %v3478_v36 = vld [vmem:[%s5997_s29 + $0xaa] sm:$0xff] }
 0x229   : > { %v1427_v55 = vld [vmem:[#allocation2 + $0x130] sm:$0xff] }
 0x22a   : > { %1332 = vst.msk [vmem:[#allocation2 + $0x138] sm:$0xff] %vm286_vm2, %v1284_v6  ;;  %v1785_v8 = vadd.f32 %v1717_v63, %v1427_v55  ;;  %5679 = vmatmul.msk.f32.gmra.mxu1 %vm432_vm1, %v2962_v21  ;;  %v2324_v44 = vpop.f32.mrf.mxu3  ;;  %v2968_v55 = vld [vmem:[#allocation3 + $0x98] sm:$0xff] }
 0x22b   : > { %5729 = vmatmul.msk.f32.gmra.mxu2 %vm432_vm1, %v4570_v4  ;;  %v2036_v40 = vld [vmem:[#allocation2 + $0x128] sm:$0xff]  ;;  %3530 = vst.msk [vmem:[#allocation3 + $0x98] sm:$0xff] %vm432_vm1, %v3476_v7 }
 0x22c   : > { %1833 = vst.msk [vmem:[#allocation2 + $0x130] sm:$0xff] %vm286_vm2, %v1785_v8  ;;  %v2394_v43 = vadd.f32 %v2324_v44, %v2036_v40  ;;  %5779 = vmatmul.msk.f32.gmra.mxu3 %vm432_vm1, %v4573_v48  ;;  %v933_v44 = vld [vmem:[#allocation2 + $0x170] sm:$0xff] }
 0x22d   : > { %v2537_v21 = vld [vmem:[#allocation2 + $0x120] sm:$0xff]  ;;  %v2826_v63 = vpop.f32.mrf.mxu0 }
 0x22e   : > { %v1720_v14 = vpop.f32.mrf.mxu2  ;;  %2442 = vst.msk [vmem:[#allocation2 + $0x128] sm:$0xff] %vm286_vm2, %v2394_v43  ;;  %v2895_v51 = vadd.f32 %v2823_v47, %v2537_v21  ;;  %v4577_v21 = vld [vmem:[#allocation3 + $0x70] sm:$0xff] }
 0x22f   : > { %v1221_v18 = vpop.f32.mrf.mxu1 }
 0x230   : > { %v1285_v22 = vadd.f32 %v1221_v18, %v927_v16  ;;  %2943 = vst.msk [vmem:[#allocation2 + $0x120] sm:$0xff] %vm286_vm2, %v2895_v51  ;;  %5827 = vmatmul.msk.f32.gmra.mxu0 %vm432_vm1, %v4574_v0  ;;  %v3479_v51 = vld [vmem:[%s5997_s29 + $0xb2] sm:$0xff] }
 0x231   : > { %v1428_v24 = vld [vmem:[#allocation2 + $0x138] sm:$0xff] }
 0x232   : > { %1333 = vst.msk [vmem:[#allocation2 + $0x140] sm:$0xff] %vm286_vm2, %v1285_v22  ;;  %v1786_v33 = vadd.f32 %v1720_v14, %v1428_v24  ;;  %5680 = vmatmul.msk.f32.gmra.mxu1 %vm432_vm1, %v2963_v25  ;;  %v2327_v58 = vpop.f32.mrf.mxu3  ;;  %v2969_v24 = vld [vmem:[#allocation3 + $0xa0] sm:$0xff] }
 0x233   : > { %5730 = vmatmul.msk.f32.gmra.mxu2 %vm432_vm1, %v4571_v20  ;;  %v2037_v54 = vld [vmem:[#allocation2 + $0x130] sm:$0xff]  ;;  %3531 = vst.msk [vmem:[#allocation3 + $0xa0] sm:$0xff] %vm432_vm1, %v3477_v23 }
 0x234   : > { %1834 = vst.msk [vmem:[#allocation2 + $0x138] sm:$0xff] %vm286_vm2, %v1786_v33  ;;  %v2395_v59 = vadd.f32 %v2327_v58, %v2037_v54  ;;  %5780 = vmatmul.msk.f32.gmra.mxu3 %vm432_vm1, %v4574_v0  ;;  %v934_v58 = vld [vmem:[#allocation2 + $0x178] sm:$0xff] }
 0x235   : > { %v2538_v25 = vld [vmem:[#allocation2 + $0x128] sm:$0xff]  ;;  %v2829_v14 = vpop.f32.mrf.mxu0 }
 0x236   : > { %v1723_v30 = vpop.f32.mrf.mxu2  ;;  %2443 = vst.msk [vmem:[#allocation2 + $0x130] sm:$0xff] %vm286_vm2, %v2395_v59  ;;  %v2896_v2 = vadd.f32 %v2826_v63, %v2538_v25  ;;  %v4578_v25 = vld [vmem:[#allocation3 + $0x78] sm:$0xff] }
 0x237   : > { %v1224_v34 = vpop.f32.mrf.mxu1 }
 0x238   : > { %v1286_v57 = vadd.f32 %v1224_v34, %v928_v32  ;;  %2944 = vst.msk [vmem:[#allocation2 + $0x128] sm:$0xff] %vm286_vm2, %v2896_v2  ;;  %5828 = vmatmul.msk.f32.gmra.mxu0 %vm432_vm1, %v4575_v15  ;;  %v3480_v2 = vld [vmem:[%s5997_s29 + $0xba] sm:$0xff] }
 0x239   : > { %v1429_v38 = vld [vmem:[#allocation2 + $0x140] sm:$0xff] }
 0x23a   : > { %1334 = vst.msk [vmem:[#allocation2 + $0x148] sm:$0xff] %vm286_vm2, %v1286_v57  ;;  %v1787_v39 = vadd.f32 %v1723_v30, %v1429_v38  ;;  %5681 = vmatmul.msk.f32.gmra.mxu1 %vm432_vm1, %v2964_v11  ;;  %v2330_v8 = vpop.f32.mrf.mxu3  ;;  %v2970_v38 = vld [vmem:[#allocation3 + $0xa8] sm:$0xff] }
 0x23b   : > { %5731 = vmatmul.msk.f32.gmra.mxu2 %vm432_vm1, %v4572_v37  ;;  %v2038_v6 = vld [vmem:[#allocation2 + $0x138] sm:$0xff]  ;;  %3532 = vst.msk [vmem:[#allocation3 + $0xa8] sm:$0xff] %vm432_vm1, %v3478_v36 }
 0x23c   : > { %1835 = vst.msk [vmem:[#allocation2 + $0x140] sm:$0xff] %vm286_vm2, %v1787_v39  ;;  %v2396_v29 = vadd.f32 %v2330_v8, %v2038_v6  ;;  %5781 = vmatmul.msk.f32.gmra.mxu3 %vm432_vm1, %v4575_v15  ;;  %v3003_v8 = vld [vmem:[#allocation2] sm:$0xff] }
 0x23d   : > { %v2539_v11 = vld [vmem:[#allocation2 + $0x130] sm:$0xff]  ;;  %v2832_v30 = vpop.f32.mrf.mxu0 }
 0x23e   : > { %v1726_v45 = vpop.f32.mrf.mxu2  ;;  %2444 = vst.msk [vmem:[#allocation2 + $0x138] sm:$0xff] %vm286_vm2, %v2396_v29  ;;  %v2897_v18 = vadd.f32 %v2829_v14, %v2539_v11  ;;  %v4579_v11 = vld [vmem:[#allocation3 + $0x80] sm:$0xff] }
 0x23f   : > { %v1227_v5 = vpop.f32.mrf.mxu1 }
 0x240   : > { %v1287_v49 = vadd.f32 %v1227_v5, %v929_v46  ;;  %2945 = vst.msk [vmem:[#allocation2 + $0x130] sm:$0xff] %vm286_vm2, %v2897_v18  ;;  %5829 = vmatmul.msk.f32.gmra.mxu0 %vm432_vm1, %v4576_v31  ;;  %v3481_v18 = vld [vmem:[%s5997_s29 + $0xc2] sm:$0xff] }
 0x241   : > { %v1430_v52 = vld [vmem:[#allocation2 + $0x148] sm:$0xff] }
 0x242   : > { %1335 = vst.msk [vmem:[#allocation2 + $0x150] sm:$0xff] %vm286_vm2, %v1287_v49  ;;  %v1788_v53 = vadd.f32 %v1726_v45, %v1430_v52  ;;  %5682 = vmatmul.msk.f32.gmra.mxu1 %vm432_vm1, %v2965_v27  ;;  %v2333_v33 = vpop.f32.mrf.mxu3  ;;  %v2971_v52 = vld [vmem:[#allocation3 + $0xb0] sm:$0xff] }
 0x243   : > { %5732 = vmatmul.msk.f32.gmra.mxu2 %vm432_vm1, %v4573_v48  ;;  %v2039_v22 = vld [vmem:[#allocation2 + $0x140] sm:$0xff]  ;;  %3533 = vst.msk [vmem:[#allocation3 + $0xb0] sm:$0xff] %vm432_vm1, %v3479_v51  ;;  %v3006_v51 = vld [vmem:[#allocation2 + $0x18] sm:$0xff] }
 0x244   : > { %1836 = vst.msk [vmem:[#allocation2 + $0x148] sm:$0xff] %vm286_vm2, %v1788_v53  ;;  %v2397_v26 = vadd.f32 %v2333_v33, %v2039_v22  ;;  %5782 = vmatmul.msk.f32.gmra.mxu3 %vm432_vm1, %v4576_v31  ;;  %v3004_v33 = vld [vmem:[#allocation2 + $0x8] sm:$0xff] }
 0x245   : > { %v2540_v27 = vld [vmem:[#allocation2 + $0x138] sm:$0xff]  ;;  %v2835_v45 = vpop.f32.mrf.mxu0 }
 0x246   : > { %v1729_v60 = vpop.f32.mrf.mxu2  ;;  %2445 = vst.msk [vmem:[#allocation2 + $0x140] sm:$0xff] %vm286_vm2, %v2397_v26  ;;  %v2898_v34 = vadd.f32 %v2832_v30, %v2540_v27  ;;  %v4580_v27 = vld [vmem:[#allocation3 + $0x88] sm:$0xff] }
 0x247   : > { %v1230_v9 = vpop.f32.mrf.mxu1 }
 0x248   : > { %v1288_v1 = vadd.f32 %v1230_v9, %v930_v61  ;;  %2946 = vst.msk [vmem:[#allocation2 + $0x138] sm:$0xff] %vm286_vm2, %v2898_v34  ;;  %5830 = vmatmul.msk.f32.gmra.mxu0 %vm432_vm1, %v4577_v21  ;;  %v3482_v34 = vld [vmem:[%s5997_s29 + $0xca] sm:$0xff] }
 0x249   : > { %v1431_v3 = vld [vmem:[#allocation2 + $0x150] sm:$0xff] }
 0x24a   : > { %1336 = vst.msk [vmem:[#allocation2 + $0x158] sm:$0xff] %vm286_vm2, %v1288_v1  ;;  %v1789_v4 = vadd.f32 %v1729_v60, %v1431_v3  ;;  %5683 = vmatmul.msk.f32.gmra.mxu1 %vm432_vm1, %v2966_v42  ;;  %v2336_v39 = vpop.f32.mrf.mxu3  ;;  %v2972_v3 = vld [vmem:[#allocation3 + $0xb8] sm:$0xff] }
 0x24b   : > { %5733 = vmatmul.msk.f32.gmra.mxu2 %vm432_vm1, %v4574_v0  ;;  %v2040_v57 = vld [vmem:[#allocation2 + $0x148] sm:$0xff]  ;;  %3534 = vst.msk [vmem:[#allocation3 + $0xb8] sm:$0xff] %vm432_vm1, %v3480_v2  ;;  %v2975_v2 = vld [vmem:[#allocation3 + $0xd0] sm:$0xff] }
 0x24c   : > { %1837 = vst.msk [vmem:[#allocation2 + $0x150] sm:$0xff] %vm286_vm2, %v1789_v4  ;;  %v2398_v40 = vadd.f32 %v2336_v39, %v2040_v57  ;;  %5783 = vmatmul.msk.f32.gmra.mxu3 %vm432_vm1, %v4577_v21  ;;  %v3005_v39 = vld [vmem:[#allocation2 + $0x10] sm:$0xff] }
 0x24d   : > { %v2541_v42 = vld [vmem:[#allocation2 + $0x140] sm:$0xff]  ;;  %v2838_v60 = vpop.f32.mrf.mxu0 }
 0x24e   : > { %v1732_v10 = vpop.f32.mrf.mxu2  ;;  %2446 = vst.msk [vmem:[#allocation2 + $0x148] sm:$0xff] %vm286_vm2, %v2398_v40  ;;  %v2899_v5 = vadd.f32 %v2835_v45, %v2541_v42  ;;  %v4581_v42 = vld [vmem:[#allocation3 + $0x90] sm:$0xff] }
 0x24f   : > { %v1233_v13 = vpop.f32.mrf.mxu1 }
 0x250   : > { %v1289_v16 = vadd.f32 %v1233_v13, %v931_v12  ;;  %2947 = vst.msk [vmem:[#allocation2 + $0x140] sm:$0xff] %vm286_vm2, %v2899_v5  ;;  %5831 = vmatmul.msk.f32.gmra.mxu0 %vm432_vm1, %v4578_v25 }
 0x251   : > { %v1432_v19 = vld [vmem:[#allocation2 + $0x158] sm:$0xff] }
 0x252   : > { %1337 = vst.msk [vmem:[#allocation2 + $0x160] sm:$0xff] %vm286_vm2, %v1289_v16  ;;  %v1790_v20 = vadd.f32 %v1732_v10, %v1432_v19  ;;  %5684 = vmatmul.msk.f32.gmra.mxu1 %vm432_vm1, %v2967_v56  ;;  %v2339_v53 = vpop.f32.mrf.mxu3  ;;  %v2973_v19 = vld [vmem:[#allocation3 + $0xc0] sm:$0xff] }
 0x253   : > { %5734 = vmatmul.msk.f32.gmra.mxu2 %vm432_vm1, %v4575_v15  ;;  %v2041_v49 = vld [vmem:[#allocation2 + $0x150] sm:$0xff]  ;;  %3535 = vst.msk [vmem:[#allocation3 + $0xc0] sm:$0xff] %vm432_vm1, %v3481_v18  ;;  %v2976_v18 = vld [vmem:[#allocation3 + $0xd8] sm:$0xff] }
 0x254   : > { %1838 = vst.msk [vmem:[#allocation2 + $0x158] sm:$0xff] %vm286_vm2, %v1790_v20  ;;  %v2399_v54 = vadd.f32 %v2339_v53, %v2041_v49  ;;  %5784 = vmatmul.msk.f32.gmra.mxu3 %vm432_vm1, %v4578_v25 }
 0x255   : > { %v2542_v56 = vld [vmem:[#allocation2 + $0x148] sm:$0xff]  ;;  %v2841_v10 = vpop.f32.mrf.mxu0 }
 0x256   : > { %v1735_v62 = vpop.f32.mrf.mxu2  ;;  %2447 = vst.msk [vmem:[#allocation2 + $0x150] sm:$0xff] %vm286_vm2, %v2399_v54  ;;  %v2900_v9 = vadd.f32 %v2838_v60, %v2542_v56  ;;  %v4582_v54 = vld [vmem:[#allocation3 + $0x98] sm:$0xff] }
 0x257   : > { %v1236_v17 = vpop.f32.mrf.mxu1 }
 0x258   : > { %v1290_v32 = vadd.f32 %v1236_v17, %v932_v28  ;;  %2948 = vst.msk [vmem:[#allocation2 + $0x148] sm:$0xff] %vm286_vm2, %v2900_v9  ;;  %5832 = vmatmul.msk.f32.gmra.mxu0 %vm432_vm1, %v4579_v11  ;;  %v3007_v9 = vld [vmem:[#allocation2 + $0x20] sm:$0xff] }
 0x259   : > { %v1433_v35 = vld [vmem:[#allocation2 + $0x160] sm:$0xff] }
 0x25a   : > { %1338 = vst.msk [vmem:[#allocation2 + $0x168] sm:$0xff] %vm286_vm2, %v1290_v32  ;;  %v1791_v37 = vadd.f32 %v1735_v62, %v1433_v35  ;;  %5685 = vmatmul.msk.f32.gmra.mxu1 %vm432_vm1, %v2968_v55  ;;  %v2342_v4 = vpop.f32.mrf.mxu3  ;;  %v2974_v35 = vld [vmem:[#allocation3 + $0xc8] sm:$0xff] }
 0x25b   : > { %5735 = vmatmul.msk.f32.gmra.mxu2 %vm432_vm1, %v4576_v31  ;;  %v2042_v1 = vld [vmem:[#allocation2 + $0x158] sm:$0xff]  ;;  %3536 = vst.msk [vmem:[#allocation3 + $0xc8] sm:$0xff] %vm432_vm1, %v3482_v34  ;;  %v2977_v34 = vld [vmem:[#allocation3 + $0xe0] sm:$0xff] }
 0x25c   : > { %1839 = vst.msk [vmem:[#allocation2 + $0x160] sm:$0xff] %vm286_vm2, %v1791_v37  ;;  %v2400_v6 = vadd.f32 %v2342_v4, %v2042_v1  ;;  %5785 = vmatmul.msk.f32.gmra.mxu3 %vm432_vm1, %v4579_v11 }
 0x25d   : > { %v2543_v55 = vld [vmem:[#allocation2 + $0x150] sm:$0xff]  ;;  %v2844_v62 = vpop.f32.mrf.mxu0 }
 0x25e   : > { %v1738_v41 = vpop.f32.mrf.mxu2  ;;  %2448 = vst.msk [vmem:[#allocation2 + $0x158] sm:$0xff] %vm286_vm2, %v2400_v6  ;;  %v2901_v13 = vadd.f32 %v2841_v10, %v2543_v55  ;;  %v4583_v6 = vld [vmem:[#allocation3 + $0xa0] sm:$0xff] }
 0x25f   : > { %v1239_v43 = vpop.f32.mrf.mxu1 }
 0x260   : > { %v1291_v46 = vadd.f32 %v1239_v43, %v933_v44  ;;  %2949 = vst.msk [vmem:[#allocation2 + $0x150] sm:$0xff] %vm286_vm2, %v2901_v13  ;;  %5833 = vmatmul.msk.f32.gmra.mxu0 %vm432_vm1, %v4580_v27  ;;  %v3008_v13 = vld [vmem:[#allocation2 + $0x28] sm:$0xff] }
 0x261   : > { %v1434_v47 = vld [vmem:[#allocation2 + $0x168] sm:$0xff] }
 0x262   : > { %1339 = vst.msk [vmem:[#allocation2 + $0x170] sm:$0xff] %vm286_vm2, %v1291_v46  ;;  %v1792_v48 = vadd.f32 %v1738_v41, %v1434_v47  ;;  %5686 = vmatmul.msk.f32.gmra.mxu1 %vm432_vm1, %v2969_v24  ;;  %v2345_v20 = vpop.f32.mrf.mxu3 }
 0x263   : > { %5736 = vmatmul.msk.f32.gmra.mxu2 %vm432_vm1, %v4577_v21  ;;  %v2043_v16 = vld [vmem:[#allocation2 + $0x160] sm:$0xff] }
 0x264   : > { %1840 = vst.msk [vmem:[#allocation2 + $0x168] sm:$0xff] %vm286_vm2, %v1792_v48  ;;  %v2401_v22 = vadd.f32 %v2345_v20, %v2043_v16  ;;  %5786 = vmatmul.msk.f32.gmra.mxu3 %vm432_vm1, %v4580_v27 }
 0x265   : > { %v2544_v24 = vld [vmem:[#allocation2 + $0x158] sm:$0xff]  ;;  %v2847_v41 = vpop.f32.mrf.mxu0 }
 0x266   : > { %v1741_v50 = vpop.f32.mrf.mxu2  ;;  %2449 = vst.msk [vmem:[#allocation2 + $0x160] sm:$0xff] %vm286_vm2, %v2401_v22  ;;  %v2902_v17 = vadd.f32 %v2844_v62, %v2544_v24  ;;  %v4584_v22 = vld [vmem:[#allocation3 + $0xa8] sm:$0xff] }
 0x267   : > { %v1242_v59 = vpop.f32.mrf.mxu1 }
 0x268   : > { %v1292_v61 = vadd.f32 %v1242_v59, %v934_v58  ;;  %2950 = vst.msk [vmem:[#allocation2 + $0x158] sm:$0xff] %vm286_vm2, %v2902_v17  ;;  %5834 = vmatmul.msk.f32.gmra.mxu0 %vm432_vm1, %v4581_v42  ;;  %v3009_v17 = vld [vmem:[#allocation2 + $0x30] sm:$0xff] }
 0x269   : > { %v1435_v63 = vld [vmem:[#allocation2 + $0x170] sm:$0xff] }
 0x26a   : > { %1340 = vst.msk [vmem:[#allocation2 + $0x178] sm:$0xff] %vm286_vm2, %v1292_v61  ;;  %v1793_v0 = vadd.f32 %v1741_v50, %v1435_v63  ;;  %5687 = vmatmul.msk.f32.gmra.mxu1 %vm432_vm1, %v2970_v38  ;;  %v2348_v37 = vpop.f32.mrf.mxu3 }
 0x26b   : > { %5737 = vmatmul.msk.f32.gmra.mxu2 %vm432_vm1, %v4578_v25  ;;  %v2044_v32 = vld [vmem:[#allocation2 + $0x168] sm:$0xff] }
 0x26c   : > { %1841 = vst.msk [vmem:[#allocation2 + $0x170] sm:$0xff] %vm286_vm2, %v1793_v0  ;;  %v2402_v57 = vadd.f32 %v2348_v37, %v2044_v32  ;;  %5787 = vmatmul.msk.f32.gmra.mxu3 %vm432_vm1, %v4581_v42 }
 0x26d   : > { %v2545_v38 = vld [vmem:[#allocation2 + $0x160] sm:$0xff]  ;;  %v2850_v53 = vpop.f32.mrf.mxu0 }
 0x26e   : > { %v1744_v7 = vpop.f32.mrf.mxu2  ;;  %2450 = vst.msk [vmem:[#allocation2 + $0x168] sm:$0xff] %vm286_vm2, %v2402_v57  ;;  %v2903_v43 = vadd.f32 %v2847_v41, %v2545_v38  ;;  %v4585_v57 = vld [vmem:[#allocation3 + $0xb0] sm:$0xff] }
 0x26f   : > { %v3217_v29 = vpop.f32.mrf.mxu1 }
 0x270   : > { %v3361_v12 = vadd.f32 %v3217_v29, %v3003_v8  ;;  %2951 = vst.msk [vmem:[#allocation2 + $0x160] sm:$0xff] %vm286_vm2, %v2903_v43  ;;  %5835 = vmatmul.msk.f32.gmra.mxu0 %vm432_vm1, %v4582_v54  ;;  %v3010_v43 = vld [vmem:[#allocation2 + $0x38] sm:$0xff] }
 0x271   : > { %v1436_v14 = vld [vmem:[#allocation2 + $0x178] sm:$0xff] }
 0x272   : > { %3409 = vst.msk [vmem:[#allocation2] sm:$0xff] %vm286_vm2, %v3361_v12  ;;  %v1794_v15 = vadd.f32 %v1744_v7, %v1436_v14  ;;  %5688 = vmatmul.msk.f32.gmra.mxu1 %vm432_vm1, %v2971_v52  ;;  %v2351_v5 = vpop.f32.mrf.mxu3 }
 0x273   : > { %5738 = vmatmul.msk.f32.gmra.mxu2 %vm432_vm1, %v4579_v11  ;;  %v2045_v46 = vld [vmem:[#allocation2 + $0x170] sm:$0xff] }
 0x274   : > { %1842 = vst.msk [vmem:[#allocation2 + $0x178] sm:$0xff] %vm286_vm2, %v1794_v15  ;;  %v2403_v47 = vadd.f32 %v2351_v5, %v2045_v46  ;;  %5788 = vmatmul.msk.f32.gmra.mxu3 %vm432_vm1, %v4582_v54  ;;  %v2978_v5 = vld [vmem:[#allocation3 + $0xe8] sm:$0xff] }
 0x275   : > { %v2546_v49 = vld [vmem:[#allocation2 + $0x168] sm:$0xff]  ;;  %v2853_v4 = vpop.f32.mrf.mxu0 }
 0x276   : > { %v3827_v23 = vpop.f32.mrf.mxu2  ;;  %2451 = vst.msk [vmem:[#allocation2 + $0x170] sm:$0xff] %vm286_vm2, %v2403_v47  ;;  %v2904_v56 = vadd.f32 %v2850_v53, %v2546_v49  ;;  %v3486_v47 = vld [vmem:[%s5997_s29 + $0xea] sm:$0xff]  ;;  %v4586_v49 = vld [vmem:[#allocation3 + $0xb8] sm:$0xff] }
 0x277   : > { %v3220_v26 = vpop.f32.mrf.mxu1  ;;  %3540 = vst.msk [vmem:[#allocation3 + $0xe8] sm:$0xff] %vm432_vm1, %v3486_v47 }
 0x278   : > { %v3362_v28 = vadd.f32 %v3220_v26, %v3004_v33  ;;  %2952 = vst.msk [vmem:[#allocation2 + $0x168] sm:$0xff] %vm286_vm2, %v2904_v56  ;;  %5836 = vmatmul.msk.f32.gmra.mxu0 %vm432_vm1, %v4583_v6 }
 0x279   : > { %v3613_v30 = vld [vmem:[#allocation2] sm:$0xff] }
 0x27a   : > { %3410 = vst.msk [vmem:[#allocation2 + $0x8] sm:$0xff] %vm286_vm2, %v3362_v28  ;;  %v3971_v31 = vadd.f32 %v3827_v23, %v3613_v30  ;;  %5689 = vmatmul.msk.f32.gmra.mxu1 %vm432_vm1, %v2972_v3  ;;  %v2354_v25 = vpop.f32.mrf.mxu3  ;;  %v3483_v3 = vld [vmem:[%s5997_s29 + $0xd2] sm:$0xff] }
 0x27b   : > { %5739 = vmatmul.msk.f32.gmra.mxu2 %vm432_vm1, %v4580_v27  ;;  %v2046_v60 = vld [vmem:[#allocation2 + $0x178] sm:$0xff]  ;;  %3537 = vst.msk [vmem:[#allocation3 + $0xd0] sm:$0xff] %vm432_vm1, %v3483_v3 }
 0x27c   : > { %4019 = vst.msk [vmem:[#allocation2] sm:$0xff] %vm286_vm2, %v3971_v31  ;;  %v2404_v61 = vadd.f32 %v2354_v25, %v2046_v60  ;;  %5789 = vmatmul.msk.f32.gmra.mxu3 %vm432_vm1, %v4583_v6  ;;  %v3487_v3 = vld [vmem:[%s5997_s29 + $0xf2] sm:$0xff] }
 0x27d   : > { %v2547_v0 = vld [vmem:[#allocation2 + $0x170] sm:$0xff]  ;;  %v2856_v20 = vpop.f32.mrf.mxu0 }
 0x27e   : > { %v3830_v36 = vpop.f32.mrf.mxu2  ;;  %2452 = vst.msk [vmem:[#allocation2 + $0x178] sm:$0xff] %vm286_vm2, %v2404_v61  ;;  %v2905_v55 = vadd.f32 %v2853_v4, %v2547_v0 }
 0x27f   : > { %v3223_v40 = vpop.f32.mrf.mxu1 }
 0x280   : > { %v3363_v44 = vadd.f32 %v3223_v40, %v3005_v39  ;;  %2953 = vst.msk [vmem:[#allocation2 + $0x170] sm:$0xff] %vm286_vm2, %v2905_v55  ;;  %5837 = vmatmul.msk.f32.gmra.mxu0 %vm432_vm1, %v4584_v22 }
 0x281   : > { %v3614_v45 = vld [vmem:[#allocation2 + $0x8] sm:$0xff] }
 0x282   : > { %3411 = vst.msk [vmem:[#allocation2 + $0x10] sm:$0xff] %vm286_vm2, %v3363_v44  ;;  %v3972_v21 = vadd.f32 %v3830_v36, %v3614_v45  ;;  %5690 = vmatmul.msk.f32.gmra.mxu1 %vm432_vm1, %v2973_v19  ;;  %v4329_v11 = vpop.f32.mrf.mxu3  ;;  %v3484_v19 = vld [vmem:[%s5997_s29 + $0xda] sm:$0xff] }
 0x283   : > { %5740 = vmatmul.msk.f32.gmra.mxu2 %vm432_vm1, %v4581_v42  ;;  %v4115_v10 = vld [vmem:[#allocation2] sm:$0xff]  ;;  %3538 = vst.msk [vmem:[#allocation3 + $0xd8] sm:$0xff] %vm432_vm1, %v3484_v19 }
 0x284   : > { %4020 = vst.msk [vmem:[#allocation2 + $0x8] sm:$0xff] %vm286_vm2, %v3972_v21  ;;  %v4473_v12 = vadd.f32 %v4329_v11, %v4115_v10  ;;  %5790 = vmatmul.msk.f32.gmra.mxu3 %vm432_vm1, %v4584_v22 }
 0x285   : > { %v2548_v15 = vld [vmem:[#allocation2 + $0x178] sm:$0xff]  ;;  %v4831_v37 = vpop.f32.mrf.mxu0 }
 0x286   : > { %v3833_v48 = vpop.f32.mrf.mxu2  ;;  %4521 = vst.msk [vmem:[#allocation2] sm:$0xff] %vm286_vm2, %v4473_v12  ;;  %v2906_v24 = vadd.f32 %v2856_v20, %v2548_v15 }
 0x287   : > { %v3226_v52 = vpop.f32.mrf.mxu1 }
 0x288   : > { %v3364_v50 = vadd.f32 %v3226_v52, %v3006_v51  ;;  %2954 = vst.msk [vmem:[#allocation2 + $0x178] sm:$0xff] %vm286_vm2, %v2906_v24  ;;  %5838 = vmatmul.msk.f32.gmra.mxu0 %vm432_vm1, %v4585_v57  ;;  %v7139_v52 = vld [vmem:[%s7642_s2] ss:$0 sm:$0xff] }
 0x289   : > { %v3615_v58 = vld [vmem:[#allocation2 + $0x10] sm:$0xff] }
 0x28a   : > { %3412 = vst.msk [vmem:[#allocation2 + $0x18] sm:$0xff] %vm286_vm2, %v3364_v50  ;;  %v3973_v59 = vadd.f32 %v3833_v48, %v3615_v58  ;;  %5691 = vmatmul.msk.f32.gmra.mxu1 %vm432_vm1, %v2974_v35  ;;  %v4332_v27 = vpop.f32.mrf.mxu3  ;;  %v3485_v35 = vld [vmem:[%s5997_s29 + $0xe2] sm:$0xff] }
 0x28b   : > { %5741 = vmatmul.msk.f32.gmra.mxu2 %vm432_vm1, %v4582_v54  ;;  %v4116_v62 = vld [vmem:[#allocation2 + $0x8] sm:$0xff]  ;;  %3539 = vst.msk [vmem:[#allocation3 + $0xe0] sm:$0xff] %vm432_vm1, %v3485_v35 }
 0x28c   : > { %4021 = vst.msk [vmem:[#allocation2 + $0x10] sm:$0xff] %vm286_vm2, %v3973_v59  ;;  %v4474_v28 = vadd.f32 %v4332_v27, %v4116_v62  ;;  %5791 = vmatmul.msk.f32.gmra.mxu3 %vm432_vm1, %v4585_v57 }
 0x28d   : > { %v4617_v31 = vld [vmem:[#allocation2] sm:$0xff]  ;;  %v4834_v48 = vpop.f32.mrf.mxu0 }
 0x28e   : > { %v3836_v63 = vpop.f32.mrf.mxu2  ;;  %4522 = vst.msk [vmem:[#allocation2 + $0x8] sm:$0xff] %vm286_vm2, %v4474_v28  ;;  %v4975_v38 = vadd.f32 %v4831_v37, %v4617_v31  ;;  %v3013_v37 = vld [vmem:[#allocation2 + $0x50] sm:$0xff] }
 0x28f   : > { %v3229_v1 = vpop.f32.mrf.mxu1 }
 0x290   : > { %v3365_v7 = vadd.f32 %v3229_v1, %v3007_v9  ;;  %5023 = vst.msk [vmem:[#allocation2] sm:$0xff] %vm286_vm2, %v4975_v38  ;;  %5839 = vmatmul.msk.f32.gmra.mxu0 %vm432_vm1, %v4586_v49  ;;  %v3011_v9 = vld [vmem:[#allocation2 + $0x40] sm:$0xff] }
 0x291   : > { %v3616_v8 = vld [vmem:[#allocation2 + $0x18] sm:$0xff] }
 0x292   : > { %3413 = vst.msk [vmem:[#allocation2 + $0x20] sm:$0xff] %vm286_vm2, %v3365_v7  ;;  %v3974_v29 = vadd.f32 %v3836_v63, %v3616_v8  ;;  %5692 = vmatmul.msk.f32.gmra.mxu1 %vm432_vm1, %v2975_v2  ;;  %v4335_v42 = vpop.f32.mrf.mxu3  ;;  %v2979_v2 = vld [vmem:[#allocation3 + $0xf0] sm:$0xff] }
 0x293   : > { %5742 = vmatmul.msk.f32.gmra.mxu2 %vm432_vm1, %v4583_v6  ;;  %v4117_v41 = vld [vmem:[#allocation2 + $0x10] sm:$0xff]  ;;  %v4587_v6 = vld [vmem:[#allocation3 + $0xc0] sm:$0xff]  ;;  %3541 = vst.msk [vmem:[#allocation3 + $0xf0] sm:$0xff] %vm432_vm1, %v3487_v3 }
 0x294   : > { %4022 = vst.msk [vmem:[#allocation2 + $0x18] sm:$0xff] %vm286_vm2, %v3974_v29  ;;  %v4475_v44 = vadd.f32 %v4335_v42, %v4117_v41  ;;  %5792 = vmatmul.msk.f32.gmra.mxu3 %vm432_vm1, %v4586_v49  ;;  %v4589_v42 = vld [vmem:[#allocation3 + $0xd0] sm:$0xff] }
 0x295   : > { %v4618_v21 = vld [vmem:[#allocation2 + $0x8] sm:$0xff]  ;;  %v4837_v4 = vpop.f32.mrf.mxu0 }
 0x296   : > { %v3839_v14 = vpop.f32.mrf.mxu2  ;;  %4523 = vst.msk [vmem:[#allocation2 + $0x10] sm:$0xff] %vm286_vm2, %v4475_v44  ;;  %v4976_v53 = vadd.f32 %v4834_v48, %v4618_v21 }
 0x297   : > { %v3232_v16 = vpop.f32.mrf.mxu1  ;;  %v5074_v50 = vld [vmem:[#allocation2] sm:$0xff] }
 0x298   : > { %v3366_v23 = vadd.f32 %v3232_v16, %v3008_v13  ;;  %v5122_v58 = vmul.f32 0.16666667, %v5074_v50  ;;  %5024 = vst.msk [vmem:[#allocation2 + $0x8] sm:$0xff] %vm286_vm2, %v4976_v53  ;;  %5840 = vmatmul.msk.f32.gmra.mxu0 %vm432_vm1, %v4587_v6  ;;  %v3012_v16 = vld [vmem:[#allocation2 + $0x48] sm:$0xff]  ;;  %v3014_v53 = vld [vmem:[#allocation2 + $0x58] sm:$0xff] }
 0x299   : > { %v3617_v33 = vld [vmem:[#allocation2 + $0x20] sm:$0xff] }
 0x29a   : > { %3414 = vst.msk [vmem:[#allocation2 + $0x28] sm:$0xff] %vm286_vm2, %v3366_v23  ;;  %v3975_v26 = vadd.f32 %v3839_v14, %v3617_v33  ;;  %5693 = vmatmul.msk.f32.gmra.mxu1 %vm432_vm1, %v2976_v18  ;;  %v5174_v60 = vadd.f32 %v7139_v52, %v5122_v58  ;;  %v4338_v25 = vpop.f32.mrf.mxu3  ;;  %v3488_v23 = vld [vmem:[%s5997_s29 + $0xfa] sm:$0xff]  ;;  %v4588_v33 = vld [vmem:[#allocation3 + $0xc8] sm:$0xff] }
 0x29b   : > { %5743 = vmatmul.msk.f32.gmra.mxu2 %vm432_vm1, %v4584_v22  ;;  %v4118_v59 = vld [vmem:[#allocation2 + $0x18] sm:$0xff]  ;;  %v2982_v58 = vld [vmem:[#allocation3 + $0x108] sm:$0xff] }
 0x29c   : > { %4023 = vst.msk [vmem:[#allocation2 + $0x20] sm:$0xff] %vm286_vm2, %v3975_v26  ;;  %v4476_v61 = vadd.f32 %v4338_v25, %v4118_v59  ;;  %v2980_v22 = vld [vmem:[#allocation3 + $0xf8] sm:$0xff]  ;;  %5793 = vmatmul.msk.f32.gmra.mxu3 %vm432_vm1, %v4587_v6  ;;  %v3490_v59 = vld [vmem:[%s5997_s29 + $0x10a] sm:$0xff] }
 0x29d   : > { %5222 = vst.msk [vmem:[%s7151_s19] sm:$0xff] %vm286_vm2, %v5174_v60  ;;  %v4619_v0 = vld [vmem:[#allocation2 + $0x10] sm:$0xff]  ;;  %v4840_v24 = vpop.f32.mrf.mxu0  ;;  %v4590_v25 = vld [vmem:[#allocation3 + $0xd8] sm:$0xff] }
 0x29e   : > { %v3842_v30 = vpop.f32.mrf.mxu2  ;;  %4524 = vst.msk [vmem:[#allocation2 + $0x18] sm:$0xff] %vm286_vm2, %v4476_v61  ;;  %v4977_v55 = vadd.f32 %v4837_v4, %v4619_v0 }
 0x29f   : > { %v3235_v32 = vpop.f32.mrf.mxu1  ;;  %v5075_v29 = vld [vmem:[#allocation2 + $0x8] sm:$0xff]  ;;  %3542 = vst.msk [vmem:[#allocation3 + $0xf8] sm:$0xff] %vm432_vm1, %v3488_v23 }
 0x2a0   : > { %v3367_v36 = vadd.f32 %v3235_v32, %v3009_v17  ;;  %v5123_v11 = vmul.f32 0.16666667, %v5075_v29  ;;  %5025 = vst.msk [vmem:[#allocation2 + $0x10] sm:$0xff] %vm286_vm2, %v4977_v55  ;;  %5841 = vmatmul.msk.f32.gmra.mxu0 %vm432_vm1, %v4588_v33  ;;  %v3015_v55 = vld [vmem:[#allocation2 + $0x60] sm:$0xff] }
 0x2a1   : > { %v3618_v39 = vld [vmem:[#allocation2 + $0x28] sm:$0xff]  ;;  %3544 = vst.msk [vmem:[#allocation3 + $0x108] sm:$0xff] %vm432_vm1, %v3490_v59 }
 0x2a2   : > { %3415 = vst.msk [vmem:[#allocation2 + $0x30] sm:$0xff] %vm286_vm2, %v3367_v36  ;;  %v3976_v40 = vadd.f32 %v3842_v30, %v3618_v39  ;;  %5694 = vmatmul.msk.f32.gmra.mxu1 %vm432_vm1, %v2977_v34  ;;  %v5175_v13 = vadd.f32 %v7139_v52, %v5123_v11  ;;  %v4341_v14 = vpop.f32.mrf.mxu3  ;;  %v2981_v39 = vld [vmem:[#allocation3 + $0x100] sm:$0xff]  ;;  %v2983_v11 = vld [vmem:[#allocation3 + $0x110] sm:$0xff] }
 0x2a3   : > { %5744 = vmatmul.msk.f32.gmra.mxu2 %vm432_vm1, %v4585_v57  ;;  %v4119_v12 = vld [vmem:[#allocation2 + $0x20] sm:$0xff] }
 0x2a4   : > { %4024 = vst.msk [vmem:[#allocation2 + $0x28] sm:$0xff] %vm286_vm2, %v3976_v40  ;;  %v4477_v15 = vadd.f32 %v4341_v14, %v4119_v12  ;;  %v3489_v40 = vld [vmem:[%s5997_s29 + $0x102] sm:$0xff]  ;;  %5794 = vmatmul.msk.f32.gmra.mxu3 %vm432_vm1, %v4588_v33  ;;  %v3491_v12 = vld [vmem:[%s5997_s29 + $0x112] sm:$0xff] }
 0x2a5   : > { %5223 = vst.msk [vmem:[%s7151_s19 + $0x8] sm:$0xff] %vm286_vm2, %v5175_v13  ;;  %v4620_v19 = vld [vmem:[#allocation2 + $0x18] sm:$0xff]  ;;  %v4843_v41 = vpop.f32.mrf.mxu0  ;;  %v4591_v14 = vld [vmem:[#allocation3 + $0xe0] sm:$0xff] }
 0x2a6   : > { %v3845_v45 = vpop.f32.mrf.mxu2  ;;  %4525 = vst.msk [vmem:[#allocation2 + $0x20] sm:$0xff] %vm286_vm2, %v4477_v15  ;;  %v4978_v62 = vadd.f32 %v4840_v24, %v4620_v19 }
 0x2a7   : > { %v3238_v46 = vpop.f32.mrf.mxu1  ;;  %v5076_v28 = vld [vmem:[#allocation2 + $0x10] sm:$0xff]  ;;  %3543 = vst.msk [vmem:[#allocation3 + $0x100] sm:$0xff] %vm432_vm1, %v3489_v40 }
 0x2a8   : > { %v3368_v51 = vadd.f32 %v3238_v46, %v3010_v43  ;;  %v5124_v30 = vmul.f32 0.16666667, %v5076_v28  ;;  %5026 = vst.msk [vmem:[#allocation2 + $0x18] sm:$0xff] %vm286_vm2, %v4978_v62  ;;  %5842 = vmatmul.msk.f32.gmra.mxu0 %vm432_vm1, %v4589_v42  ;;  %v3016_v62 = vld [vmem:[#allocation2 + $0x68] sm:$0xff] }
 0x2a9   : > { %v3619_v54 = vld [vmem:[#allocation2 + $0x30] sm:$0xff]  ;;  %3545 = vst.msk [vmem:[#allocation3 + $0x110] sm:$0xff] %vm432_vm1, %v3491_v12 }
 0x2aa   : > { %3416 = vst.msk [vmem:[#allocation2 + $0x38] sm:$0xff] %vm286_vm2, %v3368_v51  ;;  %v3977_v56 = vadd.f32 %v3845_v45, %v3619_v54  ;;  %5695 = vmatmul.msk.f32.gmra.mxu1 %vm432_vm1, %v2978_v5  ;;  %v5176_v32 = vadd.f32 %v7139_v52, %v5124_v30  ;;  %v4344_v34 = vpop.f32.mrf.mxu3  ;;  %v2984_v30 = vld [vmem:[#allocation3 + $0x118] sm:$0xff] }
 0x2ab   : > { %5745 = vmatmul.msk.f32.gmra.mxu2 %vm432_vm1, %v4586_v49  ;;  %v4120_v31 = vld [vmem:[#allocation2 + $0x28] sm:$0xff] }
 0x2ac   : > { %4025 = vst.msk [vmem:[#allocation2 + $0x30] sm:$0xff] %vm286_vm2, %v3977_v56  ;;  %v4478_v35 = vadd.f32 %v4344_v34, %v4120_v31  ;;  %5795 = vmatmul.msk.f32.gmra.mxu3 %vm432_vm1, %v4589_v42  ;;  %v3492_v31 = vld [vmem:[%s5997_s29 + $0x11a] sm:$0xff]  ;;  %v4592_v34 = vld [vmem:[#allocation3 + $0xe8] sm:$0xff] }
 0x2ad   : > { %5224 = vst.msk [vmem:[%s7151_s19 + $0x10] sm:$0xff] %vm286_vm2, %v5176_v32  ;;  %v4621_v36 = vld [vmem:[#allocation2 + $0x20] sm:$0xff]  ;;  %v4846_v60 = vpop.f32.mrf.mxu0 }
 0x2ae   : > { %v3848_v63 = vpop.f32.mrf.mxu2  ;;  %4526 = vst.msk [vmem:[#allocation2 + $0x28] sm:$0xff] %vm286_vm2, %v4478_v35  ;;  %v4979_v43 = vadd.f32 %v4843_v41, %v4621_v36 }
 0x2af   : > { %v3241_v1 = vpop.f32.mrf.mxu1  ;;  %v5077_v21 = vld [vmem:[#allocation2 + $0x18] sm:$0xff]  ;;  %3546 = vst.msk [vmem:[#allocation3 + $0x118] sm:$0xff] %vm432_vm1, %v3492_v31 }
 0x2b0   : > { %v3369_v7 = vadd.f32 %v3241_v1, %v3011_v9  ;;  %v5125_v5 = vmul.f32 0.16666667, %v5077_v21  ;;  %5027 = vst.msk [vmem:[#allocation2 + $0x20] sm:$0xff] %vm286_vm2, %v4979_v43  ;;  %5843 = vmatmul.msk.f32.gmra.mxu0 %vm432_vm1, %v4590_v25  ;;  %v3017_v43 = vld [vmem:[#allocation2 + $0x70] sm:$0xff] }
 0x2b1   : > { %v3620_v8 = vld [vmem:[#allocation2 + $0x38] sm:$0xff] }
 0x2b2   : > { %3417 = vst.msk [vmem:[#allocation2 + $0x40] sm:$0xff] %vm286_vm2, %v3369_v7  ;;  %v3978_v10 = vadd.f32 %v3848_v63, %v3620_v8  ;;  %5696 = vmatmul.msk.f32.gmra.mxu1 %vm432_vm1, %v2979_v2  ;;  %v5177_v48 = vadd.f32 %v7139_v52, %v5125_v5  ;;  %v4347_v49 = vpop.f32.mrf.mxu3  ;;  %v2985_v5 = vld [vmem:[#allocation3 + $0x120] sm:$0xff] }
 0x2b3   : > { %5746 = vmatmul.msk.f32.gmra.mxu2 %vm432_vm1, %v4587_v6  ;;  %v4121_v47 = vld [vmem:[#allocation2 + $0x30] sm:$0xff] }
 0x2b4   : > { %4026 = vst.msk [vmem:[#allocation2 + $0x38] sm:$0xff] %vm286_vm2, %v3978_v10  ;;  %v4479_v51 = vadd.f32 %v4347_v49, %v4121_v47  ;;  %5796 = vmatmul.msk.f32.gmra.mxu3 %vm432_vm1, %v4590_v25  ;;  %v3493_v47 = vld [vmem:[%s5997_s29 + $0x122] sm:$0xff]  ;;  %v4593_v49 = vld [vmem:[#allocation3 + $0xf0] sm:$0xff] }
 0x2b5   : > { %5225 = vst.msk [vmem:[%s7151_s19 + $0x18] sm:$0xff] %vm286_vm2, %v5177_v48  ;;  %v4622_v50 = vld [vmem:[#allocation2 + $0x28] sm:$0xff]  ;;  %v4849_v13 = vpop.f32.mrf.mxu0 }
 0x2b6   : > { %v3851_v18 = vpop.f32.mrf.mxu2  ;;  %4527 = vst.msk [vmem:[#allocation2 + $0x30] sm:$0xff] %vm286_vm2, %v4479_v51  ;;  %v4980_v9 = vadd.f32 %v4846_v60, %v4622_v50 }
 0x2b7   : > { %v3244_v20 = vpop.f32.mrf.mxu1  ;;  %v5078_v0 = vld [vmem:[#allocation2 + $0x20] sm:$0xff]  ;;  %3547 = vst.msk [vmem:[#allocation3 + $0x120] sm:$0xff] %vm432_vm1, %v3493_v47 }
 0x2b8   : > { %v3370_v26 = vadd.f32 %v3244_v20, %v3012_v16  ;;  %v5126_v2 = vmul.f32 0.16666667, %v5078_v0  ;;  %5028 = vst.msk [vmem:[#allocation2 + $0x28] sm:$0xff] %vm286_vm2, %v4980_v9  ;;  %5844 = vmatmul.msk.f32.gmra.mxu0 %vm432_vm1, %v4591_v14  ;;  %v3018_v9 = vld [vmem:[#allocation2 + $0x78] sm:$0xff] }
 0x2b9   : > { %v3621_v27 = vld [vmem:[#allocation2 + $0x40] sm:$0xff] }
 0x2ba   : > { %3418 = vst.msk [vmem:[#allocation2 + $0x48] sm:$0xff] %vm286_vm2, %v3370_v26  ;;  %v3979_v17 = vadd.f32 %v3851_v18, %v3621_v27  ;;  %5697 = vmatmul.msk.f32.gmra.mxu1 %vm432_vm1, %v2980_v22  ;;  %v5178_v4 = vadd.f32 %v7139_v52, %v5126_v2  ;;  %v4350_v6 = vpop.f32.mrf.mxu3  ;;  %v2986_v2 = vld [vmem:[#allocation3 + $0x128] sm:$0xff] }
 0x2bb   : > { %5747 = vmatmul.msk.f32.gmra.mxu2 %vm432_vm1, %v4588_v33  ;;  %v4122_v3 = vld [vmem:[#allocation2 + $0x38] sm:$0xff] }
 0x2bc   : > { %4027 = vst.msk [vmem:[#allocation2 + $0x40] sm:$0xff] %vm286_vm2, %v3979_v17  ;;  %v4480_v7 = vadd.f32 %v4350_v6, %v4122_v3  ;;  %5797 = vmatmul.msk.f32.gmra.mxu3 %vm432_vm1, %v4591_v14  ;;  %v3494_v3 = vld [vmem:[%s5997_s29 + $0x12a] sm:$0xff]  ;;  %v4594_v6 = vld [vmem:[#allocation3 + $0xf8] sm:$0xff] }
 0x2bd   : > { %5226 = vst.msk [vmem:[%s7151_s19 + $0x20] sm:$0xff] %vm286_vm2, %v5178_v4  ;;  %v4623_v29 = vld [vmem:[#allocation2 + $0x30] sm:$0xff]  ;;  %v4852_v32 = vpop.f32.mrf.mxu0 }
 0x2be   : > { %v3854_v57 = vpop.f32.mrf.mxu2  ;;  %4528 = vst.msk [vmem:[#allocation2 + $0x38] sm:$0xff] %vm286_vm2, %v4480_v7  ;;  %v4981_v16 = vadd.f32 %v4849_v13, %v4623_v29 }
 0x2bf   : > { %v3247_v38 = vpop.f32.mrf.mxu1  ;;  %v5079_v19 = vld [vmem:[#allocation2 + $0x28] sm:$0xff]  ;;  %3548 = vst.msk [vmem:[#allocation3 + $0x128] sm:$0xff] %vm432_vm1, %v3494_v3 }
 0x2c0   : > { %v3371_v44 = vadd.f32 %v3247_v38, %v3013_v37  ;;  %v5127_v22 = vmul.f32 0.16666667, %v5079_v19  ;;  %5029 = vst.msk [vmem:[#allocation2 + $0x30] sm:$0xff] %vm286_vm2, %v4981_v16  ;;  %5845 = vmatmul.msk.f32.gmra.mxu0 %vm432_vm1, %v4592_v34  ;;  %v3019_v16 = vld [vmem:[#allocation2 + $0x80] sm:$0xff] }
 0x2c1   : > { %v3622_v45 = vld [vmem:[#allocation2 + $0x48] sm:$0xff] }
 0x2c2   : > { %3419 = vst.msk [vmem:[#allocation2 + $0x50] sm:$0xff] %vm286_vm2, %v3371_v44  ;;  %v3980_v46 = vadd.f32 %v3854_v57, %v3622_v45  ;;  %5698 = vmatmul.msk.f32.gmra.mxu1 %vm432_vm1, %v2981_v39  ;;  %v5179_v24 = vadd.f32 %v7139_v52, %v5127_v22  ;;  %v4353_v33 = vpop.f32.mrf.mxu3  ;;  %v2987_v22 = vld [vmem:[#allocation3 + $0x130] sm:$0xff] }
 0x2c3   : > { %5748 = vmatmul.msk.f32.gmra.mxu2 %vm432_vm1, %v4589_v42  ;;  %v4123_v23 = vld [vmem:[#allocation2 + $0x40] sm:$0xff] }
 0x2c4   : > { %4028 = vst.msk [vmem:[#allocation2 + $0x48] sm:$0xff] %vm286_vm2, %v3980_v46  ;;  %v4481_v26 = vadd.f32 %v4353_v33, %v4123_v23  ;;  %5798 = vmatmul.msk.f32.gmra.mxu3 %vm432_vm1, %v4592_v34  ;;  %v3495_v23 = vld [vmem:[%s5997_s29 + $0x132] sm:$0xff]  ;;  %v4595_v33 = vld [vmem:[#allocation3 + $0x100] sm:$0xff] }
 0x2c5   : > { %5227 = vst.msk [vmem:[%s7151_s19 + $0x28] sm:$0xff] %vm286_vm2, %v5179_v24  ;;  %v4624_v28 = vld [vmem:[#allocation2 + $0x38] sm:$0xff]  ;;  %v4855_v48 = vpop.f32.mrf.mxu0 }
 0x2c6   : > { %v3857_v54 = vpop.f32.mrf.mxu2  ;;  %4529 = vst.msk [vmem:[#allocation2 + $0x40] sm:$0xff] %vm286_vm2, %v4481_v26  ;;  %v4982_v37 = vadd.f32 %v4852_v32, %v4624_v28 }
 0x2c7   : > { %v3250_v56 = vpop.f32.mrf.mxu1  ;;  %v5080_v36 = vld [vmem:[#allocation2 + $0x30] sm:$0xff]  ;;  %3549 = vst.msk [vmem:[#allocation3 + $0x130] sm:$0xff] %vm432_vm1, %v3495_v23 }
 0x2c8   : > { %v3372_v61 = vadd.f32 %v3250_v56, %v3014_v53  ;;  %v5128_v39 = vmul.f32 0.16666667, %v5080_v36  ;;  %5030 = vst.msk [vmem:[#allocation2 + $0x38] sm:$0xff] %vm286_vm2, %v4982_v37  ;;  %5846 = vmatmul.msk.f32.gmra.mxu0 %vm432_vm1, %v4593_v49  ;;  %v3020_v37 = vld [vmem:[#allocation2 + $0x88] sm:$0xff] }
 0x2c9   : > { %v3623_v63 = vld [vmem:[#allocation2 + $0x50] sm:$0xff] }
 0x2ca   : > { %3420 = vst.msk [vmem:[#allocation2 + $0x58] sm:$0xff] %vm286_vm2, %v3372_v61  ;;  %v3981_v1 = vadd.f32 %v3857_v54, %v3623_v63  ;;  %5699 = vmatmul.msk.f32.gmra.mxu1 %vm432_vm1, %v2982_v58  ;;  %v5180_v41 = vadd.f32 %v7139_v52, %v5128_v39  ;;  %v4356_v42 = vpop.f32.mrf.mxu3  ;;  %v2988_v39 = vld [vmem:[#allocation3 + $0x138] sm:$0xff] }
 0x2cb   : > { %5749 = vmatmul.msk.f32.gmra.mxu2 %vm432_vm1, %v4590_v25  ;;  %v4124_v40 = vld [vmem:[#allocation2 + $0x48] sm:$0xff] }
 0x2cc   : > { %4029 = vst.msk [vmem:[#allocation2 + $0x50] sm:$0xff] %vm286_vm2, %v3981_v1  ;;  %v4482_v44 = vadd.f32 %v4356_v42, %v4124_v40  ;;  %5799 = vmatmul.msk.f32.gmra.mxu3 %vm432_vm1, %v4593_v49  ;;  %v3496_v40 = vld [vmem:[%s5997_s29 + $0x13a] sm:$0xff]  ;;  %v4596_v42 = vld [vmem:[#allocation3 + $0x108] sm:$0xff] }
 0x2cd   : > { %5228 = vst.msk [vmem:[%s7151_s19 + $0x30] sm:$0xff] %vm286_vm2, %v5180_v41  ;;  %v4625_v21 = vld [vmem:[#allocation2 + $0x40] sm:$0xff]  ;;  %v4858_v4 = vpop.f32.mrf.mxu0 }
 0x2ce   : > { %v3860_v8 = vpop.f32.mrf.mxu2  ;;  %4530 = vst.msk [vmem:[#allocation2 + $0x48] sm:$0xff] %vm286_vm2, %v4482_v44  ;;  %v4983_v53 = vadd.f32 %v4855_v48, %v4625_v21 }
 0x2cf   : > { %v3253_v10 = vpop.f32.mrf.mxu1  ;;  %v5081_v50 = vld [vmem:[#allocation2 + $0x38] sm:$0xff]  ;;  %3550 = vst.msk [vmem:[#allocation3 + $0x138] sm:$0xff] %vm432_vm1, %v3496_v40 }
 0x2d0   : > { %v3373_v15 = vadd.f32 %v3253_v10, %v3015_v55  ;;  %v5129_v58 = vmul.f32 0.16666667, %v5081_v50  ;;  %5031 = vst.msk [vmem:[#allocation2 + $0x40] sm:$0xff] %vm286_vm2, %v4983_v53  ;;  %5847 = vmatmul.msk.f32.gmra.mxu0 %vm432_vm1, %v4594_v6  ;;  %v3021_v53 = vld [vmem:[#allocation2 + $0x90] sm:$0xff] }
 0x2d1   : > { %v3624_v18 = vld [vmem:[#allocation2 + $0x58] sm:$0xff] }
 0x2d2   : > { %3421 = vst.msk [vmem:[#allocation2 + $0x60] sm:$0xff] %vm286_vm2, %v3373_v15  ;;  %v3982_v20 = vadd.f32 %v3860_v8, %v3624_v18  ;;  %5700 = vmatmul.msk.f32.gmra.mxu1 %vm432_vm1, %v2983_v11  ;;  %v5181_v60 = vadd.f32 %v7139_v52, %v5129_v58  ;;  %v4359_v25 = vpop.f32.mrf.mxu3  ;;  %v2989_v58 = vld [vmem:[#allocation3 + $0x140] sm:$0xff] }
 0x2d3   : > { %5750 = vmatmul.msk.f32.gmra.mxu2 %vm432_vm1, %v4591_v14  ;;  %v4125_v59 = vld [vmem:[#allocation2 + $0x50] sm:$0xff] }
 0x2d4   : > { %4030 = vst.msk [vmem:[#allocation2 + $0x58] sm:$0xff] %vm286_vm2, %v3982_v20  ;;  %v4483_v61 = vadd.f32 %v4359_v25, %v4125_v59  ;;  %5800 = vmatmul.msk.f32.gmra.mxu3 %vm432_vm1, %v4594_v6  ;;  %v3497_v59 = vld [vmem:[%s5997_s29 + $0x142] sm:$0xff]  ;;  %v4597_v25 = vld [vmem:[#allocation3 + $0x110] sm:$0xff] }
 0x2d5   : > { %5229 = vst.msk [vmem:[%s7151_s19 + $0x38] sm:$0xff] %vm286_vm2, %v5181_v60  ;;  %v4626_v0 = vld [vmem:[#allocation2 + $0x48] sm:$0xff]  ;;  %v4861_v24 = vpop.f32.mrf.mxu0 }
 0x2d6   : > { %v3863_v27 = vpop.f32.mrf.mxu2  ;;  %4531 = vst.msk [vmem:[#allocation2 + $0x50] sm:$0xff] %vm286_vm2, %v4483_v61  ;;  %v4984_v55 = vadd.f32 %v4858_v4, %v4626_v0 }
 0x2d7   : > { %v3256_v17 = vpop.f32.mrf.mxu1  ;;  %v5082_v29 = vld [vmem:[#allocation2 + $0x40] sm:$0xff]  ;;  %3551 = vst.msk [vmem:[#allocation3 + $0x140] sm:$0xff] %vm432_vm1, %v3497_v59 }
 0x2d8   : > { %v3374_v35 = vadd.f32 %v3256_v17, %v3016_v62  ;;  %v5130_v11 = vmul.f32 0.16666667, %v5082_v29  ;;  %5032 = vst.msk [vmem:[#allocation2 + $0x48] sm:$0xff] %vm286_vm2, %v4984_v55  ;;  %5848 = vmatmul.msk.f32.gmra.mxu0 %vm432_vm1, %v4595_v33  ;;  %v3022_v55 = vld [vmem:[#allocation2 + $0x98] sm:$0xff] }
 0x2d9   : > { %v3625_v57 = vld [vmem:[#allocation2 + $0x60] sm:$0xff] }
 0x2da   : > { %3422 = vst.msk [vmem:[#allocation2 + $0x68] sm:$0xff] %vm286_vm2, %v3374_v35  ;;  %v3983_v38 = vadd.f32 %v3863_v27, %v3625_v57  ;;  %5701 = vmatmul.msk.f32.gmra.mxu1 %vm432_vm1, %v2984_v30  ;;  %v5182_v13 = vadd.f32 %v7139_v52, %v5130_v11  ;;  %v4362_v14 = vpop.f32.mrf.mxu3  ;;  %v2990_v11 = vld [vmem:[#allocation3 + $0x148] sm:$0xff] }
 0x2db   : > { %5751 = vmatmul.msk.f32.gmra.mxu2 %vm432_vm1, %v4592_v34  ;;  %v4126_v12 = vld [vmem:[#allocation2 + $0x58] sm:$0xff] }
 0x2dc   : > { %4031 = vst.msk [vmem:[#allocation2 + $0x60] sm:$0xff] %vm286_vm2, %v3983_v38  ;;  %v4484_v15 = vadd.f32 %v4362_v14, %v4126_v12  ;;  %5801 = vmatmul.msk.f32.gmra.mxu3 %vm432_vm1, %v4595_v33  ;;  %v3498_v12 = vld [vmem:[%s5997_s29 + $0x14a] sm:$0xff]  ;;  %v4598_v14 = vld [vmem:[#allocation3 + $0x118] sm:$0xff] }
 0x2dd   : > { %5230 = vst.msk [vmem:[%s7151_s19 + $0x40] sm:$0xff] %vm286_vm2, %v5182_v13  ;;  %v4627_v19 = vld [vmem:[#allocation2 + $0x50] sm:$0xff]  ;;  %v4864_v41 = vpop.f32.mrf.mxu0 }
 0x2de   : > { %v3866_v45 = vpop.f32.mrf.mxu2  ;;  %4532 = vst.msk [vmem:[#allocation2 + $0x58] sm:$0xff] %vm286_vm2, %v4484_v15  ;;  %v4985_v62 = vadd.f32 %v4861_v24, %v4627_v19 }
 0x2df   : > { %v3259_v46 = vpop.f32.mrf.mxu1  ;;  %v5083_v28 = vld [vmem:[#allocation2 + $0x48] sm:$0xff]  ;;  %3552 = vst.msk [vmem:[#allocation3 + $0x148] sm:$0xff] %vm432_vm1, %v3498_v12 }
 0x2e0   : > { %v3375_v51 = vadd.f32 %v3259_v46, %v3017_v43  ;;  %v5131_v30 = vmul.f32 0.16666667, %v5083_v28  ;;  %5033 = vst.msk [vmem:[#allocation2 + $0x50] sm:$0xff] %vm286_vm2, %v4985_v62  ;;  %5849 = vmatmul.msk.f32.gmra.mxu0 %vm432_vm1, %v4596_v42  ;;  %v3023_v62 = vld [vmem:[#allocation2 + $0xa0] sm:$0xff] }
 0x2e1   : > { %v3626_v54 = vld [vmem:[#allocation2 + $0x68] sm:$0xff] }
 0x2e2   : > { %3423 = vst.msk [vmem:[#allocation2 + $0x70] sm:$0xff] %vm286_vm2, %v3375_v51  ;;  %v3984_v56 = vadd.f32 %v3866_v45, %v3626_v54  ;;  %5702 = vmatmul.msk.f32.gmra.mxu1 %vm432_vm1, %v2985_v5  ;;  %v5183_v32 = vadd.f32 %v7139_v52, %v5131_v30  ;;  %v4365_v34 = vpop.f32.mrf.mxu3  ;;  %v2991_v30 = vld [vmem:[#allocation3 + $0x150] sm:$0xff] }
 0x2e3   : > { %5752 = vmatmul.msk.f32.gmra.mxu2 %vm432_vm1, %v4593_v49  ;;  %v4127_v31 = vld [vmem:[#allocation2 + $0x60] sm:$0xff] }
 0x2e4   : > { %4032 = vst.msk [vmem:[#allocation2 + $0x68] sm:$0xff] %vm286_vm2, %v3984_v56  ;;  %v4485_v35 = vadd.f32 %v4365_v34, %v4127_v31  ;;  %5802 = vmatmul.msk.f32.gmra.mxu3 %vm432_vm1, %v4596_v42  ;;  %v3499_v31 = vld [vmem:[%s5997_s29 + $0x152] sm:$0xff]  ;;  %v4599_v34 = vld [vmem:[#allocation3 + $0x120] sm:$0xff] }
 0x2e5   : > { %5231 = vst.msk [vmem:[%s7151_s19 + $0x48] sm:$0xff] %vm286_vm2, %v5183_v32  ;;  %v4628_v36 = vld [vmem:[#allocation2 + $0x58] sm:$0xff]  ;;  %v4867_v60 = vpop.f32.mrf.mxu0 }
 0x2e6   : > { %v3869_v63 = vpop.f32.mrf.mxu2  ;;  %4533 = vst.msk [vmem:[#allocation2 + $0x60] sm:$0xff] %vm286_vm2, %v4485_v35  ;;  %v4986_v43 = vadd.f32 %v4864_v41, %v4628_v36 }
 0x2e7   : > { %v3262_v1 = vpop.f32.mrf.mxu1  ;;  %v5084_v21 = vld [vmem:[#allocation2 + $0x50] sm:$0xff]  ;;  %3553 = vst.msk [vmem:[#allocation3 + $0x150] sm:$0xff] %vm432_vm1, %v3499_v31 }
 0x2e8   : > { %v3376_v7 = vadd.f32 %v3262_v1, %v3018_v9  ;;  %v5132_v5 = vmul.f32 0.16666667, %v5084_v21  ;;  %5034 = vst.msk [vmem:[#allocation2 + $0x58] sm:$0xff] %vm286_vm2, %v4986_v43  ;;  %5850 = vmatmul.msk.f32.gmra.mxu0 %vm432_vm1, %v4597_v25  ;;  %v3024_v43 = vld [vmem:[#allocation2 + $0xa8] sm:$0xff] }
 0x2e9   : > { %v3627_v8 = vld [vmem:[#allocation2 + $0x70] sm:$0xff] }
 0x2ea   : > { %3424 = vst.msk [vmem:[#allocation2 + $0x78] sm:$0xff] %vm286_vm2, %v3376_v7  ;;  %v3985_v10 = vadd.f32 %v3869_v63, %v3627_v8  ;;  %5703 = vmatmul.msk.f32.gmra.mxu1 %vm432_vm1, %v2986_v2  ;;  %v5184_v48 = vadd.f32 %v7139_v52, %v5132_v5  ;;  %v4368_v49 = vpop.f32.mrf.mxu3  ;;  %v2992_v5 = vld [vmem:[#allocation3 + $0x158] sm:$0xff] }
 0x2eb   : > { %5753 = vmatmul.msk.f32.gmra.mxu2 %vm432_vm1, %v4594_v6  ;;  %v4128_v47 = vld [vmem:[#allocation2 + $0x68] sm:$0xff] }
 0x2ec   : > { %4033 = vst.msk [vmem:[#allocation2 + $0x70] sm:$0xff] %vm286_vm2, %v3985_v10  ;;  %v4486_v51 = vadd.f32 %v4368_v49, %v4128_v47  ;;  %5803 = vmatmul.msk.f32.gmra.mxu3 %vm432_vm1, %v4597_v25  ;;  %v3500_v47 = vld [vmem:[%s5997_s29 + $0x15a] sm:$0xff]  ;;  %v4600_v49 = vld [vmem:[#allocation3 + $0x128] sm:$0xff] }
 0x2ed   : > { %5232 = vst.msk [vmem:[%s7151_s19 + $0x50] sm:$0xff] %vm286_vm2, %v5184_v48  ;;  %v4629_v50 = vld [vmem:[#allocation2 + $0x60] sm:$0xff]  ;;  %v4870_v13 = vpop.f32.mrf.mxu0 }
 0x2ee   : > { %v3872_v18 = vpop.f32.mrf.mxu2  ;;  %4534 = vst.msk [vmem:[#allocation2 + $0x68] sm:$0xff] %vm286_vm2, %v4486_v51  ;;  %v4987_v9 = vadd.f32 %v4867_v60, %v4629_v50 }
 0x2ef   : > { %v3265_v20 = vpop.f32.mrf.mxu1  ;;  %v5085_v0 = vld [vmem:[#allocation2 + $0x58] sm:$0xff]  ;;  %3554 = vst.msk [vmem:[#allocation3 + $0x158] sm:$0xff] %vm432_vm1, %v3500_v47 }
 0x2f0   : > { %v3377_v26 = vadd.f32 %v3265_v20, %v3019_v16  ;;  %v5133_v2 = vmul.f32 0.16666667, %v5085_v0  ;;  %5035 = vst.msk [vmem:[#allocation2 + $0x60] sm:$0xff] %vm286_vm2, %v4987_v9  ;;  %5851 = vmatmul.msk.f32.gmra.mxu0 %vm432_vm1, %v4598_v14  ;;  %v3025_v9 = vld [vmem:[#allocation2 + $0xb0] sm:$0xff] }
 0x2f1   : > { %v3628_v27 = vld [vmem:[#allocation2 + $0x78] sm:$0xff] }
 0x2f2   : > { %3425 = vst.msk [vmem:[#allocation2 + $0x80] sm:$0xff] %vm286_vm2, %v3377_v26  ;;  %v3986_v17 = vadd.f32 %v3872_v18, %v3628_v27  ;;  %5704 = vmatmul.msk.f32.gmra.mxu1 %vm432_vm1, %v2987_v22  ;;  %v5185_v4 = vadd.f32 %v7139_v52, %v5133_v2  ;;  %v4371_v6 = vpop.f32.mrf.mxu3  ;;  %v2993_v2 = vld [vmem:[#allocation3 + $0x160] sm:$0xff] }
 0x2f3   : > { %5754 = vmatmul.msk.f32.gmra.mxu2 %vm432_vm1, %v4595_v33  ;;  %v4129_v3 = vld [vmem:[#allocation2 + $0x70] sm:$0xff] }
 0x2f4   : > { %4034 = vst.msk [vmem:[#allocation2 + $0x78] sm:$0xff] %vm286_vm2, %v3986_v17  ;;  %v4487_v7 = vadd.f32 %v4371_v6, %v4129_v3  ;;  %5804 = vmatmul.msk.f32.gmra.mxu3 %vm432_vm1, %v4598_v14  ;;  %v3501_v3 = vld [vmem:[%s5997_s29 + $0x162] sm:$0xff]  ;;  %v4601_v6 = vld [vmem:[#allocation3 + $0x130] sm:$0xff] }
 0x2f5   : > { %5233 = vst.msk [vmem:[%s7151_s19 + $0x58] sm:$0xff] %vm286_vm2, %v5185_v4  ;;  %v4630_v29 = vld [vmem:[#allocation2 + $0x68] sm:$0xff]  ;;  %v4873_v32 = vpop.f32.mrf.mxu0 }
 0x2f6   : > { %v3875_v57 = vpop.f32.mrf.mxu2  ;;  %4535 = vst.msk [vmem:[#allocation2 + $0x70] sm:$0xff] %vm286_vm2, %v4487_v7  ;;  %v4988_v16 = vadd.f32 %v4870_v13, %v4630_v29 }
 0x2f7   : > { %v3268_v38 = vpop.f32.mrf.mxu1  ;;  %v5086_v19 = vld [vmem:[#allocation2 + $0x60] sm:$0xff]  ;;  %3555 = vst.msk [vmem:[#allocation3 + $0x160] sm:$0xff] %vm432_vm1, %v3501_v3 }
 0x2f8   : > { %v3378_v44 = vadd.f32 %v3268_v38, %v3020_v37  ;;  %v5134_v22 = vmul.f32 0.16666667, %v5086_v19  ;;  %5036 = vst.msk [vmem:[#allocation2 + $0x68] sm:$0xff] %vm286_vm2, %v4988_v16  ;;  %5852 = vmatmul.msk.f32.gmra.mxu0 %vm432_vm1, %v4599_v34  ;;  %v3026_v16 = vld [vmem:[#allocation2 + $0xb8] sm:$0xff]  ;;  %v7391_v3 = vld [vmem:[%s7642_s2] ss:$0 sm:$0xff] }
 0x2f9   : > { %v3629_v45 = vld [vmem:[#allocation2 + $0x80] sm:$0xff] }
 0x2fa   : > { %3426 = vst.msk [vmem:[#allocation2 + $0x88] sm:$0xff] %vm286_vm2, %v3378_v44  ;;  %v3987_v46 = vadd.f32 %v3875_v57, %v3629_v45  ;;  %5705 = vmatmul.msk.f32.gmra.mxu1 %vm432_vm1, %v2988_v39  ;;  %v5186_v24 = vadd.f32 %v7139_v52, %v5134_v22  ;;  %v4374_v33 = vpop.f32.mrf.mxu3  ;;  %v2994_v22 = vld [vmem:[#allocation3 + $0x168] sm:$0xff] }
 0x2fb   : > { %5755 = vmatmul.msk.f32.gmra.mxu2 %vm432_vm1, %v4596_v42  ;;  %v4130_v23 = vld [vmem:[#allocation2 + $0x78] sm:$0xff] }
 0x2fc   : > { %4035 = vst.msk [vmem:[#allocation2 + $0x80] sm:$0xff] %vm286_vm2, %v3987_v46  ;;  %v4488_v26 = vadd.f32 %v4374_v33, %v4130_v23  ;;  %5805 = vmatmul.msk.f32.gmra.mxu3 %vm432_vm1, %v4599_v34  ;;  %v3502_v23 = vld [vmem:[%s5997_s29 + $0x16a] sm:$0xff]  ;;  %v4602_v33 = vld [vmem:[#allocation3 + $0x138] sm:$0xff] }
 0x2fd   : > { %5234 = vst.msk [vmem:[%s7151_s19 + $0x60] sm:$0xff] %vm286_vm2, %v5186_v24  ;;  %v4631_v28 = vld [vmem:[#allocation2 + $0x70] sm:$0xff]  ;;  %v4876_v48 = vpop.f32.mrf.mxu0 }
 0x2fe   : > { %v3878_v54 = vpop.f32.mrf.mxu2  ;;  %4536 = vst.msk [vmem:[#allocation2 + $0x78] sm:$0xff] %vm286_vm2, %v4488_v26  ;;  %v4989_v37 = vadd.f32 %v4873_v32, %v4631_v28 }
 0x2ff   : > { %v3271_v56 = vpop.f32.mrf.mxu1  ;;  %v5087_v36 = vld [vmem:[#allocation2 + $0x68] sm:$0xff]  ;;  %3556 = vst.msk [vmem:[#allocation3 + $0x168] sm:$0xff] %vm432_vm1, %v3502_v23 }
 0x300   : > { %v3379_v61 = vadd.f32 %v3271_v56, %v3021_v53  ;;  %v5135_v39 = vmul.f32 0.16666667, %v5087_v36  ;;  %5037 = vst.msk [vmem:[#allocation2 + $0x70] sm:$0xff] %vm286_vm2, %v4989_v37  ;;  %5853 = vmatmul.msk.f32.gmra.mxu0 %vm432_vm1, %v4600_v49  ;;  %v3027_v37 = vld [vmem:[#allocation2 + $0xc0] sm:$0xff] }
 0x301   : > { %v3630_v63 = vld [vmem:[#allocation2 + $0x88] sm:$0xff] }
 0x302   : > { %3427 = vst.msk [vmem:[#allocation2 + $0x90] sm:$0xff] %vm286_vm2, %v3379_v61  ;;  %v3988_v1 = vadd.f32 %v3878_v54, %v3630_v63  ;;  %5706 = vmatmul.msk.f32.gmra.mxu1 %vm432_vm1, %v2989_v58  ;;  %v5187_v41 = vadd.f32 %v7139_v52, %v5135_v39  ;;  %v4377_v42 = vpop.f32.mrf.mxu3  ;;  %v2995_v39 = vld [vmem:[#allocation3 + $0x170] sm:$0xff] }
 0x303   : > { %5756 = vmatmul.msk.f32.gmra.mxu2 %vm432_vm1, %v4597_v25  ;;  %v4131_v40 = vld [vmem:[#allocation2 + $0x80] sm:$0xff] }
 0x304   : > { %4036 = vst.msk [vmem:[#allocation2 + $0x88] sm:$0xff] %vm286_vm2, %v3988_v1  ;;  %v4489_v44 = vadd.f32 %v4377_v42, %v4131_v40  ;;  %5806 = vmatmul.msk.f32.gmra.mxu3 %vm432_vm1, %v4600_v49  ;;  %v3503_v40 = vld [vmem:[%s5997_s29 + $0x172] sm:$0xff]  ;;  %v4603_v42 = vld [vmem:[#allocation3 + $0x140] sm:$0xff] }
 0x305   : > { %5235 = vst.msk [vmem:[%s7151_s19 + $0x68] sm:$0xff] %vm286_vm2, %v5187_v41  ;;  %v4632_v21 = vld [vmem:[#allocation2 + $0x78] sm:$0xff]  ;;  %v4879_v4 = vpop.f32.mrf.mxu0 }
 0x306   : > { %v3881_v8 = vpop.f32.mrf.mxu2  ;;  %4537 = vst.msk [vmem:[#allocation2 + $0x80] sm:$0xff] %vm286_vm2, %v4489_v44  ;;  %v4990_v53 = vadd.f32 %v4876_v48, %v4632_v21 }
 0x307   : > { %v3274_v10 = vpop.f32.mrf.mxu1  ;;  %v5088_v50 = vld [vmem:[#allocation2 + $0x70] sm:$0xff]  ;;  %3557 = vst.msk [vmem:[#allocation3 + $0x170] sm:$0xff] %vm432_vm1, %v3503_v40 }
 0x308   : > { %v3380_v15 = vadd.f32 %v3274_v10, %v3022_v55  ;;  %v5136_v58 = vmul.f32 0.16666667, %v5088_v50  ;;  %5038 = vst.msk [vmem:[#allocation2 + $0x78] sm:$0xff] %vm286_vm2, %v4990_v53  ;;  %5854 = vmatmul.msk.f32.gmra.mxu0 %vm432_vm1, %v4601_v6  ;;  %v3028_v53 = vld [vmem:[#allocation2 + $0xc8] sm:$0xff] }
 0x309   : > { %v3631_v18 = vld [vmem:[#allocation2 + $0x90] sm:$0xff] }
 0x30a   : > { %3428 = vst.msk [vmem:[#allocation2 + $0x98] sm:$0xff] %vm286_vm2, %v3380_v15  ;;  %v3989_v20 = vadd.f32 %v3881_v8, %v3631_v18  ;;  %5707 = vmatmul.msk.f32.gmra.mxu1 %vm432_vm1, %v2990_v11  ;;  %v5188_v60 = vadd.f32 %v7139_v52, %v5136_v58  ;;  %v4380_v25 = vpop.f32.mrf.mxu3  ;;  %v2996_v58 = vld [vmem:[#allocation3 + $0x178] sm:$0xff] }
 0x30b   : > { %5757 = vmatmul.msk.f32.gmra.mxu2 %vm432_vm1, %v4598_v14  ;;  %v4132_v59 = vld [vmem:[#allocation2 + $0x88] sm:$0xff] }
 0x30c   : > { %4037 = vst.msk [vmem:[#allocation2 + $0x90] sm:$0xff] %vm286_vm2, %v3989_v20  ;;  %v4490_v61 = vadd.f32 %v4380_v25, %v4132_v59  ;;  %5807 = vmatmul.msk.f32.gmra.mxu3 %vm432_vm1, %v4601_v6  ;;  %v3504_v59 = vld [vmem:[%s5997_s29 + $0x17a] sm:$0xff]  ;;  %v4604_v25 = vld [vmem:[#allocation3 + $0x148] sm:$0xff] }
 0x30d   : > { %5236 = vst.msk [vmem:[%s7151_s19 + $0x70] sm:$0xff] %vm286_vm2, %v5188_v60  ;;  %v4633_v0 = vld [vmem:[#allocation2 + $0x80] sm:$0xff]  ;;  %v4882_v24 = vpop.f32.mrf.mxu0 }
 0x30e   : > { %v3884_v27 = vpop.f32.mrf.mxu2  ;;  %4538 = vst.msk [vmem:[#allocation2 + $0x88] sm:$0xff] %vm286_vm2, %v4490_v61  ;;  %v4991_v55 = vadd.f32 %v4879_v4, %v4633_v0 }
 0x30f   : > { %v3277_v17 = vpop.f32.mrf.mxu1  ;;  %v5089_v29 = vld [vmem:[#allocation2 + $0x78] sm:$0xff]  ;;  %3558 = vst.msk [vmem:[#allocation3 + $0x178] sm:$0xff] %vm432_vm1, %v3504_v59 }
 0x310   : > { %v3381_v35 = vadd.f32 %v3277_v17, %v3023_v62  ;;  %v5137_v11 = vmul.f32 0.16666667, %v5089_v29  ;;  %5039 = vst.msk [vmem:[#allocation2 + $0x80] sm:$0xff] %vm286_vm2, %v4991_v55  ;;  %5855 = vmatmul.msk.f32.gmra.mxu0 %vm432_vm1, %v4602_v33  ;;  %v3029_v55 = vld [vmem:[#allocation2 + $0xd0] sm:$0xff] }
 0x311   : > { %v3632_v57 = vld [vmem:[#allocation2 + $0x98] sm:$0xff] }
 0x312   : > { %3429 = vst.msk [vmem:[#allocation2 + $0xa0] sm:$0xff] %vm286_vm2, %v3381_v35  ;;  %v3990_v38 = vadd.f32 %v3884_v27, %v3632_v57  ;;  %5708 = vmatmul.msk.f32.gmra.mxu1 %vm432_vm1, %v2991_v30  ;;  %v5189_v13 = vadd.f32 %v7139_v52, %v5137_v11  ;;  %v4383_v14 = vpop.f32.mrf.mxu3  ;;  %v2997_v11 = vld [vmem:[#allocation3 + $0x180] sm:$0xff] }
 0x313   : > { %5758 = vmatmul.msk.f32.gmra.mxu2 %vm432_vm1, %v4599_v34  ;;  %v4133_v12 = vld [vmem:[#allocation2 + $0x90] sm:$0xff] }
 0x314   : > { %4038 = vst.msk [vmem:[#allocation2 + $0x98] sm:$0xff] %vm286_vm2, %v3990_v38  ;;  %v4491_v15 = vadd.f32 %v4383_v14, %v4133_v12  ;;  %5808 = vmatmul.msk.f32.gmra.mxu3 %vm432_vm1, %v4602_v33  ;;  %v3505_v12 = vld [vmem:[%s5997_s29 + $0x182] sm:$0xff]  ;;  %v4605_v14 = vld [vmem:[#allocation3 + $0x150] sm:$0xff] }
 0x315   : > { %5237 = vst.msk [vmem:[%s7151_s19 + $0x78] sm:$0xff] %vm286_vm2, %v5189_v13  ;;  %v4634_v19 = vld [vmem:[#allocation2 + $0x88] sm:$0xff]  ;;  %v4885_v41 = vpop.f32.mrf.mxu0 }
 0x316   : > { %v3887_v45 = vpop.f32.mrf.mxu2  ;;  %4539 = vst.msk [vmem:[#allocation2 + $0x90] sm:$0xff] %vm286_vm2, %v4491_v15  ;;  %v4992_v62 = vadd.f32 %v4882_v24, %v4634_v19  ;;  %v1894_v24 = vld [vmem:[%s5997_s29 + $0x199] sm:$0xff] }
 0x317   : > { %v3280_v46 = vpop.f32.mrf.mxu1  ;;  %v5090_v28 = vld [vmem:[#allocation2 + $0x80] sm:$0xff]  ;;  %3559 = vst.msk [vmem:[#allocation3 + $0x180] sm:$0xff] %vm432_vm1, %v3505_v12 }
 0x318   : > { %v3382_v51 = vadd.f32 %v3280_v46, %v3024_v43  ;;  %v5138_v30 = vmul.f32 0.16666667, %v5090_v28  ;;  %5040 = vst.msk [vmem:[#allocation2 + $0x88] sm:$0xff] %vm286_vm2, %v4992_v62  ;;  %5856 = vmatmul.msk.f32.gmra.mxu0 %vm432_vm1, %v4603_v42 }
 0x319   : > { %v3633_v54 = vld [vmem:[#allocation2 + $0xa0] sm:$0xff]  ;;  %1948 = vst.msk [vmem:[#allocation3 + $0x198] sm:$0xff] %vm432_vm1, %v1894_v24 }
 0x31a   : > { %3430 = vst.msk [vmem:[#allocation2 + $0xa8] sm:$0xff] %vm286_vm2, %v3382_v51  ;;  %v3991_v56 = vadd.f32 %v3887_v45, %v3633_v54  ;;  %5709 = vmatmul.msk.f32.gmra.mxu1 %vm432_vm1, %v2992_v5  ;;  %v5190_v32 = vadd.f32 %v7139_v52, %v5138_v30  ;;  %v4386_v34 = vpop.f32.mrf.mxu3 }
 0x31b   : > { %5759 = vmatmul.msk.f32.gmra.mxu2 %vm432_vm1, %v4600_v49  ;;  %v4134_v31 = vld [vmem:[#allocation2 + $0x98] sm:$0xff] }
 0x31c   : > { %4039 = vst.msk [vmem:[#allocation2 + $0xa0] sm:$0xff] %vm286_vm2, %v3991_v56  ;;  %v4492_v35 = vadd.f32 %v4386_v34, %v4134_v31  ;;  %5809 = vmatmul.msk.f32.gmra.mxu3 %vm432_vm1, %v4603_v42  ;;  %v2998_v31 = vld [vmem:[#allocation3 + $0x188] sm:$0xff] }
 0x31d   : > { %5238 = vst.msk [vmem:[%s7151_s19 + $0x80] sm:$0xff] %vm286_vm2, %v5190_v32  ;;  %v4635_v36 = vld [vmem:[#allocation2 + $0x90] sm:$0xff]  ;;  %v4888_v60 = vpop.f32.mrf.mxu0 }
 0x31e   : > { %v3890_v63 = vpop.f32.mrf.mxu2  ;;  %4540 = vst.msk [vmem:[#allocation2 + $0x98] sm:$0xff] %vm286_vm2, %v4492_v35  ;;  %v4993_v43 = vadd.f32 %v4885_v41, %v4635_v36  ;;  %v3506_v32 = vld [vmem:[%s5997_s29 + $0x18a] sm:$0xff]  ;;  %v4606_v35 = vld [vmem:[#allocation3 + $0x158] sm:$0xff] }
 0x31f   : > { %v3283_v1 = vpop.f32.mrf.mxu1  ;;  %v5091_v21 = vld [vmem:[#allocation2 + $0x88] sm:$0xff]  ;;  %3560 = vst.msk [vmem:[#allocation3 + $0x188] sm:$0xff] %vm432_vm1, %v3506_v32 }
 0x320   : > { %v3383_v7 = vadd.f32 %v3283_v1, %v3025_v9  ;;  %v5139_v5 = vmul.f32 0.16666667, %v5091_v21  ;;  %5041 = vst.msk [vmem:[#allocation2 + $0x90] sm:$0xff] %vm286_vm2, %v4993_v43  ;;  %5857 = vmatmul.msk.f32.gmra.mxu0 %vm432_vm1, %v4604_v25  ;;  %v3031_v21 = vld [vmem:[#allocation2 + $0xe0] sm:$0xff] }
 0x321   : > { %v3634_v8 = vld [vmem:[#allocation2 + $0xa8] sm:$0xff] }
 0x322   : > { %3431 = vst.msk [vmem:[#allocation2 + $0xb0] sm:$0xff] %vm286_vm2, %v3383_v7  ;;  %v3992_v10 = vadd.f32 %v3890_v63, %v3634_v8  ;;  %5710 = vmatmul.msk.f32.gmra.mxu1 %vm432_vm1, %v2993_v2  ;;  %v5191_v48 = vadd.f32 %v7139_v52, %v5139_v5  ;;  %v4389_v49 = vpop.f32.mrf.mxu3 }
 0x323   : > { %5760 = vmatmul.msk.f32.gmra.mxu2 %vm432_vm1, %v4601_v6  ;;  %v4135_v47 = vld [vmem:[#allocation2 + $0xa0] sm:$0xff] }
 0x324   : > { %4040 = vst.msk [vmem:[#allocation2 + $0xa8] sm:$0xff] %vm286_vm2, %v3992_v10  ;;  %v4493_v51 = vadd.f32 %v4389_v49, %v4135_v47  ;;  %5810 = vmatmul.msk.f32.gmra.mxu3 %vm432_vm1, %v4604_v25  ;;  %v3507_v49 = vld [vmem:[%s5997_s29 + $0x192] sm:$0xff] }
 0x325   : > { %5239 = vst.msk [vmem:[%s7151_s19 + $0x88] sm:$0xff] %vm286_vm2, %v5191_v48  ;;  %v4636_v50 = vld [vmem:[#allocation2 + $0x98] sm:$0xff]  ;;  %v4891_v13 = vpop.f32.mrf.mxu0  ;;  %v2999_v48 = vld [vmem:[#allocation3 + $0x190] sm:$0xff] }
 0x326   : > { %v3893_v18 = vpop.f32.mrf.mxu2  ;;  %4541 = vst.msk [vmem:[#allocation2 + $0xa0] sm:$0xff] %vm286_vm2, %v4493_v51  ;;  %v4994_v9 = vadd.f32 %v4888_v60, %v4636_v50 }
 0x327   : > { %v3286_v20 = vpop.f32.mrf.mxu1  ;;  %v5092_v52 = vld [vmem:[#allocation2 + $0x90] sm:$0xff]  ;;  %3561 = vst.msk [vmem:[#allocation3 + $0x190] sm:$0xff] %vm432_vm1, %v3507_v49 }
 0x328   : > { %v3384_v26 = vadd.f32 %v3286_v20, %v3026_v16  ;;  %v5140_v1 = vmul.f32 0.16666667, %v5092_v52  ;;  %5042 = vst.msk [vmem:[#allocation2 + $0x98] sm:$0xff] %vm286_vm2, %v4994_v9  ;;  %5858 = vmatmul.msk.f32.gmra.mxu0 %vm432_vm1, %v4605_v14 }
 0x329   : > { %v3635_v27 = vld [vmem:[#allocation2 + $0xb0] sm:$0xff] }
 0x32a   : > { %3432 = vst.msk [vmem:[#allocation2 + $0xb8] sm:$0xff] %vm286_vm2, %v3384_v26  ;;  %v3993_v17 = vadd.f32 %v3893_v18, %v3635_v27  ;;  %5711 = vmatmul.msk.f32.gmra.mxu1 %vm432_vm1, %v2994_v22  ;;  %v5192_v4 = vadd.f32 %v7391_v3, %v5140_v1  ;;  %v4392_v6 = vpop.f32.mrf.mxu3  ;;  %v3030_v27 = vld [vmem:[#allocation2 + $0xd8] sm:$0xff] }
 0x32b   : > { %5761 = vmatmul.msk.f32.gmra.mxu2 %vm432_vm1, %v4602_v33  ;;  %v4136_v2 = vld [vmem:[#allocation2 + $0xa8] sm:$0xff] }
 0x32c   : > { %4041 = vst.msk [vmem:[#allocation2 + $0xb0] sm:$0xff] %vm286_vm2, %v3993_v17  ;;  %v4494_v7 = vadd.f32 %v4392_v6, %v4136_v2  ;;  %5811 = vmatmul.msk.f32.gmra.mxu3 %vm432_vm1, %v4605_v14  ;;  %v3000_v6 = vld [vmem:[#allocation3 + $0x198] sm:$0xff] }
 0x32d   : > { %5240 = vst.msk [vmem:[%s7151_s19 + $0x90] sm:$0xff] %vm286_vm2, %v5192_v4  ;;  %v4637_v29 = vld [vmem:[#allocation2 + $0xa0] sm:$0xff]  ;;  %v4894_v34 = vpop.f32.mrf.mxu0 }
 0x32e   : > { %v3896_v57 = vpop.f32.mrf.mxu2  ;;  %4542 = vst.msk [vmem:[#allocation2 + $0xa8] sm:$0xff] %vm286_vm2, %v4494_v7  ;;  %v4995_v16 = vadd.f32 %v4891_v13, %v4637_v29  ;;  %v3508_v7 = vld [vmem:[%s5997_s29 + $0x19a] sm:$0xff] }
 0x32f   : > { %v3289_v38 = vpop.f32.mrf.mxu1  ;;  %v5093_v19 = vld [vmem:[#allocation2 + $0x98] sm:$0xff]  ;;  %3562 = vst.msk [vmem:[#allocation3 + $0x198] sm:$0xff] %vm432_vm1, %v3508_v7 }
 0x330   : > { %v3385_v44 = vadd.f32 %v3289_v38, %v3027_v37  ;;  %v5141_v22 = vmul.f32 0.16666667, %v5093_v19  ;;  %5043 = vst.msk [vmem:[#allocation2 + $0xa0] sm:$0xff] %vm286_vm2, %v4995_v16  ;;  %5859 = vmatmul.msk.f32.gmra.mxu0 %vm432_vm1, %v4606_v35 }
 0x331   : > { %v3636_v45 = vld [vmem:[#allocation2 + $0xb8] sm:$0xff] }
 0x332   : > { %3433 = vst.msk [vmem:[#allocation2 + $0xc0] sm:$0xff] %vm286_vm2, %v3385_v44  ;;  %v3994_v46 = vadd.f32 %v3896_v57, %v3636_v45  ;;  %5712 = vmatmul.msk.f32.gmra.mxu1 %vm432_vm1, %v2995_v39  ;;  %v5193_v33 = vadd.f32 %v7391_v3, %v5141_v22  ;;  %v4395_v26 = vpop.f32.mrf.mxu3 }
 0x333   : > { %5762 = vmatmul.msk.f32.gmra.mxu2 %vm432_vm1, %v4603_v42  ;;  %v4137_v23 = vld [vmem:[#allocation2 + $0xb0] sm:$0xff]  ;;  %v1895_v42 = vld [vmem:[%s5997_s29 + $0x1a1] sm:$0xff] }
 0x334   : > { %4042 = vst.msk [vmem:[#allocation2 + $0xb8] sm:$0xff] %vm286_vm2, %v3994_v46  ;;  %v4495_v62 = vadd.f32 %v4395_v26, %v4137_v23  ;;  %5812 = vmatmul.msk.f32.gmra.mxu3 %vm432_vm1, %v4606_v35  ;;  %v3509_v26 = vld [vmem:[%s5997_s29 + $0x1a2] sm:$0xff] }
 0x335   : > { %5241 = vst.msk [vmem:[%s7151_s19 + $0x98] sm:$0xff] %vm286_vm2, %v5193_v33  ;;  %v4638_v17 = vld [vmem:[#allocation2 + $0xa8] sm:$0xff]  ;;  %v4897_v51 = vpop.f32.mrf.mxu0 }
 0x336   : > { %v3899_v54 = vpop.f32.mrf.mxu2  ;;  %4543 = vst.msk [vmem:[#allocation2 + $0xb0] sm:$0xff] %vm286_vm2, %v4495_v62  ;;  %v4996_v57 = vadd.f32 %v4894_v34, %v4638_v17 }
 0x337   : > { %v3292_v56 = vpop.f32.mrf.mxu1  ;;  %v5094_v38 = vld [vmem:[#allocation2 + $0xa0] sm:$0xff]  ;;  %1949 = vst.msk [vmem:[#allocation3 + $0x1a0] sm:$0xff] %vm432_vm1, %v1895_v42 }
 0x338   : > { %v3386_v61 = vadd.f32 %v3292_v56, %v3028_v53  ;;  %v5142_v40 = vmul.f32 0.16666667, %v5094_v38  ;;  %5044 = vst.msk [vmem:[#allocation2 + $0xa8] sm:$0xff] %vm286_vm2, %v4996_v57  ;;  %v4607_v53 = vld [vmem:[#allocation3 + $0x160] sm:$0xff]  ;;  %v3034_v38 = vld [vmem:[#allocation2 + $0xf8] sm:$0xff] }
 0x339   : > { %v3637_v63 = vld [vmem:[#allocation2 + $0xc0] sm:$0xff]  ;;  %5860 = vmatmul.msk.f32.gmra.mxu0 %vm432_vm1, %v4607_v53 }
 0x33a   : > { %3434 = vst.msk [vmem:[#allocation2 + $0xc8] sm:$0xff] %vm286_vm2, %v3386_v61  ;;  %v3995_v0 = vadd.f32 %v3899_v54, %v3637_v63  ;;  %5713 = vmatmul.msk.f32.gmra.mxu1 %vm432_vm1, %v2996_v58  ;;  %v5194_v44 = vadd.f32 %v7391_v3, %v5142_v40  ;;  %v4398_v43 = vpop.f32.mrf.mxu3  ;;  %v1896_v61 = vld [vmem:[%s5997_s29 + $0x1a9] sm:$0xff] }
 0x33b   : > { %5763 = vmatmul.msk.f32.gmra.mxu2 %vm432_vm1, %v4604_v25  ;;  %v4138_v41 = vld [vmem:[#allocation2 + $0xb8] sm:$0xff]  ;;  %1950 = vst.msk [vmem:[#allocation3 + $0x1a8] sm:$0xff] %vm432_vm1, %v1896_v61  ;;  %v4611_v61 = vld [vmem:[#allocation3 + $0x180] sm:$0xff] }
 0x33c   : > { %4043 = vst.msk [vmem:[#allocation2 + $0xc0] sm:$0xff] %vm286_vm2, %v3995_v0  ;;  %v4496_v45 = vadd.f32 %v4398_v43, %v4138_v41  ;;  %v3032_v0 = vld [vmem:[#allocation2 + $0xe8] sm:$0xff]  ;;  %5813 = vmatmul.msk.f32.gmra.mxu3 %vm432_vm1, %v4607_v53 }
 0x33d   : > { %5242 = vst.msk [vmem:[%s7151_s19 + $0xa0] sm:$0xff] %vm286_vm2, %v5194_v44  ;;  %v4639_v5 = vld [vmem:[#allocation2 + $0xb0] sm:$0xff] }
 0x33e   : > { %v3902_v8 = vpop.f32.mrf.mxu2  ;;  %4544 = vst.msk [vmem:[#allocation2 + $0xb8] sm:$0xff] %vm286_vm2, %v4496_v45  ;;  %v4997_v50 = vadd.f32 %v4897_v51, %v4639_v5  ;;  %v3001_v33 = vld [vmem:[#allocation3 + $0x1a0] sm:$0xff]  ;;  %v3510_v44 = vld [vmem:[%s5997_s29 + $0x1aa] sm:$0xff]  ;;  %v4610_v45 = vld [vmem:[#allocation3 + $0x178] sm:$0xff] }
 0x33f   : > { %v3295_v10 = vpop.f32.mrf.mxu1  ;;  %v5095_v58 = vld [vmem:[#allocation2 + $0xa8] sm:$0xff]  ;;  %3563 = vst.msk [vmem:[#allocation3 + $0x1a0] sm:$0xff] %vm432_vm1, %v3509_v26 }
 0x340   : > { %v3387_v15 = vadd.f32 %v3295_v10, %v3029_v55  ;;  %v5143_v60 = vmul.f32 0.16666667, %v5095_v58  ;;  %5045 = vst.msk [vmem:[#allocation2 + $0xb0] sm:$0xff] %vm286_vm2, %v4997_v50  ;;  %v4900_v55 = vpop.f32.mrf.mxu0 }
 0x341   : > { %v3638_v18 = vld [vmem:[#allocation2 + $0xc8] sm:$0xff] }
 0x342   : > { %3435 = vst.msk [vmem:[#allocation2 + $0xd0] sm:$0xff] %vm286_vm2, %v3387_v15  ;;  %v3996_v20 = vadd.f32 %v3902_v8, %v3638_v18  ;;  %5714 = vmatmul.msk.f32.gmra.mxu1 %vm432_vm1, %v2997_v11  ;;  %v5195_v9 = vadd.f32 %v7391_v3, %v5143_v60  ;;  %v4401_v63 = vpop.f32.mrf.mxu3  ;;  %v4608_v8 = vld [vmem:[#allocation3 + $0x168] sm:$0xff] }
 0x343   : > { %5764 = vmatmul.msk.f32.gmra.mxu2 %vm432_vm1, %v4605_v14  ;;  %v4139_v25 = vld [vmem:[#allocation2 + $0xc0] sm:$0xff]  ;;  %5861 = vmatmul.msk.f32.gmra.mxu0 %vm432_vm1, %v4608_v8  ;;  %v3002_v42 = vld [vmem:[#allocation3 + $0x1a8] sm:$0xff] }
 0x344   : > { %4044 = vst.msk [vmem:[#allocation2 + $0xc8] sm:$0xff] %vm286_vm2, %v3996_v20  ;;  %v4497_v52 = vadd.f32 %v4401_v63, %v4139_v25  ;;  %v3033_v20 = vld [vmem:[#allocation2 + $0xf0] sm:$0xff]  ;;  %5814 = vmatmul.msk.f32.gmra.mxu3 %vm432_vm1, %v4608_v8 }
 0x345   : > { %5243 = vst.msk [vmem:[%s7151_s19 + $0xa8] sm:$0xff] %vm286_vm2, %v5195_v9  ;;  %v4640_v2 = vld [vmem:[#allocation2 + $0xb8] sm:$0xff] }
 0x346   : > { %v3905_v28 = vpop.f32.mrf.mxu2  ;;  %4545 = vst.msk [vmem:[#allocation2 + $0xc0] sm:$0xff] %vm286_vm2, %v4497_v52  ;;  %v4998_v10 = vadd.f32 %v4900_v55, %v4640_v2 }
 0x347   : > { %v3298_v30 = vpop.f32.mrf.mxu1  ;;  %v5096_v12 = vld [vmem:[#allocation2 + $0xb0] sm:$0xff]  ;;  %3564 = vst.msk [vmem:[#allocation3 + $0x1a8] sm:$0xff] %vm432_vm1, %v3510_v44  ;;  %v3038_v44 = vld [vmem:[#allocation2 + $0x118] sm:$0xff] }
 0x348   : > { %v3388_v37 = vadd.f32 %v3298_v30, %v3030_v27  ;;  %v5144_v14 = vmul.f32 0.16666667, %v5096_v12  ;;  %5046 = vst.msk [vmem:[#allocation2 + $0xb8] sm:$0xff] %vm286_vm2, %v4998_v10  ;;  %v4903_v62 = vpop.f32.mrf.mxu0  ;;  %v4609_v27 = vld [vmem:[#allocation3 + $0x170] sm:$0xff]  ;;  %v3036_v10 = vld [vmem:[#allocation2 + $0x108] sm:$0xff] }
 0x349   : > { %v3639_v36 = vld [vmem:[#allocation2 + $0xd0] sm:$0xff] }
 0x34a   : > { %3436 = vst.msk [vmem:[#allocation2 + $0xd8] sm:$0xff] %vm286_vm2, %v3388_v37  ;;  %v3997_v39 = vadd.f32 %v3905_v28, %v3639_v36  ;;  %5715 = vmatmul.msk.f32.gmra.mxu1 %vm432_vm1, %v2998_v31  ;;  %v5196_v16 = vadd.f32 %v7391_v3, %v5144_v14  ;;  %v4404_v18 = vpop.f32.mrf.mxu3 }
 0x34b   : > { %5765 = vmatmul.msk.f32.gmra.mxu2 %vm432_vm1, %v4606_v35  ;;  %v4140_v15 = vld [vmem:[#allocation2 + $0xc8] sm:$0xff]  ;;  %5862 = vmatmul.msk.f32.gmra.mxu0 %vm432_vm1, %v4609_v27 }
 0x34c   : > { %4045 = vst.msk [vmem:[#allocation2 + $0xd0] sm:$0xff] %vm286_vm2, %v3997_v39  ;;  %v4498_v19 = vadd.f32 %v4404_v18, %v4140_v15  ;;  %5815 = vmatmul.msk.f32.gmra.mxu3 %vm432_vm1, %v4609_v27 }
 0x34d   : > { %5244 = vst.msk [vmem:[%s7151_s19 + $0xb0] sm:$0xff] %vm286_vm2, %v5196_v16  ;;  %v4641_v23 = vld [vmem:[#allocation2 + $0xc0] sm:$0xff] }
 0x34e   : > { %v3908_v46 = vpop.f32.mrf.mxu2  ;;  %4546 = vst.msk [vmem:[#allocation2 + $0xc8] sm:$0xff] %vm286_vm2, %v4498_v19  ;;  %v4999_v17 = vadd.f32 %v4903_v62, %v4641_v23 }
 0x34f   : > { %v3301_v47 = vpop.f32.mrf.mxu1  ;;  %v5097_v31 = vld [vmem:[#allocation2 + $0xb8] sm:$0xff] }
 0x350   : > { %v3389_v54 = vadd.f32 %v3301_v47, %v3031_v21  ;;  %v5145_v34 = vmul.f32 0.16666667, %v5097_v31  ;;  %5047 = vst.msk [vmem:[#allocation2 + $0xc0] sm:$0xff] %vm286_vm2, %v4999_v17  ;;  %v4906_v43 = vpop.f32.mrf.mxu0 }
 0x351   : > { %v3640_v56 = vld [vmem:[#allocation2 + $0xd8] sm:$0xff] }
 0x352   : > { %3437 = vst.msk [vmem:[#allocation2 + $0xe0] sm:$0xff] %vm286_vm2, %v3389_v54  ;;  %v3998_v59 = vadd.f32 %v3908_v46, %v3640_v56  ;;  %5716 = vmatmul.msk.f32.gmra.mxu1 %vm432_vm1, %v2999_v48  ;;  %v5197_v37 = vadd.f32 %v7391_v3, %v5145_v34  ;;  %v4407_v57 = vpop.f32.mrf.mxu3 }
 0x353   : > { %5766 = vmatmul.msk.f32.gmra.mxu2 %vm432_vm1, %v4607_v53  ;;  %v4141_v35 = vld [vmem:[#allocation2 + $0xd0] sm:$0xff]  ;;  %5863 = vmatmul.msk.f32.gmra.mxu0 %vm432_vm1, %v4610_v45 }
 0x354   : > { %4046 = vst.msk [vmem:[#allocation2 + $0xd8] sm:$0xff] %vm286_vm2, %v3998_v59  ;;  %v4499_v36 = vadd.f32 %v4407_v57, %v4141_v35  ;;  %v3035_v59 = vld [vmem:[#allocation2 + $0x100] sm:$0xff]  ;;  %5816 = vmatmul.msk.f32.gmra.mxu3 %vm432_vm1, %v4610_v45 }
 0x355   : > { %5245 = vst.msk [vmem:[%s7151_s19 + $0xb8] sm:$0xff] %vm286_vm2, %v5197_v37  ;;  %v4642_v40 = vld [vmem:[#allocation2 + $0xc8] sm:$0xff] }
 0x356   : > { %v3911_v1 = vpop.f32.mrf.mxu2  ;;  %4547 = vst.msk [vmem:[#allocation2 + $0xd0] sm:$0xff] %vm286_vm2, %v4499_v36  ;;  %v5000_v46 = vadd.f32 %v4906_v43, %v4642_v40 }
 0x357   : > { %v3304_v4 = vpop.f32.mrf.mxu1  ;;  %v5098_v47 = vld [vmem:[#allocation2 + $0xc0] sm:$0xff] }
 0x358   : > { %v3390_v29 = vadd.f32 %v3304_v4, %v3032_v0  ;;  %v5146_v49 = vmul.f32 0.16666667, %v5098_v47  ;;  %5048 = vst.msk [vmem:[#allocation2 + $0xc8] sm:$0xff] %vm286_vm2, %v5000_v46  ;;  %v4909_v25 = vpop.f32.mrf.mxu0 }
 0x359   : > { %v3641_v11 = vld [vmem:[#allocation2 + $0xe0] sm:$0xff] }
 0x35a   : > { %3438 = vst.msk [vmem:[#allocation2 + $0xe8] sm:$0xff] %vm286_vm2, %v3390_v29  ;;  %v3999_v13 = vadd.f32 %v3911_v1, %v3641_v11  ;;  %5717 = vmatmul.msk.f32.gmra.mxu1 %vm432_vm1, %v3000_v6  ;;  %v5198_v53 = vadd.f32 %v7391_v3, %v5146_v49  ;;  %v4410_v54 = vpop.f32.mrf.mxu3 }
 0x35b   : > { %5767 = vmatmul.msk.f32.gmra.mxu2 %vm432_vm1, %v4608_v8  ;;  %v4142_v51 = vld [vmem:[#allocation2 + $0xd8] sm:$0xff]  ;;  %5864 = vmatmul.msk.f32.gmra.mxu0 %vm432_vm1, %v4611_v61 }
 0x35c   : > { %4047 = vst.msk [vmem:[#allocation2 + $0xe0] sm:$0xff] %vm286_vm2, %v3999_v13  ;;  %v4500_v50 = vadd.f32 %v4410_v54, %v4142_v51  ;;  %v4612_v13 = vld [vmem:[#allocation3 + $0x188] sm:$0xff]  ;;  %5817 = vmatmul.msk.f32.gmra.mxu3 %vm432_vm1, %v4611_v61 }
 0x35d   : > { %5246 = vst.msk [vmem:[%s7151_s19 + $0xc0] sm:$0xff] %vm286_vm2, %v5198_v53  ;;  %v4643_v58 = vld [vmem:[#allocation2 + $0xd0] sm:$0xff] }
 0x35e   : > { %v3914_v22 = vpop.f32.mrf.mxu2  ;;  %4548 = vst.msk [vmem:[#allocation2 + $0xd8] sm:$0xff] %vm286_vm2, %v4500_v50  ;;  %v5001_v63 = vadd.f32 %v4909_v25, %v4643_v58 }
 0x35f   : > { %v3307_v24 = vpop.f32.mrf.mxu1  ;;  %v5099_v0 = vld [vmem:[#allocation2 + $0xc8] sm:$0xff] }
 0x360   : > { %v3391_v28 = vadd.f32 %v3307_v24, %v3033_v20  ;;  %v5147_v2 = vmul.f32 0.16666667, %v5099_v0  ;;  %5049 = vst.msk [vmem:[#allocation2 + $0xd0] sm:$0xff] %vm286_vm2, %v5001_v63  ;;  %v4912_v12 = vpop.f32.mrf.mxu0 }
 0x361   : > { %v3642_v30 = vld [vmem:[#allocation2 + $0xe8] sm:$0xff] }
 0x362   : > { %3439 = vst.msk [vmem:[#allocation2 + $0xf0] sm:$0xff] %vm286_vm2, %v3391_v28  ;;  %v4000_v32 = vadd.f32 %v3914_v22, %v3642_v30  ;;  %5718 = vmatmul.msk.f32.gmra.mxu1 %vm432_vm1, %v3001_v33  ;;  %v5199_v6 = vadd.f32 %v7391_v3, %v5147_v2  ;;  %v4413_v7 = vpop.f32.mrf.mxu3  ;;  %v4613_v30 = vld [vmem:[#allocation3 + $0x190] sm:$0xff] }
 0x363   : > { %5768 = vmatmul.msk.f32.gmra.mxu2 %vm432_vm1, %v4609_v27  ;;  %v4143_v4 = vld [vmem:[#allocation2 + $0xe0] sm:$0xff]  ;;  %5865 = vmatmul.msk.f32.gmra.mxu0 %vm432_vm1, %v4612_v13  ;;  %v3037_v27 = vld [vmem:[#allocation2 + $0x110] sm:$0xff] }
 0x364   : > { %4048 = vst.msk [vmem:[#allocation2 + $0xe8] sm:$0xff] %vm286_vm2, %v4000_v32  ;;  %v4501_v55 = vadd.f32 %v4413_v7, %v4143_v4  ;;  %5818 = vmatmul.msk.f32.gmra.mxu3 %vm432_vm1, %v4612_v13 }
 0x365   : > { %5247 = vst.msk [vmem:[%s7151_s19 + $0xc8] sm:$0xff] %vm286_vm2, %v5199_v6  ;;  %v4644_v29 = vld [vmem:[#allocation2 + $0xd8] sm:$0xff] }
 0x366   : > { %v3917_v39 = vpop.f32.mrf.mxu2  ;;  %4549 = vst.msk [vmem:[#allocation2 + $0xe0] sm:$0xff] %vm286_vm2, %v4501_v55  ;;  %v5002_v15 = vadd.f32 %v4912_v12, %v4644_v29 }
 0x367   : > { %v3310_v41 = vpop.f32.mrf.mxu1  ;;  %v5100_v18 = vld [vmem:[#allocation2 + $0xd0] sm:$0xff] }
 0x368   : > { %v3392_v21 = vadd.f32 %v3310_v41, %v3034_v38  ;;  %v5148_v20 = vmul.f32 0.16666667, %v5100_v18  ;;  %5050 = vst.msk [vmem:[#allocation2 + $0xd8] sm:$0xff] %vm286_vm2, %v5002_v15  ;;  %v4915_v17 = vpop.f32.mrf.mxu0 }
 0x369   : > { %v3643_v5 = vld [vmem:[#allocation2 + $0xf0] sm:$0xff] }
 0x36a   : > { %3440 = vst.msk [vmem:[#allocation2 + $0xf8] sm:$0xff] %vm286_vm2, %v3392_v21  ;;  %v4001_v48 = vadd.f32 %v3917_v39, %v3643_v5  ;;  %5719 = vmatmul.msk.f32.gmra.mxu1 %vm432_vm1, %v3002_v42  ;;  %v5200_v23 = vadd.f32 %v7391_v3, %v5148_v20  ;;  %v4416_v24 = vpop.f32.mrf.mxu3  ;;  %v4614_v21 = vld [vmem:[#allocation3 + $0x198] sm:$0xff] }
 0x36b   : > { %5769 = vmatmul.msk.f32.gmra.mxu2 %vm432_vm1, %v4610_v45  ;;  %v4144_v22 = vld [vmem:[#allocation2 + $0xe8] sm:$0xff]  ;;  %5866 = vmatmul.msk.f32.gmra.mxu0 %vm432_vm1, %v4613_v30 }
 0x36c   : > { %4049 = vst.msk [vmem:[#allocation2 + $0xf0] sm:$0xff] %vm286_vm2, %v4001_v48  ;;  %v4502_v33 = vadd.f32 %v4416_v24, %v4144_v22  ;;  %5819 = vmatmul.msk.f32.gmra.mxu3 %vm432_vm1, %v4613_v30 }
 0x36d   : > { %5248 = vst.msk [vmem:[%s7151_s19 + $0xd0] sm:$0xff] %vm286_vm2, %v5200_v23  ;;  %v4645_v62 = vld [vmem:[#allocation2 + $0xe0] sm:$0xff] }
 0x36e   : > { %v3920_v56 = vpop.f32.mrf.mxu2  ;;  %4550 = vst.msk [vmem:[#allocation2 + $0xe8] sm:$0xff] %vm286_vm2, %v4502_v33  ;;  %v5003_v32 = vadd.f32 %v4915_v17, %v4645_v62 }
 0x36f   : > { %v3313_v60 = vpop.f32.mrf.mxu1  ;;  %v5101_v35 = vld [vmem:[#allocation2 + $0xd8] sm:$0xff] }
 0x370   : > { %v3393_v9 = vadd.f32 %v3313_v60, %v3035_v59  ;;  %v5149_v57 = vmul.f32 0.16666667, %v5101_v35  ;;  %5051 = vst.msk [vmem:[#allocation2 + $0xe0] sm:$0xff] %vm286_vm2, %v5003_v32  ;;  %v4918_v45 = vpop.f32.mrf.mxu0  ;;  %v3039_v60 = vld [vmem:[#allocation2 + $0x120] sm:$0xff] }
 0x371   : > { %v3644_v52 = vld [vmem:[#allocation2 + $0xf8] sm:$0xff] }
 0x372   : > { %3441 = vst.msk [vmem:[#allocation2 + $0x100] sm:$0xff] %vm286_vm2, %v3393_v9  ;;  %v4002_v1 = vadd.f32 %v3920_v56, %v3644_v52  ;;  %v5201_v38 = vadd.f32 %v7391_v3, %v5149_v57  ;;  %v4419_v39 = vpop.f32.mrf.mxu3  ;;  %v4615_v9 = vld [vmem:[#allocation3 + $0x1a0] sm:$0xff] }
 0x373   : > { %v4145_v36 = vld [vmem:[#allocation2 + $0xf0] sm:$0xff]  ;;  %5867 = vmatmul.msk.f32.gmra.mxu0 %vm432_vm1, %v4614_v21 }
 0x374   : > { %4050 = vst.msk [vmem:[#allocation2 + $0xf8] sm:$0xff] %vm286_vm2, %v4002_v1  ;;  %v4503_v40 = vadd.f32 %v4419_v39, %v4145_v36 }
 0x375   : > { %5249 = vst.msk [vmem:[%s7151_s19 + $0xd8] sm:$0xff] %vm286_vm2, %v5201_v38  ;;  %v4646_v42 = vld [vmem:[#allocation2 + $0xe8] sm:$0xff] }
 0x376   : > { %v3923_v8 = vpop.f32.mrf.mxu2  ;;  %4551 = vst.msk [vmem:[#allocation2 + $0xf0] sm:$0xff] %vm286_vm2, %v4503_v40  ;;  %v5004_v5 = vadd.f32 %v4918_v45, %v4646_v42 }
 0x377   : > { %v3316_v11 = vpop.f32.mrf.mxu1  ;;  %v5102_v48 = vld [vmem:[#allocation2 + $0xe0] sm:$0xff] }
 0x378   : > { %v3394_v14 = vadd.f32 %v3316_v11, %v3036_v10  ;;  %v5150_v51 = vmul.f32 0.16666667, %v5102_v48  ;;  %5052 = vst.msk [vmem:[#allocation2 + $0xe8] sm:$0xff] %vm286_vm2, %v5004_v5  ;;  %v4921_v61 = vpop.f32.mrf.mxu0  ;;  %v3040_v11 = vld [vmem:[#allocation2 + $0x128] sm:$0xff] }
 0x379   : > { %v3645_v16 = vld [vmem:[#allocation2 + $0x100] sm:$0xff] }
 0x37a   : > { %3442 = vst.msk [vmem:[#allocation2 + $0x108] sm:$0xff] %vm286_vm2, %v3394_v14  ;;  %v4003_v19 = vadd.f32 %v3923_v8, %v3645_v16  ;;  %v5202_v54 = vadd.f32 %v7391_v3, %v5150_v51  ;;  %v4422_v50 = vpop.f32.mrf.mxu3  ;;  %v4616_v14 = vld [vmem:[#allocation3 + $0x1a8] sm:$0xff] }
 0x37b   : > { %v4146_v53 = vld [vmem:[#allocation2 + $0xf8] sm:$0xff]  ;;  %5868 = vmatmul.msk.f32.gmra.mxu0 %vm432_vm1, %v4615_v9 }
 0x37c   : > { %4051 = vst.msk [vmem:[#allocation2 + $0x100] sm:$0xff] %vm286_vm2, %v4003_v19  ;;  %v4504_v56 = vadd.f32 %v4422_v50, %v4146_v53 }
 0x37d   : > { %5250 = vst.msk [vmem:[%s7151_s19 + $0xe0] sm:$0xff] %vm286_vm2, %v5202_v54  ;;  %v4647_v59 = vld [vmem:[#allocation2 + $0xf0] sm:$0xff] }
 0x37e   : > { %v3926_v26 = vpop.f32.mrf.mxu2  ;;  %4552 = vst.msk [vmem:[#allocation2 + $0xf8] sm:$0xff] %vm286_vm2, %v4504_v56  ;;  %v5005_v52 = vadd.f32 %v4921_v61, %v4647_v59  ;;  %v3043_v59 = vld [vmem:[#allocation2 + $0x140] sm:$0xff] }
 0x37f   : > { %v3319_v28 = vpop.f32.mrf.mxu1  ;;  %v5103_v1 = vld [vmem:[#allocation2 + $0xe8] sm:$0xff] }
 0x380   : > { %v3395_v31 = vadd.f32 %v3319_v28, %v3037_v27  ;;  %v5151_v4 = vmul.f32 0.16666667, %v5103_v1  ;;  %5053 = vst.msk [vmem:[#allocation2 + $0xf0] sm:$0xff] %vm286_vm2, %v5005_v52  ;;  %v4924_v13 = vpop.f32.mrf.mxu0  ;;  %v3041_v28 = vld [vmem:[#allocation2 + $0x130] sm:$0xff] }
 0x381   : > { %v3646_v34 = vld [vmem:[#allocation2 + $0x108] sm:$0xff] }
 0x382   : > { %3443 = vst.msk [vmem:[#allocation2 + $0x110] sm:$0xff] %vm286_vm2, %v3395_v31  ;;  %v4004_v37 = vadd.f32 %v3926_v26, %v3646_v34  ;;  %v5203_v7 = vadd.f32 %v7391_v3, %v5151_v4  ;;  %v4425_v55 = vpop.f32.mrf.mxu3 }
 0x383   : > { %v4147_v6 = vld [vmem:[#allocation2 + $0x100] sm:$0xff]  ;;  %5869 = vmatmul.msk.f32.gmra.mxu0 %vm432_vm1, %v4616_v14 }
 0x384   : > { %4052 = vst.msk [vmem:[#allocation2 + $0x108] sm:$0xff] %vm286_vm2, %v4004_v37  ;;  %v4505_v8 = vadd.f32 %v4425_v55, %v4147_v6 }
 0x385   : > { %5251 = vst.msk [vmem:[%s7151_s19 + $0xe8] sm:$0xff] %vm286_vm2, %v5203_v7  ;;  %v4648_v10 = vld [vmem:[#allocation2 + $0xf8] sm:$0xff] }
 0x386   : > { %v3929_v41 = vpop.f32.mrf.mxu2  ;;  %4553 = vst.msk [vmem:[#allocation2 + $0x100] sm:$0xff] %vm286_vm2, %v4505_v8  ;;  %v5006_v16 = vadd.f32 %v4924_v13, %v4648_v10 }
 0x387   : > { %v3322_v43 = vpop.f32.mrf.mxu1  ;;  %v5104_v19 = vld [vmem:[#allocation2 + $0xf0] sm:$0xff] }
 0x388   : > { %v3396_v46 = vadd.f32 %v3322_v43, %v3038_v44  ;;  %v5152_v22 = vmul.f32 0.16666667, %v5104_v19  ;;  %5054 = vst.msk [vmem:[#allocation2 + $0xf8] sm:$0xff] %vm286_vm2, %v5006_v16  ;;  %v4927_v30 = vpop.f32.mrf.mxu0  ;;  %v3042_v44 = vld [vmem:[#allocation2 + $0x138] sm:$0xff] }
 0x389   : > { %v3647_v47 = vld [vmem:[#allocation2 + $0x110] sm:$0xff] }
 0x38a   : > { %3444 = vst.msk [vmem:[#allocation2 + $0x118] sm:$0xff] %vm286_vm2, %v3396_v46  ;;  %v4005_v49 = vadd.f32 %v3929_v41, %v3647_v47  ;;  %v5204_v24 = vadd.f32 %v7391_v3, %v5152_v22  ;;  %v4428_v33 = vpop.f32.mrf.mxu3 }
 0x38b   : > { %v4148_v23 = vld [vmem:[#allocation2 + $0x108] sm:$0xff] }
 0x38c   : > { %4053 = vst.msk [vmem:[#allocation2 + $0x110] sm:$0xff] %vm286_vm2, %v4005_v49  ;;  %v4506_v26 = vadd.f32 %v4428_v33, %v4148_v23 }
 0x38d   : > { %5252 = vst.msk [vmem:[%s7151_s19 + $0xf0] sm:$0xff] %vm286_vm2, %v5204_v24  ;;  %v4649_v27 = vld [vmem:[#allocation2 + $0x100] sm:$0xff] }
 0x38e   : > { %v3932_v58 = vpop.f32.mrf.mxu2  ;;  %4554 = vst.msk [vmem:[#allocation2 + $0x108] sm:$0xff] %vm286_vm2, %v4506_v26  ;;  %v5007_v32 = vadd.f32 %v4927_v30, %v4649_v27  ;;  %v3045_v26 = vld [vmem:[#allocation2 + $0x150] sm:$0xff] }
 0x38f   : > { %v3325_v25 = vpop.f32.mrf.mxu1  ;;  %v5105_v35 = vld [vmem:[#allocation2 + $0xf8] sm:$0xff] }
 0x390   : > { %v3397_v63 = vadd.f32 %v3325_v25, %v3039_v60  ;;  %v5153_v57 = vmul.f32 0.16666667, %v5105_v35  ;;  %5055 = vst.msk [vmem:[#allocation2 + $0x100] sm:$0xff] %vm286_vm2, %v5007_v32  ;;  %v4930_v45 = vpop.f32.mrf.mxu0 }
 0x391   : > { %v3648_v0 = vld [vmem:[#allocation2 + $0x118] sm:$0xff] }
 0x392   : > { %3445 = vst.msk [vmem:[#allocation2 + $0x120] sm:$0xff] %vm286_vm2, %v3397_v63  ;;  %v4006_v2 = vadd.f32 %v3932_v58, %v3648_v0  ;;  %v5205_v38 = vadd.f32 %v7391_v3, %v5153_v57  ;;  %v4431_v39 = vpop.f32.mrf.mxu3 }
 0x393   : > { %v4149_v36 = vld [vmem:[#allocation2 + $0x110] sm:$0xff] }
 0x394   : > { %4054 = vst.msk [vmem:[#allocation2 + $0x118] sm:$0xff] %vm286_vm2, %v4006_v2  ;;  %v4507_v40 = vadd.f32 %v4431_v39, %v4149_v36 }
 0x395   : > { %5253 = vst.msk [vmem:[%s7151_s19 + $0xf8] sm:$0xff] %vm286_vm2, %v5205_v38  ;;  %v4650_v42 = vld [vmem:[#allocation2 + $0x108] sm:$0xff] }
 0x396   : > { %v3935_v29 = vpop.f32.mrf.mxu2  ;;  %4555 = vst.msk [vmem:[#allocation2 + $0x110] sm:$0xff] %vm286_vm2, %v4507_v40  ;;  %v5008_v46 = vadd.f32 %v4930_v45, %v4650_v42  ;;  %v3046_v40 = vld [vmem:[#allocation2 + $0x158] sm:$0xff] }
 0x397   : > { %v3328_v12 = vpop.f32.mrf.mxu1  ;;  %v5106_v47 = vld [vmem:[#allocation2 + $0x100] sm:$0xff] }
 0x398   : > { %v3398_v15 = vadd.f32 %v3328_v12, %v3040_v11  ;;  %v5154_v49 = vmul.f32 0.16666667, %v5106_v47  ;;  %5056 = vst.msk [vmem:[#allocation2 + $0x108] sm:$0xff] %vm286_vm2, %v5008_v46  ;;  %v4933_v25 = vpop.f32.mrf.mxu0 }
 0x399   : > { %v3649_v18 = vld [vmem:[#allocation2 + $0x120] sm:$0xff] }
 0x39a   : > { %3446 = vst.msk [vmem:[#allocation2 + $0x128] sm:$0xff] %vm286_vm2, %v3398_v15  ;;  %v4007_v20 = vadd.f32 %v3935_v29, %v3649_v18  ;;  %v5206_v53 = vadd.f32 %v7391_v3, %v5154_v49  ;;  %v4434_v54 = vpop.f32.mrf.mxu3  ;;  %v3044_v29 = vld [vmem:[#allocation2 + $0x148] sm:$0xff] }
 0x39b   : > { %v4150_v51 = vld [vmem:[#allocation2 + $0x118] sm:$0xff] }
 0x39c   : > { %4055 = vst.msk [vmem:[#allocation2 + $0x120] sm:$0xff] %vm286_vm2, %v4007_v20  ;;  %v4508_v50 = vadd.f32 %v4434_v54, %v4150_v51 }
 0x39d   : > { %5254 = vst.msk [vmem:[%s7151_s19 + $0x100] sm:$0xff] %vm286_vm2, %v5206_v53  ;;  %v4651_v58 = vld [vmem:[#allocation2 + $0x110] sm:$0xff] }
 0x39e   : > { %v3938_v62 = vpop.f32.mrf.mxu2  ;;  %4556 = vst.msk [vmem:[#allocation2 + $0x118] sm:$0xff] %vm286_vm2, %v4508_v50  ;;  %v5009_v9 = vadd.f32 %v4933_v25, %v4651_v58  ;;  %v3047_v50 = vld [vmem:[#allocation2 + $0x160] sm:$0xff] }
 0x39f   : > { %v3331_v17 = vpop.f32.mrf.mxu1  ;;  %v5107_v52 = vld [vmem:[#allocation2 + $0x108] sm:$0xff] }
 0x3a0   : > { %v3399_v31 = vadd.f32 %v3331_v17, %v3041_v28  ;;  %v5155_v1 = vmul.f32 0.16666667, %v5107_v52  ;;  %5057 = vst.msk [vmem:[#allocation2 + $0x110] sm:$0xff] %vm286_vm2, %v5009_v9  ;;  %v4936_v11 = vpop.f32.mrf.mxu0 }
 0x3a1   : > { %v3650_v34 = vld [vmem:[#allocation2 + $0x128] sm:$0xff] }
 0x3a2   : > { %3447 = vst.msk [vmem:[#allocation2 + $0x130] sm:$0xff] %vm286_vm2, %v3399_v31  ;;  %v4008_v37 = vadd.f32 %v3938_v62, %v3650_v34  ;;  %v5207_v4 = vadd.f32 %v7391_v3, %v5155_v1  ;;  %v4437_v6 = vpop.f32.mrf.mxu3 }
 0x3a3   : > { %v4151_v2 = vld [vmem:[#allocation2 + $0x120] sm:$0xff] }
 0x3a4   : > { %4056 = vst.msk [vmem:[#allocation2 + $0x128] sm:$0xff] %vm286_vm2, %v4008_v37  ;;  %v4509_v7 = vadd.f32 %v4437_v6, %v4151_v2 }
 0x3a5   : > { %5255 = vst.msk [vmem:[%s7151_s19 + $0x108] sm:$0xff] %vm286_vm2, %v5207_v4  ;;  %v4652_v8 = vld [vmem:[#allocation2 + $0x118] sm:$0xff] }
 0x3a6   : > { %v3941_v41 = vpop.f32.mrf.mxu2  ;;  %4557 = vst.msk [vmem:[#allocation2 + $0x120] sm:$0xff] %vm286_vm2, %v4509_v7  ;;  %v5010_v13 = vadd.f32 %v4936_v11, %v4652_v8  ;;  %v3048_v7 = vld [vmem:[#allocation2 + $0x168] sm:$0xff] }
 0x3a7   : > { %v3334_v43 = vpop.f32.mrf.mxu1  ;;  %v5108_v15 = vld [vmem:[#allocation2 + $0x110] sm:$0xff] }
 0x3a8   : > { %v3400_v21 = vadd.f32 %v3334_v43, %v3042_v44  ;;  %v5156_v18 = vmul.f32 0.16666667, %v5108_v15  ;;  %5058 = vst.msk [vmem:[#allocation2 + $0x118] sm:$0xff] %vm286_vm2, %v5010_v13  ;;  %v4939_v27 = vpop.f32.mrf.mxu0 }
 0x3a9   : > { %v3651_v5 = vld [vmem:[#allocation2 + $0x130] sm:$0xff] }
 0x3aa   : > { %3448 = vst.msk [vmem:[#allocation2 + $0x138] sm:$0xff] %vm286_vm2, %v3400_v21  ;;  %v4009_v48 = vadd.f32 %v3941_v41, %v3651_v5  ;;  %v5208_v20 = vadd.f32 %v7391_v3, %v5156_v18  ;;  %v4440_v22 = vpop.f32.mrf.mxu3 }
 0x3ab   : > { %v4152_v19 = vld [vmem:[#allocation2 + $0x128] sm:$0xff] }
 0x3ac   : > { %4057 = vst.msk [vmem:[#allocation2 + $0x130] sm:$0xff] %vm286_vm2, %v4009_v48  ;;  %v4510_v23 = vadd.f32 %v4440_v22, %v4152_v19 }
 0x3ad   : > { %5256 = vst.msk [vmem:[%s7151_s19 + $0x110] sm:$0xff] %vm286_vm2, %v5208_v20  ;;  %v4653_v33 = vld [vmem:[#allocation2 + $0x120] sm:$0xff] }
 0x3ae   : > { %v3944_v56 = vpop.f32.mrf.mxu2  ;;  %4558 = vst.msk [vmem:[#allocation2 + $0x128] sm:$0xff] %vm286_vm2, %v4510_v23  ;;  %v5011_v17 = vadd.f32 %v4939_v27, %v4653_v33  ;;  %v3049_v23 = vld [vmem:[#allocation2 + $0x170] sm:$0xff] }
 0x3af   : > { %v3337_v60 = vpop.f32.mrf.mxu1  ;;  %v5109_v31 = vld [vmem:[#allocation2 + $0x118] sm:$0xff] }
 0x3b0   : > { %v3401_v61 = vadd.f32 %v3337_v60, %v3043_v59  ;;  %v5157_v34 = vmul.f32 0.16666667, %v5109_v31  ;;  %5059 = vst.msk [vmem:[#allocation2 + $0x120] sm:$0xff] %vm286_vm2, %v5011_v17  ;;  %v4942_v42 = vpop.f32.mrf.mxu0 }
 0x3b1   : > { %v3652_v63 = vld [vmem:[#allocation2 + $0x138] sm:$0xff] }
 0x3b2   : > { %3449 = vst.msk [vmem:[#allocation2 + $0x140] sm:$0xff] %vm286_vm2, %v3401_v61  ;;  %v4010_v0 = vadd.f32 %v3944_v56, %v3652_v63  ;;  %v5209_v37 = vadd.f32 %v7391_v3, %v5157_v34  ;;  %v4443_v57 = vpop.f32.mrf.mxu3 }
 0x3b3   : > { %v4153_v35 = vld [vmem:[#allocation2 + $0x130] sm:$0xff] }
 0x3b4   : > { %4058 = vst.msk [vmem:[#allocation2 + $0x138] sm:$0xff] %vm286_vm2, %v4010_v0  ;;  %v4511_v36 = vadd.f32 %v4443_v57, %v4153_v35 }
 0x3b5   : > { %5257 = vst.msk [vmem:[%s7151_s19 + $0x118] sm:$0xff] %vm286_vm2, %v5209_v37  ;;  %v4654_v39 = vld [vmem:[#allocation2 + $0x128] sm:$0xff] }
 0x3b6   : > { %v3947_v55 = vpop.f32.mrf.mxu2  ;;  %4559 = vst.msk [vmem:[#allocation2 + $0x130] sm:$0xff] %vm286_vm2, %v4511_v36  ;;  %v5012_v43 = vadd.f32 %v4942_v42, %v4654_v39  ;;  %v3050_v36 = vld [vmem:[#allocation2 + $0x178] sm:$0xff] }
 0x3b7   : > { %v3340_v10 = vpop.f32.mrf.mxu1  ;;  %v5110_v21 = vld [vmem:[#allocation2 + $0x120] sm:$0xff] }
 0x3b8   : > { %v3402_v12 = vadd.f32 %v3340_v10, %v3044_v29  ;;  %v5158_v5 = vmul.f32 0.16666667, %v5110_v21  ;;  %5060 = vst.msk [vmem:[#allocation2 + $0x128] sm:$0xff] %vm286_vm2, %v5012_v43  ;;  %v4945_v58 = vpop.f32.mrf.mxu0 }
 0x3b9   : > { %v3653_v14 = vld [vmem:[#allocation2 + $0x140] sm:$0xff] }
 0x3ba   : > { %3450 = vst.msk [vmem:[#allocation2 + $0x148] sm:$0xff] %vm286_vm2, %v3402_v12  ;;  %v4011_v16 = vadd.f32 %v3947_v55, %v3653_v14  ;;  %v5210_v48 = vadd.f32 %v7391_v3, %v5158_v5  ;;  %v4446_v49 = vpop.f32.mrf.mxu3 }
 0x3bb   : > { %v4154_v47 = vld [vmem:[#allocation2 + $0x138] sm:$0xff] }
 0x3bc   : > { %4059 = vst.msk [vmem:[#allocation2 + $0x140] sm:$0xff] %vm286_vm2, %v4011_v16  ;;  %v4512_v51 = vadd.f32 %v4446_v49, %v4154_v47 }
 0x3bd   : > { %5258 = vst.msk [vmem:[%s7151_s19 + $0x120] sm:$0xff] %vm286_vm2, %v5210_v48  ;;  %v4655_v54 = vld [vmem:[#allocation2 + $0x130] sm:$0xff] }
 0x3be   : > { %v3950_v24 = vpop.f32.mrf.mxu2  ;;  %4560 = vst.msk [vmem:[#allocation2 + $0x138] sm:$0xff] %vm286_vm2, %v4512_v51  ;;  %v5013_v60 = vadd.f32 %v4945_v58, %v4655_v54 }
 0x3bf   : > { %v3343_v62 = vpop.f32.mrf.mxu1  ;;  %v5111_v61 = vld [vmem:[#allocation2 + $0x128] sm:$0xff] }
 0x3c0   : > { %v3403_v28 = vadd.f32 %v3343_v62, %v3045_v26  ;;  %v5159_v63 = vmul.f32 0.16666667, %v5111_v61  ;;  %5061 = vst.msk [vmem:[#allocation2 + $0x130] sm:$0xff] %vm286_vm2, %v5013_v60  ;;  %v4948_v8 = vpop.f32.mrf.mxu0 }
 0x3c1   : > { %v3654_v30 = vld [vmem:[#allocation2 + $0x148] sm:$0xff] }
 0x3c2   : > { %3451 = vst.msk [vmem:[#allocation2 + $0x150] sm:$0xff] %vm286_vm2, %v3403_v28  ;;  %v4012_v32 = vadd.f32 %v3950_v24, %v3654_v30  ;;  %v5211_v0 = vadd.f32 %v7391_v3, %v5159_v63  ;;  %v4449_v1 = vpop.f32.mrf.mxu3 }
 0x3c3   : > { %v4155_v52 = vld [vmem:[#allocation2 + $0x140] sm:$0xff] }
 0x3c4   : > { %4060 = vst.msk [vmem:[#allocation2 + $0x148] sm:$0xff] %vm286_vm2, %v4012_v32  ;;  %v4513_v2 = vadd.f32 %v4449_v1, %v4155_v52 }
 0x3c5   : > { %5259 = vst.msk [vmem:[%s7151_s19 + $0x128] sm:$0xff] %vm286_vm2, %v5211_v0  ;;  %v4656_v6 = vld [vmem:[#allocation2 + $0x138] sm:$0xff] }
 0x3c6   : > { %v3953_v38 = vpop.f32.mrf.mxu2  ;;  %4561 = vst.msk [vmem:[#allocation2 + $0x140] sm:$0xff] %vm286_vm2, %v4513_v2  ;;  %v5014_v10 = vadd.f32 %v4948_v8, %v4656_v6 }
 0x3c7   : > { %v3346_v41 = vpop.f32.mrf.mxu1  ;;  %v5112_v12 = vld [vmem:[#allocation2 + $0x130] sm:$0xff] }
 0x3c8   : > { %v3404_v44 = vadd.f32 %v3346_v41, %v3046_v40  ;;  %v5160_v14 = vmul.f32 0.16666667, %v5112_v12  ;;  %5062 = vst.msk [vmem:[#allocation2 + $0x138] sm:$0xff] %vm286_vm2, %v5014_v10  ;;  %v4951_v33 = vpop.f32.mrf.mxu0 }
 0x3c9   : > { %v3655_v45 = vld [vmem:[#allocation2 + $0x150] sm:$0xff] }
 0x3ca   : > { %3452 = vst.msk [vmem:[#allocation2 + $0x158] sm:$0xff] %vm286_vm2, %v3404_v44  ;;  %v4013_v46 = vadd.f32 %v3953_v38, %v3655_v45  ;;  %v5212_v16 = vadd.f32 %v7391_v3, %v5160_v14  ;;  %v4452_v18 = vpop.f32.mrf.mxu3 }
 0x3cb   : > { %v4156_v15 = vld [vmem:[#allocation2 + $0x148] sm:$0xff] }
 0x3cc   : > { %4061 = vst.msk [vmem:[#allocation2 + $0x150] sm:$0xff] %vm286_vm2, %v4013_v46  ;;  %v4514_v19 = vadd.f32 %v4452_v18, %v4156_v15 }
 0x3cd   : > { %5260 = vst.msk [vmem:[%s7151_s19 + $0x130] sm:$0xff] %vm286_vm2, %v5212_v16  ;;  %v4657_v22 = vld [vmem:[#allocation2 + $0x140] sm:$0xff] }
 0x3ce   : > { %v3956_v53 = vpop.f32.mrf.mxu2  ;;  %4562 = vst.msk [vmem:[#allocation2 + $0x148] sm:$0xff] %vm286_vm2, %v4514_v19  ;;  %v5015_v62 = vadd.f32 %v4951_v33, %v4657_v22 }
 0x3cf   : > { %v3349_v56 = vpop.f32.mrf.mxu1  ;;  %v5113_v28 = vld [vmem:[#allocation2 + $0x138] sm:$0xff] }
 0x3d0   : > { %v3405_v59 = vadd.f32 %v3349_v56, %v3047_v50  ;;  %v5161_v30 = vmul.f32 0.16666667, %v5113_v28  ;;  %5063 = vst.msk [vmem:[#allocation2 + $0x140] sm:$0xff] %vm286_vm2, %v5015_v62  ;;  %v4954_v39 = vpop.f32.mrf.mxu0 }
 0x3d1   : > { %v3656_v25 = vld [vmem:[#allocation2 + $0x158] sm:$0xff] }
 0x3d2   : > { %3453 = vst.msk [vmem:[#allocation2 + $0x160] sm:$0xff] %vm286_vm2, %v3405_v59  ;;  %v4014_v9 = vadd.f32 %v3956_v53, %v3656_v25  ;;  %v5213_v32 = vadd.f32 %v7391_v3, %v5161_v30  ;;  %v4455_v34 = vpop.f32.mrf.mxu3 }
 0x3d3   : > { %v4157_v31 = vld [vmem:[#allocation2 + $0x150] sm:$0xff] }
 0x3d4   : > { %4062 = vst.msk [vmem:[#allocation2 + $0x158] sm:$0xff] %vm286_vm2, %v4014_v9  ;;  %v4515_v35 = vadd.f32 %v4455_v34, %v4157_v31 }
 0x3d5   : > { %5261 = vst.msk [vmem:[%s7151_s19 + $0x138] sm:$0xff] %vm286_vm2, %v5213_v32  ;;  %v4658_v57 = vld [vmem:[#allocation2 + $0x148] sm:$0xff] }
 0x3d6   : > { %v3959_v4 = vpop.f32.mrf.mxu2  ;;  %4563 = vst.msk [vmem:[#allocation2 + $0x150] sm:$0xff] %vm286_vm2, %v4515_v35  ;;  %v5016_v41 = vadd.f32 %v4954_v39, %v4658_v57 }
 0x3d7   : > { %v3352_v55 = vpop.f32.mrf.mxu1  ;;  %v5114_v44 = vld [vmem:[#allocation2 + $0x140] sm:$0xff] }
 0x3d8   : > { %v3406_v29 = vadd.f32 %v3352_v55, %v3048_v7  ;;  %v5162_v45 = vmul.f32 0.16666667, %v5114_v44  ;;  %5064 = vst.msk [vmem:[#allocation2 + $0x148] sm:$0xff] %vm286_vm2, %v5016_v41  ;;  %v4957_v51 = vpop.f32.mrf.mxu0 }
 0x3d9   : > { %v3657_v11 = vld [vmem:[#allocation2 + $0x160] sm:$0xff] }
 0x3da   : > { %3454 = vst.msk [vmem:[#allocation2 + $0x168] sm:$0xff] %vm286_vm2, %v3406_v29  ;;  %v4015_v13 = vadd.f32 %v3959_v4, %v3657_v11  ;;  %v5214_v46 = vadd.f32 %v7391_v3, %v5162_v45  ;;  %v4458_v5 = vpop.f32.mrf.mxu3  ;;  %v5904_v3 = vld [vmem:[%s7642_s2] ss:$0 sm:$0xff] }
 0x3db   : > { %v4158_v21 = vld [vmem:[#allocation2 + $0x158] sm:$0xff] }
 0x3dc   : > { %4063 = vst.msk [vmem:[#allocation2 + $0x160] sm:$0xff] %vm286_vm2, %v4015_v13  ;;  %v4516_v47 = vadd.f32 %v4458_v5, %v4158_v21 }
 0x3dd   : > { %5262 = vst.msk [vmem:[%s7151_s19 + $0x140] sm:$0xff] %vm286_vm2, %v5214_v46  ;;  %v4659_v48 = vld [vmem:[#allocation2 + $0x150] sm:$0xff] }
 0x3de   : > { %v3962_v20 = vpop.f32.mrf.mxu2  ;;  %4564 = vst.msk [vmem:[#allocation2 + $0x158] sm:$0xff] %vm286_vm2, %v4516_v47  ;;  %v5017_v53 = vadd.f32 %v4957_v51, %v4659_v48 }
 0x3df   : > { %v3355_v24 = vpop.f32.mrf.mxu1  ;;  %v5115_v50 = vld [vmem:[#allocation2 + $0x148] sm:$0xff] }
 0x3e0   : > { %v3407_v26 = vadd.f32 %v3355_v24, %v3049_v23  ;;  %v5163_v58 = vmul.f32 0.16666667, %v5115_v50  ;;  %5065 = vst.msk [vmem:[#allocation2 + $0x150] sm:$0xff] %vm286_vm2, %v5017_v53  ;;  %v4960_v63 = vpop.f32.mrf.mxu0 }
 0x3e1   : > { %v3658_v27 = vld [vmem:[#allocation2 + $0x168] sm:$0xff] }
 0x3e2   : > { %3455 = vst.msk [vmem:[#allocation2 + $0x170] sm:$0xff] %vm286_vm2, %v3407_v26  ;;  %v4016_v17 = vadd.f32 %v3962_v20, %v3658_v27  ;;  %v5215_v60 = vadd.f32 %v5904_v3, %v5163_v58  ;;  %v4461_v25 = vpop.f32.mrf.mxu3 }
 0x3e3   : > { %v4159_v59 = vld [vmem:[#allocation2 + $0x160] sm:$0xff] }
 0x3e4   : > { %4064 = vst.msk [vmem:[#allocation2 + $0x168] sm:$0xff] %vm286_vm2, %v4016_v17  ;;  %v4517_v61 = vadd.f32 %v4461_v25, %v4159_v59 }
 0x3e5   : > { %5263 = vst.msk [vmem:[%s7151_s19 + $0x148] sm:$0xff] %vm286_vm2, %v5215_v60  ;;  %v4660_v9 = vld [vmem:[#allocation2 + $0x158] sm:$0xff] }
 0x3e6   : > { %v3965_v37 = vpop.f32.mrf.mxu2  ;;  %4565 = vst.msk [vmem:[#allocation2 + $0x160] sm:$0xff] %vm286_vm2, %v4517_v61  ;;  %v5018_v52 = vadd.f32 %v4960_v63, %v4660_v9 }
 0x3e7   : > { %v3358_v38 = vpop.f32.mrf.mxu1  ;;  %v5116_v0 = vld [vmem:[#allocation2 + $0x150] sm:$0xff] }
 0x3e8   : > { %v3408_v40 = vadd.f32 %v3358_v38, %v3050_v36  ;;  %v5164_v1 = vmul.f32 0.16666667, %v5116_v0  ;;  %5066 = vst.msk [vmem:[#allocation2 + $0x158] sm:$0xff] %vm286_vm2, %v5018_v52  ;;  %v4963_v8 = vpop.f32.mrf.mxu0 }
 0x3e9   : > { %v3659_v42 = vld [vmem:[#allocation2 + $0x170] sm:$0xff] }
 0x3ea   : > { %3456 = vst.msk [vmem:[#allocation2 + $0x178] sm:$0xff] %vm286_vm2, %v3408_v40  ;;  %v4017_v43 = vadd.f32 %v3965_v37, %v3659_v42  ;;  %v5216_v4 = vadd.f32 %v5904_v3, %v5164_v1  ;;  %v4464_v6 = vpop.f32.mrf.mxu3 }
 0x3eb   : > { %v4160_v2 = vld [vmem:[#allocation2 + $0x168] sm:$0xff] }
 0x3ec   : > { %4065 = vst.msk [vmem:[#allocation2 + $0x170] sm:$0xff] %vm286_vm2, %v4017_v43  ;;  %v4518_v7 = vadd.f32 %v4464_v6, %v4160_v2 }
 0x3ed   : > { %5264 = vst.msk [vmem:[%s7151_s19 + $0x150] sm:$0xff] %vm286_vm2, %v5216_v4  ;;  %v4661_v55 = vld [vmem:[#allocation2 + $0x160] sm:$0xff] }
 0x3ee   : > { %v3968_v49 = vpop.f32.mrf.mxu2  ;;  %4566 = vst.msk [vmem:[#allocation2 + $0x168] sm:$0xff] %vm286_vm2, %v4518_v7  ;;  %v5019_v29 = vadd.f32 %v4963_v8, %v4661_v55 }
 0x3ef   : > { %v5117_v10 = vld [vmem:[#allocation2 + $0x158] sm:$0xff] }
 0x3f0   : > { %v5165_v11 = vmul.f32 0.16666667, %v5117_v10  ;;  %5067 = vst.msk [vmem:[#allocation2 + $0x160] sm:$0xff] %vm286_vm2, %v5019_v29  ;;  %v4966_v18 = vpop.f32.mrf.mxu0 }
 0x3f1   : > { %v3660_v54 = vld [vmem:[#allocation2 + $0x178] sm:$0xff] }
 0x3f2   : > { %v4018_v56 = vadd.f32 %v3968_v49, %v3660_v54  ;;  %v5217_v13 = vadd.f32 %v5904_v3, %v5165_v11  ;;  %v4467_v14 = vpop.f32.mrf.mxu3 }
 0x3f3   : > { %v4161_v12 = vld [vmem:[#allocation2 + $0x170] sm:$0xff] }
 0x3f4   : > { %4066 = vst.msk [vmem:[#allocation2 + $0x178] sm:$0xff] %vm286_vm2, %v4018_v56  ;;  %v4519_v15 = vadd.f32 %v4467_v14, %v4161_v12 }
 0x3f5   : > { %5265 = vst.msk [vmem:[%s7151_s19 + $0x158] sm:$0xff] %vm286_vm2, %v5217_v13  ;;  %v4662_v16 = vld [vmem:[#allocation2 + $0x168] sm:$0xff] }
 0x3f6   : > { %4567 = vst.msk [vmem:[#allocation2 + $0x170] sm:$0xff] %vm286_vm2, %v4519_v15  ;;  %v5020_v19 = vadd.f32 %v4966_v18, %v4662_v16 }
 0x3f7   : > { %v5118_v20 = vld [vmem:[#allocation2 + $0x160] sm:$0xff] }
 0x3f8   : > { %v5166_v22 = vmul.f32 0.16666667, %v5118_v20  ;;  %5068 = vst.msk [vmem:[#allocation2 + $0x168] sm:$0xff] %vm286_vm2, %v5020_v19  ;;  %v4969_v27 = vpop.f32.mrf.mxu0 }
 0x3fa   : > { %v5218_v24 = vadd.f32 %v5904_v3, %v5166_v22  ;;  %v4470_v33 = vpop.f32.mrf.mxu3 }
 0x3fb   : > { %v4162_v23 = vld [vmem:[#allocation2 + $0x178] sm:$0xff] }
 0x3fc   : > { %v4520_v26 = vadd.f32 %v4470_v33, %v4162_v23  ;;  %5266 = vst.msk [vmem:[%s7151_s19 + $0x160] sm:$0xff] %vm286_vm2, %v5218_v24 }
 0x3fd   : > { %v4663_v62 = vld [vmem:[#allocation2 + $0x170] sm:$0xff] }
 0x3fe   : > { %4568 = vst.msk [vmem:[#allocation2 + $0x178] sm:$0xff] %vm286_vm2, %v4520_v26  ;;  %v5021_v28 = vadd.f32 %v4969_v27, %v4663_v62 }
 0x3ff   : > { %v5119_v17 = vld [vmem:[#allocation2 + $0x168] sm:$0xff] }
 0x400   : > { %v5167_v30 = vmul.f32 0.16666667, %v5119_v17  ;;  %5069 = vst.msk [vmem:[#allocation2 + $0x170] sm:$0xff] %vm286_vm2, %v5021_v28  ;;  %v4972_v34 = vpop.f32.mrf.mxu0 }
 0x402   : > { %v5219_v31 = vadd.f32 %v5904_v3, %v5167_v30 }
 0x404   : > { %5267 = vst.msk [vmem:[%s7151_s19 + $0x168] sm:$0xff] %vm286_vm2, %v5219_v31 }
 0x405   : > { %v4664_v32 = vld [vmem:[#allocation2 + $0x178] sm:$0xff] }
 0x406   : > { %v5022_v35 = vadd.f32 %v4972_v34, %v4664_v32 }
 0x407   : > { %v5120_v37 = vld [vmem:[#allocation2 + $0x170] sm:$0xff] }
 0x408   : > { %v5168_v57 = vmul.f32 0.16666667, %v5120_v37  ;;  %5070 = vst.msk [vmem:[#allocation2 + $0x178] sm:$0xff] %vm286_vm2, %v5022_v35 }
 0x40a   : > { %v5220_v36 = vadd.f32 %v5904_v3, %v5168_v57 }
 0x40c   : > { %5268 = vst.msk [vmem:[%s7151_s19 + $0x170] sm:$0xff] %vm286_vm2, %v5220_v36 }
 0x40f   : > { %v5121_v38 = vld [vmem:[#allocation2 + $0x178] sm:$0xff] }
 0x410   : > { %v5169_v39 = vmul.f32 0.16666667, %v5121_v38 }
 0x412   : > { %v5221_v40 = vadd.f32 %v5904_v3, %v5169_v39 }
 0x414   : > { %5269 = vst.msk [vmem:[%s7151_s19 + $0x178] sm:$0xff] %vm286_vm2, %v5221_v40 }
 0x415 PF: > { %s13_s14 = sadd.s32 1, %s5927_s14   ;;  %s7644_s12 = smov %s5923_s13 }
 0x416   : > { %p10_p5 = scmp.ge.s32.totalorder %s13_s14, 4   ;;  %s7645_s13 = smov %s7647_s15 }
 0x418   :  { %12 = sbr.rel (!%p10_p5) target bundleno = 2 (0x2), region = 84 }

</bundles_post_ra>
